<compile_context>
chip_gen: v5e
topology: v5e:2x2
jax: 0.10.0
libtpu: 0.0.40
codegen_flags: <defaults>
</compile_context>

<pallas_src>
import functools
import math

import jax
import jax.numpy as jnp
from jax.experimental import pallas as pl
from jax.experimental.pallas import tpu as pltpu


def _round_up(x, m):
    return (x + m - 1) // m * m


# -----------------------------------------------------------------------------
# Pass 1: dilated conv (bf16 MXU, f32 accumulate) + per-block BN partial stats
# -----------------------------------------------------------------------------
def _conv_stats_kernel(x_ref, w_ref, conv_ref, stats_ref, acc_ref, *, dilation):
    """Grid = (N, Cout tiles, Cin tiles);  the Cin axis is the reduction.

    x_ref:     (1, Hp, Wp, TCI)   bf16  zero-padded NHWC input block
    w_ref:     (KH, KW, TCI, TCO) bf16  conv weight block (HWIO)
    conv_ref:  (1, H, W, TCO)     f32   conv output block (written on last ci)
    stats_ref: (1, 2, TCO)        f32   [sum, sum-of-squares] for this block
    acc_ref:   (H*W, TCO)         f32   VMEM accumulator scratch
    """
    _, H, W, _ = conv_ref.shape
    KH, KW, c_in, _ = w_ref.shape
    d = dilation
    ci = pl.program_id(2)

    @pl.when(ci == 0)
    def _init():
        acc_ref[...] = jnp.zeros_like(acc_ref)

    # Dilated KHxKW conv as KH*KW channel-contraction matmuls on the MXU,
    # accumulating in the f32 VMEM scratch.
    # TODO(synk): the per-tap (kw*d) window read along W is a shifted sublane
    # access; a full-width block + pltpu.roll would move the shift onto the XLU
    # at the cost of Wp/W extra MXU width.
    for kh in range(KH):
        for kw in range(KW):
            patch = x_ref[0, kh * d:kh * d + H, kw * d:kw * d + W, :]
            lhs = patch.reshape(H * W, c_in)
            acc_ref[...] += jnp.dot(lhs, w_ref[kh, kw],
                                    preferred_element_type=jnp.float32)

    @pl.when(ci == pl.num_programs(2) - 1)
    def _finalize():
        y = acc_ref[...]                                    # (H*W, TCO) f32
        conv_ref[0] = y.reshape(H, W, y.shape[-1])
        stats_ref[0, 0:1, :] = jnp.sum(y, axis=0, keepdims=True)
        stats_ref[0, 1:2, :] = jnp.sum(y * y, axis=0, keepdims=True)


# -----------------------------------------------------------------------------
# Pass 2: per-channel scale/shift (folded BatchNorm) + ReLU
# -----------------------------------------------------------------------------
def _bn_relu_kernel(conv_ref, scale_ref, shift_ref, out_ref):
    x = conv_ref[...]                                       # (1, H, W, TCO) f32
    s = scale_ref[...].reshape(1, 1, 1, -1)
    b = shift_ref[...].reshape(1, 1, 1, -1)
    out_ref[...] = jnp.maximum(x * s + b, 0.0)


# -----------------------------------------------------------------------------
# Wrapper
# -----------------------------------------------------------------------------
def aspp_module_forward(x_nchw, weight, gamma, beta, *, dilation, eps=1e-5):
    """x_nchw: (N, Cin, H, W); weight: (Cout, Cin, KH, KW) (PyTorch OIHW)."""
    N, Cin, H, W = x_nchw.shape
    Cout, _, KH, KW = weight.shape
    pad = dilation if KH > 1 else 0          # module: k=1/pad=0 or k=3/pad=d

    # Channel padding -> lane-dense MXU contraction (Cin) and output (Cout).
    ci_p = _round_up(Cin, 128)
    co_p = _round_up(Cout, 128)
    tci = 256 if ci_p % 256 == 0 else 128    # Cin reduction chunk (K per dot)
    tco = 256 if co_p % 256 == 0 else 128    # Cout tile (output lanes)
    n_ci = ci_p // tci
    n_co = co_p // tco
    hp, wp = H + 2 * pad, W + 2 * pad

    # Glue: NCHW -> NHWC, spatial zero-pad (conv halo), channel pad, bf16.
    x_nhwc = jnp.transpose(x_nchw, (0, 2, 3, 1))
    x_pad = jnp.pad(
        x_nhwc, ((0, 0), (pad, pad), (pad, pad), (0, ci_p - Cin))
    ).astype(jnp.bfloat16)
    w_hwio = jnp.transpose(weight, (2, 3, 1, 0))
    w_pad = jnp.pad(
        w_hwio, ((0, 0), (0, 0), (0, ci_p - Cin), (0, co_p - Cout))
    ).astype(jnp.bfloat16)

    conv_kernel = functools.partial(_conv_stats_kernel, dilation=dilation)

    conv_out, stats = pl.pallas_call(
        conv_kernel,
        out_shape=(
            jax.ShapeDtypeStruct((N, H, W, co_p), jnp.float32),
            jax.ShapeDtypeStruct((N, 2, co_p), jnp.float32),
        ),
        grid_spec=pltpu.PrefetchScalarGridSpec(
            num_scalar_prefetch=0,
            grid=(N, n_co, n_ci),
            in_specs=[
                pl.BlockSpec((1, hp, wp, tci), lambda n, co, ci: (n, 0, 0, ci)),
                pl.BlockSpec((KH, KW, tci, tco), lambda n, co, ci: (0, 0, ci, co)),
            ],
            out_specs=(
                pl.BlockSpec((1, H, W, tco), lambda n, co, ci: (n, 0, 0, co)),
                pl.BlockSpec((1, 2, tco), lambda n, co, ci: (n, 0, co)),
            ),
            scratch_shapes=[pltpu.VMEM((H * W, tco), jnp.float32)],
        ),
        compiler_params=pltpu.CompilerParams(
            dimension_semantics=("parallel", "parallel", "arbitrary"),
            vmem_limit_bytes=64 * 1024 * 1024,
        ),
    )(x_pad, w_pad)

    # BatchNorm2d (training-mode biased batch stats) folded to scale/shift.
    # TODO(synk): SynchronizedBatchNorm2d would all-reduce sum/sumsq across
    # replicas here; single-device batch stats only.
    m = float(N * H * W)
    mean = jnp.sum(stats[:, 0, :], axis=0) / m
    var = jnp.maximum(jnp.sum(stats[:, 1, :], axis=0) / m - mean * mean, 0.0)
    gamma_p = jnp.pad(gamma.astype(jnp.float32), (0, co_p - Cout))
    beta_p = jnp.pad(beta.astype(jnp.float32), (0, co_p - Cout))
    scale = gamma_p * jax.lax.rsqrt(var + eps)
    shift = beta_p - mean * scale

    out_nhwc = pl.pallas_call(
        _bn_relu_kernel,
        out_shape=jax.ShapeDtypeStruct((N, H, W, co_p), jnp.float32),
        grid_spec=pltpu.PrefetchScalarGridSpec(
            num_scalar_prefetch=0,
            grid=(N, n_co),
            in_specs=[
                pl.BlockSpec((1, H, W, tco), lambda n, co: (n, 0, 0, co)),
                pl.BlockSpec((1, tco), lambda n, co: (0, co)),
                pl.BlockSpec((1, tco), lambda n, co: (0, co)),
            ],
            out_specs=pl.BlockSpec((1, H, W, tco), lambda n, co: (n, 0, 0, co)),
        ),
        compiler_params=pltpu.CompilerParams(
            dimension_semantics=("parallel", "parallel"),
            vmem_limit_bytes=64 * 1024 * 1024,
        ),
    )(conv_out, scale.reshape(1, co_p), shift.reshape(1, co_p))

    # Glue back to the PyTorch NCHW convention, drop channel padding.
    return jnp.transpose(out_nhwc[:, :, :, :Cout], (0, 3, 1, 2))


# -----------------------------------------------------------------------------
# Deterministic params (matches ASPP_module._init_weight) and a reference.
# -----------------------------------------------------------------------------
def make_params(key, inplanes, planes, dilation):
    kernel_size = 1 if dilation == 1 else 3
    n = kernel_size * kernel_size * planes
    std = math.sqrt(2.0 / n)
    weight = std * jax.random.normal(
        key, (planes, inplanes, kernel_size, kernel_size), dtype=jnp.float32)
    gamma = jnp.ones((planes,), jnp.float32)   # bn.weight.fill_(1)
    beta = jnp.zeros((planes,), jnp.float32)   # bn.bias.zero_()
    return weight, gamma, beta


def _reference(x_nchw, weight, gamma, beta, *, dilation, eps=1e-5):
    """Pure-JAX reference with bf16 conv operands (f32 accum) + f32 BN/ReLU."""
    KH = weight.shape[2]
    pad = dilation if KH > 1 else 0
    conv = jax.lax.conv_general_dilated(
        x_nchw.astype(jnp.bfloat16), weight.astype(jnp.bfloat16),
        window_strides=(1, 1),
        padding=((pad, pad), (pad, pad)),
        rhs_dilation=(dilation, dilation),
        dimension_numbers=("NCHW", "OIHW", "NCHW"),
        preferred_element_type=jnp.float32)
    mean = jnp.mean(conv, axis=(0, 2, 3), keepdims=True)
    var = jnp.mean((conv - mean) ** 2, axis=(0, 2, 3), keepdims=True)
    y = (conv - mean) * jax.lax.rsqrt(var + eps)
    y = y * gamma.reshape(1, -1, 1, 1) + beta.reshape(1, -1, 1, 1)
    return jnp.maximum(y, 0.0)


if __name__ == "__main__":
    key = jax.random.PRNGKey(0)
    kx, kw = jax.random.split(key)

    # small shapes consistent with the module
    N, inplanes, H, W = 2, 4, 16, 16
    planes = 8
    dilation = 2          # -> 3x3 atrous conv, padding = 2

    x = jax.random.normal(kx, (N, inplanes, H, W), dtype=jnp.float32)
    weight, gamma, beta = make_params(kw, inplanes, planes, dilation)

    fwd = jax.jit(functools.partial(aspp_module_forward, dilation=dilation))
    out = jax.block_until_ready(fwd(x, weight, gamma, beta))

    ref = _reference(x, weight, gamma, beta, dilation=dilation)
    assert out.shape == (N, planes, H, W), out.shape
    max_err = float(jnp.max(jnp.abs(out - ref)))
    assert jnp.allclose(out, ref, atol=2e-3, rtol=2e-3), max_err

    print("KERNEL_OK")
</pallas_src>

<mosaic_0001>
module attributes {stable_mosaic.version = 11 : i64} {
  func.func @_conv_stats_kernel(%arg0: i32, %arg1: i32, %arg2: i32, %arg3: memref<1x20x20x128xbf16, #tpu.memory_space<vmem>>, %arg4: memref<3x3x128x128xbf16, #tpu.memory_space<vmem>>, %arg5: memref<1x16x16x128xf32, #tpu.memory_space<vmem>>, %arg6: memref<1x2x128xf32, #tpu.memory_space<vmem>>, %arg7: memref<256x128xf32, #tpu.memory_space<vmem>>) attributes {dimension_semantics = [#tpu.dimension_semantics<parallel>, #tpu.dimension_semantics<parallel>, #tpu.dimension_semantics<arbitrary>], iteration_bounds = array<i64: 2, 1, 1>, scalar_prefetch = 0 : i64, scratch_operands = 1 : i64, tpu.core_type = #tpu.core_type<tc>, window_params = [{transform_indices = @transform_0, window_bounds = array<i64: 1, 20, 20, 128>}, {transform_indices = @transform_1, window_bounds = array<i64: 3, 3, 128, 128>}, {transform_indices = @transform_2, window_bounds = array<i64: 1, 16, 16, 128>}, {transform_indices = @transform_3, window_bounds = array<i64: 1, 2, 128>}]} {
    %c0_i32 = arith.constant 0 : i32
    %0 = arith.cmpi eq, %arg2, %c0_i32 : i32
    %1 = arith.extui %0 : i1 to i32
    %c0_i32_0 = arith.constant 0 : i32
    %2 = arith.cmpi ne, %1, %c0_i32_0 : i32
    scf.if %2 {
      %cst_115 = arith.constant 0.000000e+00 : f32
      %87 = vector.broadcast %cst_115 : f32 to vector<256x128xf32>
      %c0_116 = arith.constant 0 : index
      %c0_117 = arith.constant 0 : index
      %88 = vector.load %arg7[%c0_116, %c0_117] : memref<256x128xf32, #tpu.memory_space<vmem>>, vector<256x128xf32>
      tpu.vector_store %arg7[%c0_116, %c0_117], %87 {strides = array<i32>} : memref<256x128xf32, #tpu.memory_space<vmem>>, vector<256x128xf32>,
    } else {
    }
    %c0 = arith.constant 0 : index
    %c0_1 = arith.constant 0 : index
    %c0_2 = arith.constant 0 : index
    %c0_3 = arith.constant 0 : index
    %3 = vector.load %arg3[%c0, %c0_1, %c0_2, %c0_3] : memref<1x20x20x128xbf16, #tpu.memory_space<vmem>>, vector<1x16x16x128xbf16>
    %4 = vector.shape_cast %3 : vector<1x16x16x128xbf16> to vector<16x16x128xbf16>
    %5 = vector.shape_cast %4 : vector<16x16x128xbf16> to vector<256x128xbf16>
    %c0_4 = arith.constant 0 : index
    %c0_5 = arith.constant 0 : index
    %6 = vector.load %arg7[%c0_4, %c0_5] : memref<256x128xf32, #tpu.memory_space<vmem>>, vector<256x128xf32>
    %c0_6 = arith.constant 0 : index
    %c0_7 = arith.constant 0 : index
    %c0_8 = arith.constant 0 : index
    %c0_9 = arith.constant 0 : index
    %7 = vector.load %arg4[%c0_6, %c0_7, %c0_8, %c0_9] : memref<3x3x128x128xbf16, #tpu.memory_space<vmem>>, vector<1x1x128x128xbf16>
    %8 = vector.shape_cast %7 : vector<1x1x128x128xbf16> to vector<128x128xbf16>
    %cst = arith.constant dense<0.000000e+00> : vector<256x128xf32>
    %9 = tpu.matmul %5, %8, %cst {dimension_numbers = #tpu.dot_dimension_numbers<[1], [0], [0], [1], [0, 0, 1, 1], [], []>} : vector<256x128xbf16>, vector<128x128xbf16>, vector<256x128xf32> -> vector<256x128xf32>
    %10 = arith.addf %6, %9 : vector<256x128xf32>
    %c0_10 = arith.constant 0 : index
    %c0_11 = arith.constant 0 : index
    %11 = vector.load %arg7[%c0_10, %c0_11] : memref<256x128xf32, #tpu.memory_space<vmem>>, vector<256x128xf32>
    tpu.vector_store %arg7[%c0_10, %c0_11], %10 {strides = array<i32>} : memref<256x128xf32, #tpu.memory_space<vmem>>, vector<256x128xf32>,
    %c0_12 = arith.constant 0 : index
    %c0_13 = arith.constant 0 : index
    %c2 = arith.constant 2 : index
    %c0_14 = arith.constant 0 : index
    %12 = vector.load %arg3[%c0_12, %c0_13, %c2, %c0_14] : memref<1x20x20x128xbf16, #tpu.memory_space<vmem>>, vector<1x16x16x128xbf16>
    %13 = vector.shape_cast %12 : vector<1x16x16x128xbf16> to vector<16x16x128xbf16>
    %14 = vector.shape_cast %13 : vector<16x16x128xbf16> to vector<256x128xbf16>
    %c0_15 = arith.constant 0 : index
    %c0_16 = arith.constant 0 : index
    %15 = vector.load %arg7[%c0_15, %c0_16] : memref<256x128xf32, #tpu.memory_space<vmem>>, vector<256x128xf32>
    %c0_17 = arith.constant 0 : index
    %c1 = arith.constant 1 : index
    %c0_18 = arith.constant 0 : index
    %c0_19 = arith.constant 0 : index
    %16 = vector.load %arg4[%c0_17, %c1, %c0_18, %c0_19] : memref<3x3x128x128xbf16, #tpu.memory_space<vmem>>, vector<1x1x128x128xbf16>
    %17 = vector.shape_cast %16 : vector<1x1x128x128xbf16> to vector<128x128xbf16>
    %cst_20 = arith.constant dense<0.000000e+00> : vector<256x128xf32>
    %18 = tpu.matmul %14, %17, %cst_20 {dimension_numbers = #tpu.dot_dimension_numbers<[1], [0], [0], [1], [0, 0, 1, 1], [], []>} : vector<256x128xbf16>, vector<128x128xbf16>, vector<256x128xf32> -> vector<256x128xf32>
    %19 = arith.addf %15, %18 : vector<256x128xf32>
    %c0_21 = arith.constant 0 : index
    %c0_22 = arith.constant 0 : index
    %20 = vector.load %arg7[%c0_21, %c0_22] : memref<256x128xf32, #tpu.memory_space<vmem>>, vector<256x128xf32>
    tpu.vector_store %arg7[%c0_21, %c0_22], %19 {strides = array<i32>} : memref<256x128xf32, #tpu.memory_space<vmem>>, vector<256x128xf32>,
    %c0_23 = arith.constant 0 : index
    %c0_24 = arith.constant 0 : index
    %c4 = arith.constant 4 : index
    %c0_25 = arith.constant 0 : index
    %21 = vector.load %arg3[%c0_23, %c0_24, %c4, %c0_25] : memref<1x20x20x128xbf16, #tpu.memory_space<vmem>>, vector<1x16x16x128xbf16>
    %22 = vector.shape_cast %21 : vector<1x16x16x128xbf16> to vector<16x16x128xbf16>
    %23 = vector.shape_cast %22 : vector<16x16x128xbf16> to vector<256x128xbf16>
    %c0_26 = arith.constant 0 : index
    %c0_27 = arith.constant 0 : index
    %24 = vector.load %arg7[%c0_26, %c0_27] : memref<256x128xf32, #tpu.memory_space<vmem>>, vector<256x128xf32>
    %c0_28 = arith.constant 0 : index
    %c2_29 = arith.constant 2 : index
    %c0_30 = arith.constant 0 : index
    %c0_31 = arith.constant 0 : index
    %25 = vector.load %arg4[%c0_28, %c2_29, %c0_30, %c0_31] : memref<3x3x128x128xbf16, #tpu.memory_space<vmem>>, vector<1x1x128x128xbf16>
    %26 = vector.shape_cast %25 : vector<1x1x128x128xbf16> to vector<128x128xbf16>
    %cst_32 = arith.constant dense<0.000000e+00> : vector<256x128xf32>
    %27 = tpu.matmul %23, %26, %cst_32 {dimension_numbers = #tpu.dot_dimension_numbers<[1], [0], [0], [1], [0, 0, 1, 1], [], []>} : vector<256x128xbf16>, vector<128x128xbf16>, vector<256x128xf32> -> vector<256x128xf32>
    %28 = arith.addf %24, %27 : vector<256x128xf32>
    %c0_33 = arith.constant 0 : index
    %c0_34 = arith.constant 0 : index
    %29 = vector.load %arg7[%c0_33, %c0_34] : memref<256x128xf32, #tpu.memory_space<vmem>>, vector<256x128xf32>
    tpu.vector_store %arg7[%c0_33, %c0_34], %28 {strides = array<i32>} : memref<256x128xf32, #tpu.memory_space<vmem>>, vector<256x128xf32>,
    %c0_35 = arith.constant 0 : index
    %c2_36 = arith.constant 2 : index
    %c0_37 = arith.constant 0 : index
    %c0_38 = arith.constant 0 : index
    %30 = vector.load %arg3[%c0_35, %c2_36, %c0_37, %c0_38] : memref<1x20x20x128xbf16, #tpu.memory_space<vmem>>, vector<1x16x16x128xbf16>
    %31 = vector.shape_cast %30 : vector<1x16x16x128xbf16> to vector<16x16x128xbf16>
    %32 = vector.shape_cast %31 : vector<16x16x128xbf16> to vector<256x128xbf16>
    %c0_39 = arith.constant 0 : index
    %c0_40 = arith.constant 0 : index
    %33 = vector.load %arg7[%c0_39, %c0_40] : memref<256x128xf32, #tpu.memory_space<vmem>>, vector<256x128xf32>
    %c1_41 = arith.constant 1 : index
    %c0_42 = arith.constant 0 : index
    %c0_43 = arith.constant 0 : index
    %c0_44 = arith.constant 0 : index
    %34 = vector.load %arg4[%c1_41, %c0_42, %c0_43, %c0_44] : memref<3x3x128x128xbf16, #tpu.memory_space<vmem>>, vector<1x1x128x128xbf16>
    %35 = vector.shape_cast %34 : vector<1x1x128x128xbf16> to vector<128x128xbf16>
    %cst_45 = arith.constant dense<0.000000e+00> : vector<256x128xf32>
    %36 = tpu.matmul %32, %35, %cst_45 {dimension_numbers = #tpu.dot_dimension_numbers<[1], [0], [0], [1], [0, 0, 1, 1], [], []>} : vector<256x128xbf16>, vector<128x128xbf16>, vector<256x128xf32> -> vector<256x128xf32>
    %37 = arith.addf %33, %36 : vector<256x128xf32>
    %c0_46 = arith.constant 0 : index
    %c0_47 = arith.constant 0 : index
    %38 = vector.load %arg7[%c0_46, %c0_47] : memref<256x128xf32, #tpu.memory_space<vmem>>, vector<256x128xf32>
    tpu.vector_store %arg7[%c0_46, %c0_47], %37 {strides = array<i32>} : memref<256x128xf32, #tpu.memory_space<vmem>>, vector<256x128xf32>,
    %c0_48 = arith.constant 0 : index
    %c2_49 = arith.constant 2 : index
    %c2_50 = arith.constant 2 : index
    %c0_51 = arith.constant 0 : index
    %39 = vector.load %arg3[%c0_48, %c2_49, %c2_50, %c0_51] : memref<1x20x20x128xbf16, #tpu.memory_space<vmem>>, vector<1x16x16x128xbf16>
    %40 = vector.shape_cast %39 : vector<1x16x16x128xbf16> to vector<16x16x128xbf16>
    %41 = vector.shape_cast %40 : vector<16x16x128xbf16> to vector<256x128xbf16>
    %c0_52 = arith.constant 0 : index
    %c0_53 = arith.constant 0 : index
    %42 = vector.load %arg7[%c0_52, %c0_53] : memref<256x128xf32, #tpu.memory_space<vmem>>, vector<256x128xf32>
    %c1_54 = arith.constant 1 : index
    %c1_55 = arith.constant 1 : index
    %c0_56 = arith.constant 0 : index
    %c0_57 = arith.constant 0 : index
    %43 = vector.load %arg4[%c1_54, %c1_55, %c0_56, %c0_57] : memref<3x3x128x128xbf16, #tpu.memory_space<vmem>>, vector<1x1x128x128xbf16>
    %44 = vector.shape_cast %43 : vector<1x1x128x128xbf16> to vector<128x128xbf16>
    %cst_58 = arith.constant dense<0.000000e+00> : vector<256x128xf32>
    %45 = tpu.matmul %41, %44, %cst_58 {dimension_numbers = #tpu.dot_dimension_numbers<[1], [0], [0], [1], [0, 0, 1, 1], [], []>} : vector<256x128xbf16>, vector<128x128xbf16>, vector<256x128xf32> -> vector<256x128xf32>
    %46 = arith.addf %42, %45 : vector<256x128xf32>
    %c0_59 = arith.constant 0 : index
    %c0_60 = arith.constant 0 : index
    %47 = vector.load %arg7[%c0_59, %c0_60] : memref<256x128xf32, #tpu.memory_space<vmem>>, vector<256x128xf32>
    tpu.vector_store %arg7[%c0_59, %c0_60], %46 {strides = array<i32>} : memref<256x128xf32, #tpu.memory_space<vmem>>, vector<256x128xf32>,
    %c0_61 = arith.constant 0 : index
    %c2_62 = arith.constant 2 : index
    %c4_63 = arith.constant 4 : index
    %c0_64 = arith.constant 0 : index
    %48 = vector.load %arg3[%c0_61, %c2_62, %c4_63, %c0_64] : memref<1x20x20x128xbf16, #tpu.memory_space<vmem>>, vector<1x16x16x128xbf16>
    %49 = vector.shape_cast %48 : vector<1x16x16x128xbf16> to vector<16x16x128xbf16>
    %50 = vector.shape_cast %49 : vector<16x16x128xbf16> to vector<256x128xbf16>
    %c0_65 = arith.constant 0 : index
    %c0_66 = arith.constant 0 : index
    %51 = vector.load %arg7[%c0_65, %c0_66] : memref<256x128xf32, #tpu.memory_space<vmem>>, vector<256x128xf32>
    %c1_67 = arith.constant 1 : index
    %c2_68 = arith.constant 2 : index
    %c0_69 = arith.constant 0 : index
    %c0_70 = arith.constant 0 : index
    %52 = vector.load %arg4[%c1_67, %c2_68, %c0_69, %c0_70] : memref<3x3x128x128xbf16, #tpu.memory_space<vmem>>, vector<1x1x128x128xbf16>
    %53 = vector.shape_cast %52 : vector<1x1x128x128xbf16> to vector<128x128xbf16>
    %cst_71 = arith.constant dense<0.000000e+00> : vector<256x128xf32>
    %54 = tpu.matmul %50, %53, %cst_71 {dimension_numbers = #tpu.dot_dimension_numbers<[1], [0], [0], [1], [0, 0, 1, 1], [], []>} : vector<256x128xbf16>, vector<128x128xbf16>, vector<256x128xf32> -> vector<256x128xf32>
    %55 = arith.addf %51, %54 : vector<256x128xf32>
    %c0_72 = arith.constant 0 : index
    %c0_73 = arith.constant 0 : index
    %56 = vector.load %arg7[%c0_72, %c0_73] : memref<256x128xf32, #tpu.memory_space<vmem>>, vector<256x128xf32>
    tpu.vector_store %arg7[%c0_72, %c0_73], %55 {strides = array<i32>} : memref<256x128xf32, #tpu.memory_space<vmem>>, vector<256x128xf32>,
    %c0_74 = arith.constant 0 : index
    %c4_75 = arith.constant 4 : index
    %c0_76 = arith.constant 0 : index
    %c0_77 = arith.constant 0 : index
    %57 = vector.load %arg3[%c0_74, %c4_75, %c0_76, %c0_77] : memref<1x20x20x128xbf16, #tpu.memory_space<vmem>>, vector<1x16x16x128xbf16>
    %58 = vector.shape_cast %57 : vector<1x16x16x128xbf16> to vector<16x16x128xbf16>
    %59 = vector.shape_cast %58 : vector<16x16x128xbf16> to vector<256x128xbf16>
    %c0_78 = arith.constant 0 : index
    %c0_79 = arith.constant 0 : index
    %60 = vector.load %arg7[%c0_78, %c0_79] : memref<256x128xf32, #tpu.memory_space<vmem>>, vector<256x128xf32>
    %c2_80 = arith.constant 2 : index
    %c0_81 = arith.constant 0 : index
    %c0_82 = arith.constant 0 : index
    %c0_83 = arith.constant 0 : index
    %61 = vector.load %arg4[%c2_80, %c0_81, %c0_82, %c0_83] : memref<3x3x128x128xbf16, #tpu.memory_space<vmem>>, vector<1x1x128x128xbf16>
    %62 = vector.shape_cast %61 : vector<1x1x128x128xbf16> to vector<128x128xbf16>
    %cst_84 = arith.constant dense<0.000000e+00> : vector<256x128xf32>
    %63 = tpu.matmul %59, %62, %cst_84 {dimension_numbers = #tpu.dot_dimension_numbers<[1], [0], [0], [1], [0, 0, 1, 1], [], []>} : vector<256x128xbf16>, vector<128x128xbf16>, vector<256x128xf32> -> vector<256x128xf32>
    %64 = arith.addf %60, %63 : vector<256x128xf32>
    %c0_85 = arith.constant 0 : index
    %c0_86 = arith.constant 0 : index
    %65 = vector.load %arg7[%c0_85, %c0_86] : memref<256x128xf32, #tpu.memory_space<vmem>>, vector<256x128xf32>
    tpu.vector_store %arg7[%c0_85, %c0_86], %64 {strides = array<i32>} : memref<256x128xf32, #tpu.memory_space<vmem>>, vector<256x128xf32>,
    %c0_87 = arith.constant 0 : index
    %c4_88 = arith.constant 4 : index
    %c2_89 = arith.constant 2 : index
    %c0_90 = arith.constant 0 : index
    %66 = vector.load %arg3[%c0_87, %c4_88, %c2_89, %c0_90] : memref<1x20x20x128xbf16, #tpu.memory_space<vmem>>, vector<1x16x16x128xbf16>
    %67 = vector.shape_cast %66 : vector<1x16x16x128xbf16> to vector<16x16x128xbf16>
    %68 = vector.shape_cast %67 : vector<16x16x128xbf16> to vector<256x128xbf16>
    %c0_91 = arith.constant 0 : index
    %c0_92 = arith.constant 0 : index
    %69 = vector.load %arg7[%c0_91, %c0_92] : memref<256x128xf32, #tpu.memory_space<vmem>>, vector<256x128xf32>
    %c2_93 = arith.constant 2 : index
    %c1_94 = arith.constant 1 : index
    %c0_95 = arith.constant 0 : index
    %c0_96 = arith.constant 0 : index
    %70 = vector.load %arg4[%c2_93, %c1_94, %c0_95, %c0_96] : memref<3x3x128x128xbf16, #tpu.memory_space<vmem>>, vector<1x1x128x128xbf16>
    %71 = vector.shape_cast %70 : vector<1x1x128x128xbf16> to vector<128x128xbf16>
    %cst_97 = arith.constant dense<0.000000e+00> : vector<256x128xf32>
    %72 = tpu.matmul %68, %71, %cst_97 {dimension_numbers = #tpu.dot_dimension_numbers<[1], [0], [0], [1], [0, 0, 1, 1], [], []>} : vector<256x128xbf16>, vector<128x128xbf16>, vector<256x128xf32> -> vector<256x128xf32>
    %73 = arith.addf %69, %72 : vector<256x128xf32>
    %c0_98 = arith.constant 0 : index
    %c0_99 = arith.constant 0 : index
    %74 = vector.load %arg7[%c0_98, %c0_99] : memref<256x128xf32, #tpu.memory_space<vmem>>, vector<256x128xf32>
    tpu.vector_store %arg7[%c0_98, %c0_99], %73 {strides = array<i32>} : memref<256x128xf32, #tpu.memory_space<vmem>>, vector<256x128xf32>,
    %c0_100 = arith.constant 0 : index
    %c4_101 = arith.constant 4 : index
    %c4_102 = arith.constant 4 : index
    %c0_103 = arith.constant 0 : index
    %75 = vector.load %arg3[%c0_100, %c4_101, %c4_102, %c0_103] : memref<1x20x20x128xbf16, #tpu.memory_space<vmem>>, vector<1x16x16x128xbf16>
    %76 = vector.shape_cast %75 : vector<1x16x16x128xbf16> to vector<16x16x128xbf16>
    %77 = vector.shape_cast %76 : vector<16x16x128xbf16> to vector<256x128xbf16>
    %c0_104 = arith.constant 0 : index
    %c0_105 = arith.constant 0 : index
    %78 = vector.load %arg7[%c0_104, %c0_105] : memref<256x128xf32, #tpu.memory_space<vmem>>, vector<256x128xf32>
    %c2_106 = arith.constant 2 : index
    %c2_107 = arith.constant 2 : index
    %c0_108 = arith.constant 0 : index
    %c0_109 = arith.constant 0 : index
    %79 = vector.load %arg4[%c2_106, %c2_107, %c0_108, %c0_109] : memref<3x3x128x128xbf16, #tpu.memory_space<vmem>>, vector<1x1x128x128xbf16>
    %80 = vector.shape_cast %79 : vector<1x1x128x128xbf16> to vector<128x128xbf16>
    %cst_110 = arith.constant dense<0.000000e+00> : vector<256x128xf32>
    %81 = tpu.matmul %77, %80, %cst_110 {dimension_numbers = #tpu.dot_dimension_numbers<[1], [0], [0], [1], [0, 0, 1, 1], [], []>} : vector<256x128xbf16>, vector<128x128xbf16>, vector<256x128xf32> -> vector<256x128xf32>
    %82 = arith.addf %78, %81 : vector<256x128xf32>
    %c0_111 = arith.constant 0 : index
    %c0_112 = arith.constant 0 : index
    %83 = vector.load %arg7[%c0_111, %c0_112] : memref<256x128xf32, #tpu.memory_space<vmem>>, vector<256x128xf32>
    tpu.vector_store %arg7[%c0_111, %c0_112], %82 {strides = array<i32>} : memref<256x128xf32, #tpu.memory_space<vmem>>, vector<256x128xf32>,
    %c0_i32_113 = arith.constant 0 : i32
    %84 = arith.cmpi eq, %arg2, %c0_i32_113 : i32
    %85 = arith.extui %84 : i1 to i32
    %c0_i32_114 = arith.constant 0 : i32
    %86 = arith.cmpi ne, %85, %c0_i32_114 : i32
    scf.if %86 {
      %c0_115 = arith.constant 0 : index
      %c0_116 = arith.constant 0 : index
      %87 = vector.load %arg7[%c0_115, %c0_116] : memref<256x128xf32, #tpu.memory_space<vmem>>, vector<256x128xf32>
      %88 = vector.shape_cast %87 : vector<256x128xf32> to vector<16x16x128xf32>
      %c0_117 = arith.constant 0 : index
      %c0_118 = arith.constant 0 : index
      %c0_119 = arith.constant 0 : index
      %c0_120 = arith.constant 0 : index
      %89 = vector.load %arg5[%c0_117, %c0_118, %c0_119, %c0_120] : memref<1x16x16x128xf32, #tpu.memory_space<vmem>>, vector<1x16x16x128xf32>
      %90 = vector.shape_cast %89 : vector<1x16x16x128xf32> to vector<16x16x128xf32>
      %91 = vector.shape_cast %88 : vector<16x16x128xf32> to vector<1x16x16x128xf32>
      tpu.vector_store %arg5[%c0_117, %c0_118, %c0_119, %c0_120], %91 {strides = array<i32>} : memref<1x16x16x128xf32, #tpu.memory_space<vmem>>, vector<1x16x16x128xf32>,
      %cst_121 = arith.constant dense<0.000000e+00> : vector<128xf32>
      %92 = vector.multi_reduction <add>, %87, %cst_121 [0] : vector<256x128xf32> to vector<128xf32>
      %93 = vector.shape_cast %92 : vector<128xf32> to vector<1x128xf32>
      %c0_122 = arith.constant 0 : index
      %c0_123 = arith.constant 0 : index
      %c0_124 = arith.constant 0 : index
      %94 = vector.load %arg6[%c0_122, %c0_123, %c0_124] : memref<1x2x128xf32, #tpu.memory_space<vmem>>, vector<1x1x128xf32>
      %95 = vector.shape_cast %94 : vector<1x1x128xf32> to vector<1x128xf32>
      %96 = vector.shape_cast %93 : vector<1x128xf32> to vector<1x1x128xf32>
      tpu.vector_store %arg6[%c0_122, %c0_123, %c0_124], %96 {strides = array<i32>} : memref<1x2x128xf32, #tpu.memory_space<vmem>>, vector<1x1x128xf32>,
      %97 = arith.mulf %87, %87 : vector<256x128xf32>
      %cst_125 = arith.constant dense<0.000000e+00> : vector<128xf32>
      %98 = vector.multi_reduction <add>, %97, %cst_125 [0] : vector<256x128xf32> to vector<128xf32>
      %99 = vector.shape_cast %98 : vector<128xf32> to vector<1x128xf32>
      %c0_126 = arith.constant 0 : index
      %c1_127 = arith.constant 1 : index
      %c0_128 = arith.constant 0 : index
      %100 = vector.load %arg6[%c0_126, %c1_127, %c0_128] : memref<1x2x128xf32, #tpu.memory_space<vmem>>, vector<1x1x128xf32>
      %101 = vector.shape_cast %100 : vector<1x1x128xf32> to vector<1x128xf32>
      %102 = vector.shape_cast %99 : vector<1x128xf32> to vector<1x1x128xf32>
      tpu.vector_store %arg6[%c0_126, %c1_127, %c0_128], %102 {strides = array<i32>} : memref<1x2x128xf32, #tpu.memory_space<vmem>>, vector<1x1x128xf32>,
    } else {
    }
    return
  }
  func.func @transform_0(%arg0: i32, %arg1: i32, %arg2: i32) -> (i32, i32, i32, i32) {
    %c0_i32 = arith.constant 0 : i32
    %c0_i32_0 = arith.constant 0 : i32
    %c0_i32_1 = arith.constant 0 : i32
    return %arg0, %c0_i32, %c0_i32_0, %arg2 : i32, i32, i32, i32
  }
  func.func @transform_1(%arg0: i32, %arg1: i32, %arg2: i32) -> (i32, i32, i32, i32) {
    %c0_i32 = arith.constant 0 : i32
    %c0_i32_0 = arith.constant 0 : i32
    %c0_i32_1 = arith.constant 0 : i32
    return %c0_i32, %c0_i32_0, %arg2, %arg1 : i32, i32, i32, i32
  }
  func.func @transform_2(%arg0: i32, %arg1: i32, %arg2: i32) -> (i32, i32, i32, i32) {
    %c0_i32 = arith.constant 0 : i32
    %c0_i32_0 = arith.constant 0 : i32
    %c0_i32_1 = arith.constant 0 : i32
    return %arg0, %c0_i32, %c0_i32_0, %arg1 : i32, i32, i32, i32
  }
  func.func @transform_3(%arg0: i32, %arg1: i32, %arg2: i32) -> (i32, i32, i32) {
    %c0_i32 = arith.constant 0 : i32
    %c0_i32_0 = arith.constant 0 : i32
    return %arg0, %c0_i32, %arg1 : i32, i32, i32
  }
}

module attributes {stable_mosaic.version = 11 : i64} {
  func.func @_bn_relu_kernel(%arg0: i32, %arg1: i32, %arg2: memref<1x16x16x128xf32, #tpu.memory_space<vmem>>, %arg3: memref<1x128xf32, #tpu.memory_space<vmem>>, %arg4: memref<1x128xf32, #tpu.memory_space<vmem>>, %arg5: memref<1x16x16x128xf32, #tpu.memory_space<vmem>>) attributes {dimension_semantics = [#tpu.dimension_semantics<parallel>, #tpu.dimension_semantics<parallel>], iteration_bounds = array<i64: 2, 1>, scalar_prefetch = 0 : i64, scratch_operands = 0 : i64, tpu.core_type = #tpu.core_type<tc>, window_params = [{transform_indices = @transform_0, window_bounds = array<i64: 1, 16, 16, 128>}, {transform_indices = @transform_1, window_bounds = array<i64: 1, 128>}, {transform_indices = @transform_2, window_bounds = array<i64: 1, 128>}, {transform_indices = @transform_3, window_bounds = array<i64: 1, 16, 16, 128>}]} {
    %c0 = arith.constant 0 : index
    %c0_0 = arith.constant 0 : index
    %c0_1 = arith.constant 0 : index
    %c0_2 = arith.constant 0 : index
    %0 = vector.load %arg2[%c0, %c0_0, %c0_1, %c0_2] : memref<1x16x16x128xf32, #tpu.memory_space<vmem>>, vector<1x16x16x128xf32>
    %c0_3 = arith.constant 0 : index
    %c0_4 = arith.constant 0 : index
    %1 = vector.load %arg3[%c0_3, %c0_4] : memref<1x128xf32, #tpu.memory_space<vmem>>, vector<1x128xf32>
    %2 = vector.shape_cast %1 : vector<1x128xf32> to vector<1x1x1x128xf32>
    %c0_5 = arith.constant 0 : index
    %c0_6 = arith.constant 0 : index
    %3 = vector.load %arg4[%c0_5, %c0_6] : memref<1x128xf32, #tpu.memory_space<vmem>>, vector<1x128xf32>
    %4 = vector.shape_cast %3 : vector<1x128xf32> to vector<1x1x1x128xf32>
    %5 = vector.broadcast %2 : vector<1x1x1x128xf32> to vector<1x16x16x128xf32>
    %6 = arith.mulf %0, %5 : vector<1x16x16x128xf32>
    %7 = vector.broadcast %4 : vector<1x1x1x128xf32> to vector<1x16x16x128xf32>
    %8 = arith.addf %6, %7 : vector<1x16x16x128xf32>
    %cst = arith.constant 0.000000e+00 : f32
    %9 = vector.broadcast %cst : f32 to vector<1x16x16x128xf32>
    %10 = arith.maximumf %8, %9 : vector<1x16x16x128xf32>
    %c0_7 = arith.constant 0 : index
    %c0_8 = arith.constant 0 : index
    %c0_9 = arith.constant 0 : index
    %c0_10 = arith.constant 0 : index
    %11 = vector.load %arg5[%c0_7, %c0_8, %c0_9, %c0_10] : memref<1x16x16x128xf32, #tpu.memory_space<vmem>>, vector<1x16x16x128xf32>
    tpu.vector_store %arg5[%c0_7, %c0_8, %c0_9, %c0_10], %10 {strides = array<i32>} : memref<1x16x16x128xf32, #tpu.memory_space<vmem>>, vector<1x16x16x128xf32>,
    return
  }
  func.func @transform_0(%arg0: i32, %arg1: i32) -> (i32, i32, i32, i32) {
    %c0_i32 = arith.constant 0 : i32
    %c0_i32_0 = arith.constant 0 : i32
    %c0_i32_1 = arith.constant 0 : i32
    return %arg0, %c0_i32, %c0_i32_0, %arg1 : i32, i32, i32, i32
  }
  func.func @transform_1(%arg0: i32, %arg1: i32) -> (i32, i32) {
    %c0_i32 = arith.constant 0 : i32
    %c0_i32_0 = arith.constant 0 : i32
    return %c0_i32, %arg1 : i32, i32
  }
  func.func @transform_2(%arg0: i32, %arg1: i32) -> (i32, i32) {
    %c0_i32 = arith.constant 0 : i32
    %c0_i32_0 = arith.constant 0 : i32
    return %c0_i32, %arg1 : i32, i32
  }
  func.func @transform_3(%arg0: i32, %arg1: i32) -> (i32, i32, i32, i32) {
    %c0_i32 = arith.constant 0 : i32
    %c0_i32_0 = arith.constant 0 : i32
    %c0_i32_1 = arith.constant 0 : i32
    return %arg0, %c0_i32, %c0_i32_0, %arg1 : i32, i32, i32, i32
  }
}

</mosaic_0001>

<bundles_post_ra>
// kernel: aspp_module_forward.3
= control target key start
LH: loop header
LB: loop body
LE: loop exit
PB: predicated region body
PF: predicated region fallthrough
CT: control target
= control target key end

     0   :  { %s591_s12 = smov 0   ;;  %s593_s13 = smov 0   ;;  %s766_s0 = inlined_call_operand.vmem [shape: f32[2,16,16,128], index: 0, kind: input, shape index: {}]   ;;  %s767_s1 = inlined_call_operand.vmem [shape: f32[1,128], index: 1, kind: input, shape index: {}]   ;;  %s768_s2 = inlined_call_operand.vmem [shape: f32[1,128], index: 2, kind: input, shape index: {}]   ;;  %s769_s3 = inlined_call_operand.vmem [shape: f32[2,16,16,128], index: 3, kind: output, shape index: {}]  }
   0x1   :  { %s595_s14 = smov 0  }
   0x2 LB: > { %s25_s15 = sadd.s32 1, %s565_s13  ;;  %p512_p0 = scmp.ge.s32.totalorder %s569_s14, 1  ;;  %s569_s14 = sphi %s595_s14, %s13_s14   ;;  %s565_s13 = sphi %s593_s13, %s771_s13   ;;  %s561_s12 = sphi %s591_s12, %s770_s12  }
   0x3   : > { %p27_p1 = scmp.ge.s32.totalorder %s25_s15, 2  ;;  %p172_p2 = scmp.lt.s32.totalorder %s569_s14, 3 }
   0x5   : > { %s773_s15 = smov (%p27_p1, %s25_s15), 0  ;;  %p173_p3 = pnand %p512_p0, %p172_p2 }
   0x6   : > { %p208_p4 = scmp.lt.s32.totalorder (!%p173_p3), %s561_s12, 1 }
   0x7   : > { %176 = sbr.rel (%p173_p3) target bundleno = 54 (0x36), region = 32 }
   0xc   : > { %s775_s12 = smov (!%p208_p4, %s561_s12), 1  ;;  %v612_v0 = vld [vmem:[%s767_s1] ss:$0 sm:$0xff] }
   0xd   : > { %s519_s18 = sshll.u32 %s775_s12, 8  ;;  %v622_v1 = vld [vmem:[%s768_s2] ss:$0 sm:$0xff] }
   0xe   : > { %s617_s21 = scalar_lea.vmem %s766_s0, %s519_s18  ;;  %s645_s26 = scalar_lea.vmem %s769_s3, %s519_s18 }
   0xf   : > { %v230_v2 = vld [vmem:[%s617_s21] sm:$0xff]  ;;  %v231_v3 = vld [vmem:[%s617_s21 + $0x8] sm:$0xff]  ;;  %v232_v4 = vld [vmem:[%s617_s21 + $0x10] sm:$0xff] }
  0x10   : > { %v267_v5 = vmul.f32 %v612_v0, %v230_v2  ;;  %v268_v6 = vmul.f32 %v612_v0, %v231_v3  ;;  %v269_v7 = vmul.f32 %v612_v0, %v232_v4  ;;  %v233_v8 = vld [vmem:[%s617_s21 + $0x18] sm:$0xff]  ;;  %v234_v9 = vld [vmem:[%s617_s21 + $0x20] sm:$0xff]  ;;  %v235_v10 = vld [vmem:[%s617_s21 + $0x28] sm:$0xff] }
  0x11   : > { %v270_v11 = vmul.f32 %v612_v0, %v233_v8  ;;  %v271_v12 = vmul.f32 %v612_v0, %v234_v9  ;;  %v272_v13 = vmul.f32 %v612_v0, %v235_v10  ;;  %v236_v14 = vld [vmem:[%s617_s21 + $0x30] sm:$0xff]  ;;  %v237_v15 = vld [vmem:[%s617_s21 + $0x38] sm:$0xff]  ;;  %v238_v24 = vld [vmem:[%s617_s21 + $0x40] sm:$0xff] }
  0x12   : > { %v302_v16 = vadd.f32 %v622_v1, %v267_v5  ;;  %v303_v17 = vadd.f32 %v622_v1, %v268_v6  ;;  %v304_v18 = vadd.f32 %v622_v1, %v269_v7  ;;  %v273_v19 = vmul.f32 %v612_v0, %v236_v14  ;;  %v239_v25 = vld [vmem:[%s617_s21 + $0x48] sm:$0xff]  ;;  %v240_v26 = vld [vmem:[%s617_s21 + $0x50] sm:$0xff]  ;;  %v241_v31 = vld [vmem:[%s617_s21 + $0x58] sm:$0xff] }
  0x13   : > { %v305_v20 = vadd.f32 %v622_v1, %v270_v11  ;;  %v306_v21 = vadd.f32 %v622_v1, %v271_v12  ;;  %v307_v22 = vadd.f32 %v622_v1, %v272_v13  ;;  %v274_v23 = vmul.f32 %v612_v0, %v237_v15  ;;  %v242_v32 = vld [vmem:[%s617_s21 + $0x60] sm:$0xff]  ;;  %v243_v33 = vld [vmem:[%s617_s21 + $0x68] sm:$0xff]  ;;  %v244_v37 = vld [vmem:[%s617_s21 + $0x70] sm:$0xff] }
  0x14   : > { %v334_v27 = vmax.f32 %v302_v16, 0.0  ;;  %v335_v28 = vmax.f32 %v303_v17, 0.0  ;;  %v336_v29 = vmax.f32 %v304_v18, 0.0  ;;  %v308_v30 = vadd.f32 %v622_v1, %v273_v19  ;;  %v245_v42 = vld [vmem:[%s617_s21 + $0x78] sm:$0xff]  ;;  %v246_v54 = vld [vmem:[%s617_s21 + $0x80] sm:$0xff]  ;;  %v247_v55 = vld [vmem:[%s617_s21 + $0x88] sm:$0xff] }
  0x15   : > { %v337_v34 = vmax.f32 %v305_v20, 0.0  ;;  %v338_v35 = vmax.f32 %v306_v21, 0.0  ;;  %v309_v36 = vadd.f32 %v622_v1, %v274_v23  ;;  %v339_v38 = vmax.f32 %v307_v22, 0.0  ;;  %v248_v56 = vld [vmem:[%s617_s21 + $0x90] sm:$0xff]  ;;  %v249_v59 = vld [vmem:[%s617_s21 + $0x98] sm:$0xff]  ;;  %v250_v63 = vld [vmem:[%s617_s21 + $0xa0] sm:$0xff] }
  0x16   : > { %366 = vst [vmem:[%s645_s26] sm:$0xff] %v334_v27  ;;  %v275_v39 = vmul.f32 %v612_v0, %v238_v24  ;;  %v276_v40 = vmul.f32 %v612_v0, %v239_v25  ;;  %v277_v41 = vmul.f32 %v612_v0, %v240_v26  ;;  %v340_v43 = vmax.f32 %v308_v30, 0.0  ;;  %v251_v6 = vld [vmem:[%s617_s21 + $0xa8] sm:$0xff]  ;;  %v252_v10 = vld [vmem:[%s617_s21 + $0xb0] sm:$0xff]  ;;  %v253_v14 = vld [vmem:[%s617_s21 + $0xb8] sm:$0xff] }
  0x17   : > { %367 = vst [vmem:[%s645_s26 + $0x8] sm:$0xff] %v335_v28  ;;  %v278_v44 = vmul.f32 %v612_v0, %v241_v31  ;;  %v279_v45 = vmul.f32 %v612_v0, %v242_v32  ;;  %v280_v46 = vmul.f32 %v612_v0, %v243_v33  ;;  %v281_v50 = vmul.f32 %v612_v0, %v244_v37  ;;  %v254_v18 = vld [vmem:[%s617_s21 + $0xc0] sm:$0xff]  ;;  %v255_v22 = vld [vmem:[%s617_s21 + $0xc8] sm:$0xff]  ;;  %v256_v26 = vld [vmem:[%s617_s21 + $0xd0] sm:$0xff] }
  0x18   : > { %368 = vst [vmem:[%s645_s26 + $0x10] sm:$0xff] %v336_v29  ;;  %v310_v47 = vadd.f32 %v622_v1, %v275_v39  ;;  %v311_v48 = vadd.f32 %v622_v1, %v276_v40  ;;  %v312_v49 = vadd.f32 %v622_v1, %v277_v41  ;;  %v341_v51 = vmax.f32 %v309_v36, 0.0  ;;  %v257_v30 = vld [vmem:[%s617_s21 + $0xd8] sm:$0xff] }
  0x19   : > { %369 = vst [vmem:[%s645_s26 + $0x18] sm:$0xff] %v337_v34  ;;  %v313_v52 = vadd.f32 %v622_v1, %v278_v44  ;;  %v282_v53 = vmul.f32 %v612_v0, %v245_v42  ;;  %v314_v58 = vadd.f32 %v622_v1, %v279_v45  ;;  %v315_v62 = vadd.f32 %v622_v1, %v280_v46  ;;  %v258_v34 = vld [vmem:[%s617_s21 + $0xe0] sm:$0xff]  ;;  %v260_v42 = vld [vmem:[%s617_s21 + $0xf0] sm:$0xff]  ;;  %v261_v46 = vld [vmem:[%s617_s21 + $0xf8] sm:$0xff] }
  0x1a   : > { %370 = vst [vmem:[%s645_s26 + $0x20] sm:$0xff] %v338_v35  ;;  %v342_v57 = vmax.f32 %v310_v47, 0.0  ;;  %v343_v60 = vmax.f32 %v311_v48, 0.0  ;;  %v344_v61 = vmax.f32 %v312_v49, 0.0  ;;  %v316_v2 = vadd.f32 %v622_v1, %v281_v50 }
  0x1b   : > { %371 = vst [vmem:[%s645_s26 + $0x28] sm:$0xff] %v339_v38  ;;  %v283_v3 = vmul.f32 %v612_v0, %v246_v54  ;;  %v284_v4 = vmul.f32 %v612_v0, %v247_v55  ;;  %v285_v5 = vmul.f32 %v612_v0, %v248_v56  ;;  %v345_v7 = vmax.f32 %v313_v52, 0.0  ;;  %v259_v38 = vld [vmem:[%s617_s21 + $0xe8] sm:$0xff] }
  0x1c   : > { %372 = vst [vmem:[%s645_s26 + $0x30] sm:$0xff] %v340_v43  ;;  %v317_v8 = vadd.f32 %v622_v1, %v282_v53  ;;  %v286_v9 = vmul.f32 %v612_v0, %v249_v59  ;;  %v346_v11 = vmax.f32 %v314_v58, 0.0  ;;  %v287_v13 = vmul.f32 %v612_v0, %v250_v63 }
  0x1d   : > { %373 = vst [vmem:[%s645_s26 + $0x38] sm:$0xff] %v341_v51  ;;  %v318_v12 = vadd.f32 %v622_v1, %v283_v3  ;;  %v347_v15 = vmax.f32 %v315_v62, 0.0  ;;  %v319_v16 = vadd.f32 %v622_v1, %v284_v4  ;;  %v288_v17 = vmul.f32 %v612_v0, %v251_v6 }
  0x1e   : > { %374 = vst [vmem:[%s645_s26 + $0x40] sm:$0xff] %v342_v57  ;;  %v348_v19 = vmax.f32 %v316_v2, 0.0  ;;  %v320_v20 = vadd.f32 %v622_v1, %v285_v5  ;;  %v289_v21 = vmul.f32 %v612_v0, %v252_v10  ;;  %v349_v23 = vmax.f32 %v317_v8, 0.0 }
  0x1f   : > { %375 = vst [vmem:[%s645_s26 + $0x48] sm:$0xff] %v343_v60  ;;  %v321_v24 = vadd.f32 %v622_v1, %v286_v9  ;;  %v290_v25 = vmul.f32 %v612_v0, %v253_v14  ;;  %v350_v27 = vmax.f32 %v318_v12, 0.0  ;;  %v322_v28 = vadd.f32 %v622_v1, %v287_v13 }
  0x20   : > { %376 = vst [vmem:[%s645_s26 + $0x50] sm:$0xff] %v344_v61  ;;  %v291_v29 = vmul.f32 %v612_v0, %v254_v18  ;;  %v351_v31 = vmax.f32 %v319_v16, 0.0  ;;  %v323_v32 = vadd.f32 %v622_v1, %v288_v17  ;;  %v292_v33 = vmul.f32 %v612_v0, %v255_v22 }
  0x21   : > { %377 = vst [vmem:[%s645_s26 + $0x58] sm:$0xff] %v345_v7  ;;  %v352_v35 = vmax.f32 %v320_v20, 0.0  ;;  %v324_v36 = vadd.f32 %v622_v1, %v289_v21  ;;  %v293_v37 = vmul.f32 %v612_v0, %v256_v26  ;;  %v353_v39 = vmax.f32 %v321_v24, 0.0 }
  0x22   : > { %378 = vst [vmem:[%s645_s26 + $0x60] sm:$0xff] %v346_v11  ;;  %v325_v40 = vadd.f32 %v622_v1, %v290_v25  ;;  %v294_v41 = vmul.f32 %v612_v0, %v257_v30  ;;  %v354_v43 = vmax.f32 %v322_v28, 0.0  ;;  %v326_v44 = vadd.f32 %v622_v1, %v291_v29 }
  0x23   : > { %379 = vst [vmem:[%s645_s26 + $0x68] sm:$0xff] %v347_v15  ;;  %v295_v45 = vmul.f32 %v612_v0, %v258_v34  ;;  %v355_v47 = vmax.f32 %v323_v32, 0.0  ;;  %v327_v48 = vadd.f32 %v622_v1, %v292_v33  ;;  %v296_v49 = vmul.f32 %v612_v0, %v259_v38 }
  0x24   : > { %380 = vst [vmem:[%s645_s26 + $0x70] sm:$0xff] %v348_v19  ;;  %v356_v50 = vmax.f32 %v324_v36, 0.0  ;;  %v328_v51 = vadd.f32 %v622_v1, %v293_v37  ;;  %v297_v52 = vmul.f32 %v612_v0, %v260_v42  ;;  %v357_v53 = vmax.f32 %v325_v40, 0.0 }
  0x25   : > { %381 = vst [vmem:[%s645_s26 + $0x78] sm:$0xff] %v349_v23  ;;  %v329_v54 = vadd.f32 %v622_v1, %v294_v41  ;;  %v298_v55 = vmul.f32 %v612_v0, %v261_v46  ;;  %v358_v56 = vmax.f32 %v326_v44, 0.0  ;;  %v330_v57 = vadd.f32 %v622_v1, %v295_v45 }
  0x26   : > { %382 = vst [vmem:[%s645_s26 + $0x80] sm:$0xff] %v350_v27  ;;  %v359_v58 = vmax.f32 %v327_v48, 0.0  ;;  %v331_v59 = vadd.f32 %v622_v1, %v296_v49  ;;  %v360_v60 = vmax.f32 %v328_v51, 0.0  ;;  %v332_v61 = vadd.f32 %v622_v1, %v297_v52 }
  0x27   : > { %383 = vst [vmem:[%s645_s26 + $0x88] sm:$0xff] %v351_v31  ;;  %v361_v0 = vmax.f32 %v329_v54, 0.0  ;;  %v333_v62 = vadd.f32 %v622_v1, %v298_v55  ;;  %v362_v63 = vmax.f32 %v330_v57, 0.0 }
  0x28   : > { %384 = vst [vmem:[%s645_s26 + $0x90] sm:$0xff] %v352_v35  ;;  %v363_v2 = vmax.f32 %v331_v59, 0.0  ;;  %v364_v3 = vmax.f32 %v332_v61, 0.0 }
  0x29   : > { %385 = vst [vmem:[%s645_s26 + $0x98] sm:$0xff] %v353_v39  ;;  %v365_v4 = vmax.f32 %v333_v62, 0.0 }
  0x2a   : > { %386 = vst [vmem:[%s645_s26 + $0xa0] sm:$0xff] %v354_v43 }
  0x2b   : > { %387 = vst [vmem:[%s645_s26 + $0xa8] sm:$0xff] %v355_v47 }
  0x2c   : > { %388 = vst [vmem:[%s645_s26 + $0xb0] sm:$0xff] %v356_v50 }
  0x2d   : > { %389 = vst [vmem:[%s645_s26 + $0xb8] sm:$0xff] %v357_v53 }
  0x2e   : > { %390 = vst [vmem:[%s645_s26 + $0xc0] sm:$0xff] %v358_v56 }
  0x2f   : > { %391 = vst [vmem:[%s645_s26 + $0xc8] sm:$0xff] %v359_v58 }
  0x30   : > { %392 = vst [vmem:[%s645_s26 + $0xd0] sm:$0xff] %v360_v60 }
  0x31   : > { %393 = vst [vmem:[%s645_s26 + $0xd8] sm:$0xff] %v361_v0 }
  0x32   : > { %394 = vst [vmem:[%s645_s26 + $0xe0] sm:$0xff] %v362_v63 }
  0x33   : > { %395 = vst [vmem:[%s645_s26 + $0xe8] sm:$0xff] %v363_v2 }
  0x34   : > { %396 = vst [vmem:[%s645_s26 + $0xf0] sm:$0xff] %v364_v3 }
  0x35   : > { %397 = vst [vmem:[%s645_s26 + $0xf8] sm:$0xff] %v365_v4 }
  0x36 PF: > { %s13_s14 = sadd.s32 1, %s569_s14   ;;  %s770_s12 = smov %s565_s13 }
  0x37   : > { %p10_p5 = scmp.ge.s32.totalorder %s13_s14, 4   ;;  %s771_s13 = smov %s773_s15 }
  0x39   :  { %12 = sbr.rel (!%p10_p5) target bundleno = 2 (0x2), region = 68 }

// kernel: aspp_module_forward.2
= control target key start
LH: loop header
LB: loop body
LE: loop exit
PB: predicated region body
PF: predicated region fallthrough
CT: control target
= control target key end

     0   :  { %s6077_s12 = smov 0   ;;  %s6079_s13 = smov 0   ;;  %s7296_s0 = inlined_call_operand.vmem [shape: bf16[2,20,20,128], index: 0, kind: input, shape index: {}]   ;;  %s7297_s1 = inlined_call_operand.vmem [shape: bf16[3,3,128,128], index: 1, kind: input, shape index: {}]   ;;  %s7298_s2 = inlined_call_operand.vmem [shape: f32[2,16,16,128], index: 2, kind: output, shape index: {0}]   ;;  %s7299_s3 = inlined_call_operand.vmem [shape: f32[2,2,128], index: 3, kind: output, shape index: {1}]  }
   0x1   :  { %s6081_s14 = smov 0  }
   0x2 LB: > { %s33_s15 = sadd.s32 1, %s6051_s13  ;;  %p4896_p0 = scmp.ge.s32.totalorder %s6055_s14, 1  ;;  %s6055_s14 = sphi %s6081_s14, %s14_s14   ;;  %s6051_s13 = sphi %s6079_s13, %s7307_s13   ;;  %s6047_s12 = sphi %s6077_s12, %s7306_s12  }
   0x3   : > { %p35_p1 = scmp.ge.s32.totalorder %s33_s15, 2  ;;  %p184_p2 = scmp.lt.s32.totalorder %s6055_s14, 3 }
   0x5   : > { %s7309_s15 = smov (%p35_p1, %s33_s15), 0  ;;  %p185_p3 = pnand %p4896_p0, %p184_p2 }
   0x7   : > { %188 = sbr.rel (%p185_p3) target bundleno = 767 (0x2ff), region = 28 }
   0xc   : > { %v5887_v0 = vld [vmem:[%s7297_s1 + $0x38] sm:$0xff]  ;;  %v5886_v1 = vld [vmem:[%s7297_s1 + $0x30] sm:$0xff]  ;;  %v5885_v2 = vld [vmem:[%s7297_s1 + $0x28] sm:$0xff]  ;;  %p229_p4 = scmp.lt.s32.totalorder %s6047_s12, 1  ;;  %vm770_vm0 = vcmask 1042432   ;;  %vm771_vm1 = vcmask 1046532  }
   0xd   : > { %5984 = vmatpush.bf16.msra.mxu1 %v5887_v0  ;;  %5985 = vmatpush.bf16.msra.mxu2 %v5887_v0  ;;  %v5884_v3 = vld [vmem:[%s7297_s1 + $0x20] sm:$0xff]  ;;  %v5883_v4 = vld [vmem:[%s7297_s1 + $0x18] sm:$0xff]  ;;  %v5882_v5 = vld [vmem:[%s7297_s1 + $0x10] sm:$0xff]  ;;  %vm1295_vm2 = vcmask 1041408   ;;  %vm1296_vm3 = vcmask 1045508  }
   0xe   : > { %5986 = vmatpush.bf16.msra.mxu3 %v5887_v0  ;;  %521 = vmatpush.bf16.msra.mxu0 %v5887_v0  ;;  %s7311_s12 = smov (!%p229_p4, %s6047_s12), 1  ;;  %v5881_v6 = vld [vmem:[%s7297_s1 + $0x8] sm:$0xff]  ;;  %v5880_v7 = vld [vmem:[%s7297_s1] sm:$0xff]  ;;  %v5903_v8 = vld [vmem:[%s7297_s1 + $0xb8] sm:$0xff] }
   0xf   : > { %s6008_s30 = smul.u32 240, %s7311_s12  ;;  %v5927_v9 = vld [vmem:[%s7297_s1 + $0xf8] sm:$0xff]  ;;  %v5902_v16 = vld [vmem:[%s7297_s1 + $0xb0] sm:$0xff]  ;;  %v5901_v20 = vld [vmem:[%s7297_s1 + $0xa8] sm:$0xff]  ;;  %s5863_s4 = sshll.u32 %s7311_s12, 8 }
  0x10   : > { %v5895_v14 = vld [vmem:[%s7297_s1 + $0x78] sm:$0xff]  ;;  %v5926_v17 = vld [vmem:[%s7297_s1 + $0xf0] sm:$0xff]  ;;  %v5925_v21 = vld [vmem:[%s7297_s1 + $0xe8] sm:$0xff]  ;;  %s7085_s7 = scalar_lea.vmem %s7298_s2, %s5863_s4 }
  0x11   : > { %5987 = vmatpush.bf16.msra.mxu1 %v5886_v1  ;;  %5988 = vmatpush.bf16.msra.mxu2 %v5886_v1  ;;  %s6129_s8 = scalar_lea.vmem %s7296_s0, %s6008_s30  ;;  %v5935_v15 = vld [vmem:[%s7297_s1 + $0x138] sm:$0xff]  ;;  %v5894_v18 = vld [vmem:[%s7297_s1 + $0x70] sm:$0xff]  ;;  %v5893_v22 = vld [vmem:[%s7297_s1 + $0x68] sm:$0xff] }
  0x12   : > { %5989 = vmatpush.bf16.msra.mxu3 %v5886_v1  ;;  %522 = vmatpush.bf16.msra.mxu0 %v5886_v1  ;;  %v5868_v10 = vld [vmem:[%s6129_s8 + $0x30] sm:$0xff]  ;;  %v5872_v11 = vld [vmem:[%s6129_s8 + $0x60] sm:$0xff]  ;;  %v5933_v23 = vld [vmem:[%s7297_s1 + $0x128] sm:$0xff] }
  0x13   : > { %v5876_v12 = vld [vmem:[%s6129_s8 + $0x90] sm:$0xff]  ;;  %v5864_v13 = vld [vmem:[%s6129_s8] sm:$0xff]  ;;  %v5899_v28 = vld [vmem:[%s7297_s1 + $0x98] sm:$0xff] }
  0x14   : > { %v5934_v19 = vld [vmem:[%s7297_s1 + $0x130] sm:$0xff]  ;;  %v5900_v24 = vld [vmem:[%s7297_s1 + $0xa0] sm:$0xff]  ;;  %v5923_v29 = vld [vmem:[%s7297_s1 + $0xd8] sm:$0xff] }
  0x15   : > { %5990 = vmatpush.bf16.msra.mxu1 %v5885_v2  ;;  %5991 = vmatpush.bf16.msra.mxu2 %v5885_v2  ;;  %v5924_v25 = vld [vmem:[%s7297_s1 + $0xe0] sm:$0xff]  ;;  %v5873_v31 = vld [vmem:[%s6129_s8 + $0x6c] sm:$0xff]  ;;  %v5891_v34 = vld [vmem:[%s7297_s1 + $0x58] sm:$0xff] }
  0x16   : > { %5992 = vmatpush.bf16.msra.mxu3 %v5885_v2  ;;  %523 = vmatpush.bf16.msra.mxu0 %v5885_v2  ;;  %v5892_v26 = vld [vmem:[%s7297_s1 + $0x60] sm:$0xff]  ;;  %v5865_v33 = vld [vmem:[%s6129_s8 + $0xc] sm:$0xff]  ;;  %v5931_v35 = vld [vmem:[%s7297_s1 + $0x118] sm:$0xff] }
  0x17   : > { %v5932_v27 = vld [vmem:[%s7297_s1 + $0x120] sm:$0xff]  ;;  %v5898_v36 = vld [vmem:[%s7297_s1 + $0x90] sm:$0xff]  ;;  %v5897_v40 = vld [vmem:[%s7297_s1 + $0x88] sm:$0xff] }
  0x18   : > { %v5869_v30 = vld [vmem:[%s6129_s8 + $0x3c] sm:$0xff]  ;;  %v5922_v37 = vld [vmem:[%s7297_s1 + $0xd0] sm:$0xff]  ;;  %v5921_v41 = vld [vmem:[%s7297_s1 + $0xc8] sm:$0xff] }
  0x19   : > { %5993 = vmatpush.bf16.msra.mxu1 %v5884_v3  ;;  %5994 = vmatpush.bf16.msra.mxu2 %v5884_v3  ;;  %v5877_v32 = vld [vmem:[%s6129_s8 + $0x9c] sm:$0xff]  ;;  %v5890_v38 = vld [vmem:[%s7297_s1 + $0x50] sm:$0xff]  ;;  %v5889_v42 = vld [vmem:[%s7297_s1 + $0x48] sm:$0xff] }
  0x1a   : > { %5995 = vmatpush.bf16.msra.mxu3 %v5884_v3  ;;  %524 = vmatpush.bf16.msra.mxu0 %v5884_v3  ;;  %v5930_v39 = vld [vmem:[%s7297_s1 + $0x110] sm:$0xff]  ;;  %v5929_v43 = vld [vmem:[%s7297_s1 + $0x108] sm:$0xff]  ;;  %v5896_v44 = vld [vmem:[%s7297_s1 + $0x80] sm:$0xff] }
  0x1b   : > { %v5920_v45 = vld [vmem:[%s7297_s1 + $0xc0] sm:$0xff]  ;;  %v5870_v48 = vld [vmem:[%s6129_s8 + $0x48] sm:$0xff]  ;;  %v5874_v49 = vld [vmem:[%s6129_s8 + $0x78] sm:$0xff] }
  0x1c   : > { %v5888_v46 = vld [vmem:[%s7297_s1 + $0x40] sm:$0xff]  ;;  %v5878_v50 = vld [vmem:[%s6129_s8 + $0xa8] sm:$0xff]  ;;  %v5866_v51 = vld [vmem:[%s6129_s8 + $0x18] sm:$0xff] }
  0x1d   : > { %5996 = vmatpush.bf16.msra.mxu1 %v5883_v4  ;;  %5997 = vmatpush.bf16.msra.mxu2 %v5883_v4  ;;  %v5928_v47 = vld [vmem:[%s7297_s1 + $0x100] sm:$0xff]  ;;  %v5967_v52 = vld [vmem:[%s7297_s1 + $0x1b8] sm:$0xff]  ;;  %v676_v0 = vld [vmem:[%s6129_s8 + $0x8] sm:$0x1] }
  0x1e   : > { %5998 = vmatpush.bf16.msra.mxu3 %v5883_v4  ;;  %525 = vmatpush.bf16.msra.mxu0 %v5883_v4  ;;  %v5975_v53 = vld [vmem:[%s7297_s1 + $0x1f8] sm:$0xff]  ;;  %v675_v56 = vld [vmem:[%s6129_s8 + $0x4] sm:$0xf]  ;;  %v674_v63 = vld [vmem:[%s6129_s8] sm:$0xe] }
  0x1f   : > { %v5943_v54 = vld [vmem:[%s7297_s1 + $0x178] sm:$0xff]  ;;  %v1200_v57 = vld [vmem:[%s6129_s8 + $0x4] sm:$0xf]  ;;  %v775_v1 = vrot.slane %v675_v56, 5  ;;  %v1199_v3 = vld [vmem:[%s6129_s8] sm:$0xc] }
  0x20   : > { %v5983_v55 = vld [vmem:[%s7297_s1 + $0x238] sm:$0xff]  ;;  %v5875_v60 = vld [vmem:[%s6129_s8 + $0x84] sm:$0xff]  ;;  %v1300_v2 = vrot.slane %v1200_v57, 6  ;;  %vm6265_vm4 = vmor %vm770_vm0, %vm771_vm1 }
  0x21   : > { %5999 = vmatpush.bf16.msra.mxu1 %v5882_v5  ;;  %6000 = vmatpush.bf16.msra.mxu2 %v5882_v5  ;;  %v5871_v58 = vld [vmem:[%s6129_s8 + $0x54] sm:$0xff]  ;;  %v5270_v59 = vld [vmem:[%s6129_s8 + $0x1c] sm:$0xf]  ;;  %v5867_v62 = vld [vmem:[%s6129_s8 + $0x24] sm:$0xff] }
  0x22   : > { %6001 = vmatpush.bf16.msra.mxu3 %v5882_v5  ;;  %526 = vmatpush.bf16.msra.mxu0 %v5882_v5  ;;  %v5879_v61 = vld [vmem:[%s6129_s8 + $0xb4] sm:$0xff]  ;;  %v1201_v4 = vld [vmem:[%s6129_s8 + $0x8] sm:$0x3]  ;;  %v2201_v5 = vrot.slane %v5270_v59, 5  ;;  %vm6270_vm5 = vmor %vm1295_vm2, %vm1296_vm3 }
  0x23   : > { %v5982_v59 = vld [vmem:[%s7297_s1 + $0x230] sm:$0xff] }
  0x25   : > { %6002 = vmatpush.bf16.msra.mxu1 %v5881_v6  ;;  %6003 = vmatpush.bf16.msra.mxu2 %v5881_v6 }
  0x26   : > { %6004 = vmatpush.bf16.msra.mxu3 %v5881_v6  ;;  %527 = vmatpush.bf16.msra.mxu0 %v5881_v6  ;;  %v5269_v6 = vld [vmem:[%s6129_s8 + $0x18] sm:$0xe] }
  0x29   : > { %6005 = vmatpush.bf16.msra.mxu1 %v5880_v7  ;;  %6006 = vmatpush.bf16.msra.mxu2 %v5880_v7 }
  0x2a   : > { %6007 = vmatpush.bf16.msra.mxu3 %v5880_v7  ;;  %528 = vmatpush.bf16.msra.mxu0 %v5880_v7  ;;  %v5271_v7 = vld [vmem:[%s6129_s8 + $0x20] sm:$0x1] }
  0x2c   : > { %549 = vmatmul.bf16.vlgmr.msra.gmra.mxu1 %v5868_v10  ;;  %569 = vmatmul.bf16.vlgmr.msra.gmra.mxu2 %v5872_v11  ;;  %v777_v11 = vrot.slane %v775_v1, 4 }
  0x2d   : > { %1571 = vmatpush.bf16.msrb.mxu2 %v5903_v8  ;;  %589 = vmatmul.bf16.vlgmr.msra.gmra.mxu3 %v5876_v12  ;;  %v4997_v8 = vrot.slane %v674_v63, 9  ;;  %v5061_v12 = vrot.slane %v1199_v3, 10 }
  0x2e   : > { %1950 = vmatpush.bf16.msrb.mxu3 %v5927_v9  ;;  %529 = vmatmul.bf16.vlgmr.msra.gmra.mxu0 %v5864_v13  ;;  %v778_v9 = vrot.slane %v676_v0, 5  ;;  %v1302_v13 = vrot.slane %v1300_v2, 4 }
  0x2f   : > { %1046 = vmatpush.bf16.msrb.mxu1 %v5895_v14  ;;  %2472 = vmatpush.bf16.msrb.mxu0 %v5935_v15  ;;  %v1303_v14 = vrot.slane %v1201_v4, 6 }
  0x31   : > { %1572 = vmatpush.bf16.msrb.mxu2 %v5902_v16  ;;  %v5317_v16 = vrot.slane %v5269_v6, 9 }
  0x32   : > { %1951 = vmatpush.bf16.msrb.mxu3 %v5926_v17  ;;  %v2203_v17 = vrot.slane %v2201_v5, 4 }
  0x33   : > { %1047 = vmatpush.bf16.msrb.mxu1 %v5894_v18  ;;  %2473 = vmatpush.bf16.msrb.mxu0 %v5934_v19  ;;  %v2204_v18 = vrot.slane %v5271_v7, 5  ;;  %v776_v19 = vsel %vm6265_vm4, %v4997_v8, %v775_v1  ;;  %v681_v8 = vld [vmem:[%s6129_s8 + $0x1c] sm:$0xf] }
  0x35   : > { %1573 = vmatpush.bf16.msrb.mxu2 %v5901_v20  ;;  %v779_v20 = vsel %vm6265_vm4, %v777_v11, %v778_v9  ;;  %v1206_v9 = vld [vmem:[%s6129_s8 + $0x1c] sm:$0xf]  ;;  %v5276_v11 = vld [vmem:[%s6129_s8 + $0x34] sm:$0xf] }
  0x36   : > { %1952 = vmatpush.bf16.msrb.mxu3 %v5925_v21  ;;  %v1301_v21 = vsel %vm6270_vm5, %v5061_v12, %v1300_v2 }
  0x37   : > { %1048 = vmatpush.bf16.msrb.mxu1 %v5893_v22  ;;  %2474 = vmatpush.bf16.msrb.mxu0 %v5933_v23  ;;  %v1304_v22 = vsel %vm6270_vm5, %v1302_v13, %v1303_v14  ;;  %v2202_v23 = vsel %vm6265_vm4, %v5317_v16, %v2201_v5  ;;  %v5905_v14 = vld [vmem:[%s6129_s8 + $0x24] sm:$0xff] }
  0x39   : > { %1574 = vmatpush.bf16.msrb.mxu2 %v5900_v24  ;;  %v2205_v24 = vsel %vm6265_vm4, %v2203_v17, %v2204_v18  ;;  %v680_v17 = vld [vmem:[%s6129_s8 + $0x18] sm:$0xe]  ;;  %v682_v18 = vld [vmem:[%s6129_s8 + $0x20] sm:$0x1] }
  0x3a   : > { %1953 = vmatpush.bf16.msrb.mxu3 %v5924_v25  ;;  %v934_v25 = vunpack.c.l.b16 %v776_v19  ;;  %v789_v19 = vrot.slane %v681_v8, 5 }
  0x3b   : > { %1049 = vmatpush.bf16.msrb.mxu1 %v5892_v26  ;;  %2475 = vmatpush.bf16.msrb.mxu0 %v5932_v27  ;;  %v935_v26 = vunpack.c.l.b16 %v779_v20  ;;  %v1459_v27 = vunpack.c.l.b16 %v1301_v21  ;;  %v1314_v20 = vrot.slane %v1206_v9, 6  ;;  %v1205_v21 = vld [vmem:[%s6129_s8 + $0x18] sm:$0xc] }
  0x3c   : > { %554 = vmatmul.bf16.gmra.mxu1 %v5869_v30  ;;  %574 = vmatmul.bf16.gmra.mxu2 %v5873_v31  ;;  %v2361_v30 = vunpack.c.l.b16 %v2205_v24  ;;  %v678_v31 = vld [vmem:[%s6129_s8 + $0x10] sm:$0xf] }
  0x3d   : > { %1575 = vmatpush.bf16.msrb.mxu2 %v5899_v28  ;;  %594 = vmatmul.bf16.gmra.mxu3 %v5877_v32  ;;  %v1460_v28 = vunpack.c.l.b16 %v1304_v22  ;;  %v1203_v32 = vld [vmem:[%s6129_s8 + $0x10] sm:$0xf]  ;;  %v1207_v22 = vld [vmem:[%s6129_s8 + $0x20] sm:$0x3] }
  0x3e   : > { %1954 = vmatpush.bf16.msrb.mxu3 %v5923_v29  ;;  %534 = vmatmul.bf16.gmra.mxu0 %v5865_v33  ;;  %v2360_v29 = vunpack.c.l.b16 %v2202_v23  ;;  %v5273_v33 = vld [vmem:[%s6129_s8 + $0x28] sm:$0xf]  ;;  %v2215_v23 = vrot.slane %v5276_v11, 5  ;;  %v5275_v24 = vld [vmem:[%s6129_s8 + $0x30] sm:$0xe] }
  0x3f   : > { %1050 = vmatpush.bf16.msrb.mxu1 %v5891_v34  ;;  %2476 = vmatpush.bf16.msrb.mxu0 %v5931_v35  ;;  %v966_v34 = vpack.c.b16 %v935_v26, %v934_v25  ;;  %v1491_v35 = vpack.c.b16 %v1460_v28, %v1459_v27  ;;  %v5277_v25 = vld [vmem:[%s6129_s8 + $0x38] sm:$0x1]  ;;  %v4999_v26 = vrot.slane %v680_v17, 9  ;;  %v792_v27 = vrot.slane %v682_v18, 5  ;;  %v5941_v11 = vld [vmem:[%s7297_s1 + $0x168] sm:$0xff] }
  0x40   : > { %v791_v28 = vrot.slane %v789_v19, 4 }
  0x41   : > { %1576 = vmatpush.bf16.msrb.mxu2 %v5898_v36  ;;  %v782_v36 = vrot.slane %v678_v31, 5  ;;  %v1317_v31 = vrot.slane %v1207_v22, 6 }
  0x42   : > { %1955 = vmatpush.bf16.msrb.mxu3 %v5922_v37  ;;  %v5904_v37 = vld [vmem:[%s6129_s8 + $0x18] sm:$0xff] }
  0x43   : > { %1051 = vmatpush.bf16.msrb.mxu1 %v5890_v38  ;;  %2477 = vmatpush.bf16.msrb.mxu0 %v5930_v39  ;;  %v2392_v38 = vpack.c.b16 %v2361_v30, %v2360_v29  ;;  %v677_v39 = vld [vmem:[%s6129_s8 + $0xc] sm:$0xe]  ;;  %v5063_v29 = vrot.slane %v1205_v21, 10  ;;  %v1316_v30 = vrot.slane %v1314_v20, 4 }
  0x45   : > { %1577 = vmatpush.bf16.msrb.mxu2 %v5897_v40  ;;  %v679_v40 = vld [vmem:[%s6129_s8 + $0x14] sm:$0x1] }
  0x46   : > { %1956 = vmatpush.bf16.msrb.mxu3 %v5921_v41  ;;  %v1307_v41 = vrot.slane %v1203_v32, 6  ;;  %v5319_v32 = vrot.slane %v5275_v24, 9 }
  0x47   : > { %1052 = vmatpush.bf16.msrb.mxu1 %v5889_v42  ;;  %2478 = vmatpush.bf16.msrb.mxu0 %v5929_v43  ;;  %v1202_v42 = vld [vmem:[%s6129_s8 + $0xc] sm:$0xc]  ;;  %v1204_v43 = vld [vmem:[%s6129_s8 + $0x14] sm:$0x3] }
  0x49   : > { %1578 = vmatpush.bf16.msrb.mxu2 %v5896_v44  ;;  %v2208_v44 = vrot.slane %v5273_v33, 5  ;;  %v2217_v33 = vrot.slane %v2215_v23, 4 }
  0x4a   : > { %1957 = vmatpush.bf16.msrb.mxu3 %v5920_v45  ;;  %v5272_v45 = vld [vmem:[%s6129_s8 + $0x24] sm:$0xe] }
  0x4b   : > { %1053 = vmatpush.bf16.msrb.mxu1 %v5888_v46  ;;  %2479 = vmatpush.bf16.msrb.mxu0 %v5928_v47  ;;  %v5274_v46 = vld [vmem:[%s6129_s8 + $0x2c] sm:$0x1]  ;;  %v4998_v47 = vrot.slane %v677_v39, 9  ;;  %v5318_v56 = vrot.slane %v5272_v45, 9  ;;  %v2210_v57 = vrot.slane %v2208_v44, 4  ;;  %v2216_v39 = vsel %vm6265_vm4, %v5319_v32, %v2215_v23  ;;  %v5907_v32 = vld [vmem:[%s6129_s8 + $0x3c] sm:$0xff] }
  0x4c   : > { %559 = vmatmul.bf16.gmra.mxu1 %v5870_v48  ;;  %579 = vmatmul.bf16.gmra.mxu2 %v5874_v49  ;;  %v784_v48 = vrot.slane %v782_v36, 4  ;;  %v785_v49 = vrot.slane %v679_v40, 5  ;;  %v2364_v45 = vunpack.c.l.b16 %v2216_v39 }
  0x4d   : > { %599 = vmatmul.bf16.gmra.mxu3 %v5878_v50  ;;  %3373 = vmatpush.bf16.msra.mxu2 %v5967_v52  ;;  %v5062_v50 = vrot.slane %v1202_v42, 10  ;;  %v1310_v52 = vrot.slane %v1204_v43, 6  ;;  %v2209_v0 = vsel %vm6265_vm4, %v5318_v56, %v2208_v44 }
  0x4e   : > { %539 = vmatmul.bf16.gmra.mxu0 %v5866_v51  ;;  %3895 = vmatpush.bf16.msra.mxu3 %v5975_v53  ;;  %v1309_v51 = vrot.slane %v1307_v41, 4  ;;  %v5966_v53 = vld [vmem:[%s7297_s1 + $0x1b0] sm:$0xff]  ;;  %v2362_v6 = vunpack.c.l.b16 %v2209_v0 }
  0x4f   : > { %2994 = vmatpush.bf16.msra.mxu1 %v5943_v54  ;;  %4417 = vmatpush.bf16.msra.mxu0 %v5983_v55  ;;  %v5974_v54 = vld [vmem:[%s7297_s1 + $0x1f0] sm:$0xff] }
  0x50   : > { %v5942_v55 = vld [vmem:[%s7297_s1 + $0x170] sm:$0xff]  ;;  %v1311_v63 = vsel %vm6270_vm5, %v1309_v51, %v1310_v52 }
  0x51   : > { %3374 = vmatpush.bf16.msra.mxu2 %v5966_v53  ;;  %v1462_v5 = vunpack.c.l.b16 %v1311_v63  ;;  %v5906_v52 = vld [vmem:[%s6129_s8 + $0x30] sm:$0xff] }
  0x52   : > { %3896 = vmatpush.bf16.msra.mxu3 %v5974_v54  ;;  %v683_v54 = vld [vmem:[%s6129_s8 + $0x24] sm:$0xe] }
  0x53   : > { %2995 = vmatpush.bf16.msra.mxu1 %v5942_v55  ;;  %4418 = vmatpush.bf16.msra.mxu0 %v5982_v59  ;;  %v685_v55 = vld [vmem:[%s6129_s8 + $0x2c] sm:$0x1]  ;;  %v5000_v63 = vrot.slane %v683_v54, 9 }
  0x54   : > { %v1210_v59 = vld [vmem:[%s6129_s8 + $0x2c] sm:$0x3]  ;;  %v799_v0 = vrot.slane %v685_v55, 5 }
  0x57   : > { %2996 = vmatpush.bf16.msra.mxu1 %v5941_v11 }
  0x5c   : > { %564 = vmatmul.bf16.gmra.mxu1 %v5871_v58  ;;  %584 = vmatmul.bf16.gmra.mxu2 %v5875_v60  ;;  %v2211_v58 = vrot.slane %v5274_v46, 5  ;;  %v783_v60 = vsel %vm6265_vm4, %v4998_v47, %v782_v36  ;;  %v793_v36 = vsel %vm6265_vm4, %v791_v28, %v792_v27  ;;  %v684_v47 = vld [vmem:[%s6129_s8 + $0x28] sm:$0xf]  ;;  %v1212_v27 = vld [vmem:[%s6129_s8 + $0x34] sm:$0xf] }
  0x5d   : > { %604 = vmatmul.bf16.gmra.mxu3 %v5879_v61  ;;  %v786_v61 = vsel %vm6265_vm4, %v784_v48, %v785_v49  ;;  %v936_v2 = vunpack.c.l.b16 %v783_v60  ;;  %v939_v42 = vunpack.c.l.b16 %v793_v36  ;;  %v1209_v48 = vld [vmem:[%s6129_s8 + $0x28] sm:$0xf]  ;;  %v5279_v49 = vld [vmem:[%s6129_s8 + $0x40] sm:$0xf]  ;;  %v796_v56 = vrot.slane %v684_v47, 5 }
  0x5e   : > { %544 = vmatmul.bf16.gmra.mxu0 %v5867_v62  ;;  %v1308_v62 = vsel %vm6270_vm5, %v5062_v50, %v1307_v41  ;;  %v2212_v1 = vsel %vm6265_vm4, %v2210_v57, %v2211_v58  ;;  %v937_v3 = vunpack.c.l.b16 %v786_v61  ;;  %v1321_v57 = vrot.slane %v1209_v48, 6  ;;  %v1208_v58 = vld [vmem:[%s6129_s8 + $0x24] sm:$0xc]  ;;  %v5278_v61 = vld [vmem:[%s6129_s8 + $0x3c] sm:$0xe] }
  0x5f   : > { %v1461_v4 = vunpack.c.l.b16 %v1308_v62  ;;  %v2363_v7 = vunpack.c.l.b16 %v2212_v1  ;;  %v2222_v60 = vrot.slane %v5279_v49, 5  ;;  %v5280_v62 = vld [vmem:[%s6129_s8 + $0x44] sm:$0x1]  ;;  %v798_v1 = vrot.slane %v796_v56, 4  ;;  %v5282_v28 = vld [vmem:[%s6129_s8 + $0x4c] sm:$0xf] }
  0x60   : > { %v967_v12 = vpack.c.b16 %v937_v3, %v936_v2  ;;  %v5064_v2 = vrot.slane %v1208_v58, 10  ;;  %v1323_v3 = vrot.slane %v1321_v57, 4  ;;  %v2225_v9 = vrot.slane %v5280_v62, 5 }
  0x61   : > { %v1492_v13 = vpack.c.b16 %v1462_v5, %v1461_v4  ;;  %v2393_v16 = vpack.c.b16 %v2363_v7, %v2362_v6  ;;  %v1324_v4 = vrot.slane %v1210_v59, 6  ;;  %v5965_v5 = vld [vmem:[%s7297_s1 + $0x1a8] sm:$0xff]  ;;  %v5320_v7 = vrot.slane %v5278_v61, 9 }
  0x62   : > { %v5973_v6 = vld [vmem:[%s7297_s1 + $0x1e8] sm:$0xff]  ;;  %v2224_v8 = vrot.slane %v2222_v60, 4  ;;  %3375 = vmatpush.bf16.msra.mxu2 %v5965_v5  ;;  %v1328_v36 = vrot.slane %v1212_v27, 6  ;;  %v2229_v39 = vrot.slane %v5282_v28, 5 }
  0x63   : > { %3897 = vmatpush.bf16.msra.mxu3 %v5973_v6  ;;  %v2223_v17 = vsel %vm6265_vm4, %v5320_v7, %v2222_v60  ;;  %v5908_v6 = vld [vmem:[%s6129_s8 + $0x48] sm:$0xff] }
  0x64   : > { %v2226_v18 = vsel %vm6265_vm4, %v2224_v8, %v2225_v9  ;;  %v2366_v24 = vunpack.c.l.b16 %v2223_v17  ;;  %v2231_v49 = vrot.slane %v2229_v39, 4  ;;  %v689_v8 = vld [vmem:[%s6129_s8 + $0x3c] sm:$0xe]  ;;  %v691_v9 = vld [vmem:[%s6129_s8 + $0x44] sm:$0x1] }
  0x65   : > { %v5284_v17 = vld [vmem:[%s6129_s8 + $0x54] sm:$0xe] }
  0x66   : > { %v5322_v27 = vrot.slane %v5284_v17, 9 }
  0x6c   : > { %1054 = vmatmul.bf16.vlgmr.msrb.gmra.mxu1 %v966_v34  ;;  %1579 = vmatmul.bf16.vlgmr.msrb.gmra.mxu2 %v1491_v35  ;;  %v2218_v34 = vrot.slane %v5277_v25, 5  ;;  %v790_v35 = vsel %vm6265_vm4, %v4999_v26, %v789_v19  ;;  %v5981_v19 = vld [vmem:[%s7297_s1 + $0x228] sm:$0xff]  ;;  %v2367_v25 = vunpack.c.l.b16 %v2226_v18  ;;  %v687_v26 = vld [vmem:[%s6129_s8 + $0x34] sm:$0xf]  ;;  %v5286_v18 = vld [vmem:[%s6129_s8 + $0x5c] sm:$0x1] }
  0x6d   : > { %1958 = vmatmul.bf16.vlgmr.msrb.gmra.mxu3 %v5904_v37  ;;  %v1315_v37 = vsel %vm6270_vm5, %v5063_v29, %v1314_v20  ;;  %v938_v41 = vunpack.c.l.b16 %v790_v35  ;;  %4419 = vmatpush.bf16.msra.mxu0 %v5981_v19  ;;  %v688_v35 = vld [vmem:[%s6129_s8 + $0x38] sm:$0x1]  ;;  %v5002_v19 = vrot.slane %v689_v8, 9 }
  0x6e   : > { %2480 = vmatmul.bf16.vlgmr.msrb.gmra.mxu0 %v2392_v38  ;;  %v1318_v38 = vsel %vm6270_vm5, %v1316_v30, %v1317_v31  ;;  %v2219_v40 = vsel %vm6265_vm4, %v2217_v33, %v2218_v34  ;;  %v1463_v43 = vunpack.c.l.b16 %v1315_v37  ;;  %v803_v31 = vrot.slane %v687_v26, 5  ;;  %v686_v34 = vld [vmem:[%s6129_s8 + $0x30] sm:$0xe]  ;;  %v5972_v26 = vld [vmem:[%s7297_s1 + $0x1e0] sm:$0xff] }
  0x6f   : > { %v1464_v44 = vunpack.c.l.b16 %v1318_v38  ;;  %v2365_v46 = vunpack.c.l.b16 %v2219_v40  ;;  %v968_v50 = vpack.c.b16 %v939_v42, %v938_v41  ;;  %v2395_v33 = vpack.c.b16 %v2367_v25, %v2366_v24  ;;  %v1211_v37 = vld [vmem:[%s6129_s8 + $0x30] sm:$0xc]  ;;  %v1213_v38 = vld [vmem:[%s6129_s8 + $0x38] sm:$0x3]  ;;  %v5281_v40 = vld [vmem:[%s6129_s8 + $0x48] sm:$0xe]  ;;  %3898 = vmatpush.bf16.msra.mxu3 %v5972_v26 }
  0x70   : > { %v5283_v41 = vld [vmem:[%s6129_s8 + $0x50] sm:$0x1]  ;;  %v5001_v42 = vrot.slane %v686_v34, 9  ;;  %v1331_v47 = vrot.slane %v1213_v38, 6  ;;  %v5321_v48 = vrot.slane %v5281_v40, 9  ;;  %v5964_v25 = vld [vmem:[%s7297_s1 + $0x1a0] sm:$0xff] }
  0x71   : > { %v1493_v51 = vpack.c.b16 %v1464_v44, %v1463_v43  ;;  %v2394_v53 = vpack.c.b16 %v2365_v46, %v2364_v45  ;;  %v805_v43 = vrot.slane %v803_v31, 4  ;;  %v806_v44 = vrot.slane %v688_v35, 5  ;;  %3376 = vmatpush.bf16.msra.mxu2 %v5964_v25 }
  0x72   : > { %v5065_v45 = vrot.slane %v1211_v37, 10  ;;  %v1330_v46 = vrot.slane %v1328_v36, 4  ;;  %v2230_v55 = vsel %vm6265_vm4, %v5321_v48, %v2229_v39  ;;  %v693_v48 = vld [vmem:[%s6129_s8 + $0x4c] sm:$0xf] }
  0x73   : > { %v2368_v61 = vunpack.c.l.b16 %v2230_v55  ;;  %v817_v55 = vrot.slane %v693_v48, 5  ;;  %v695_v48 = vld [vmem:[%s6129_s8 + $0x54] sm:$0xe] }
  0x74   : > { %v1332_v54 = vsel %vm6270_vm5, %v1330_v46, %v1331_v47 }
  0x75   : > { %v1468_v60 = vunpack.c.l.b16 %v1332_v54 }
  0x7c   : > { %1059 = vmatmul.bf16.gmra.mxu1 %v967_v12  ;;  %1584 = vmatmul.bf16.gmra.mxu2 %v1492_v13  ;;  %v797_v12 = vsel %vm6265_vm4, %v5000_v63, %v796_v56  ;;  %v800_v13 = vsel %vm6265_vm4, %v798_v1, %v799_v0  ;;  %v690_v63 = vld [vmem:[%s6129_s8 + $0x40] sm:$0xf]  ;;  %v5285_v1 = vld [vmem:[%s6129_s8 + $0x58] sm:$0xf] }
  0x7d   : > { %1963 = vmatmul.bf16.gmra.mxu3 %v5905_v14  ;;  %v1322_v14 = vsel %vm6270_vm5, %v5064_v2, %v1321_v57  ;;  %v940_v20 = vunpack.c.l.b16 %v797_v12  ;;  %v941_v21 = vunpack.c.l.b16 %v800_v13  ;;  %v1215_v0 = vld [vmem:[%s6129_s8 + $0x40] sm:$0xf]  ;;  %v1214_v13 = vld [vmem:[%s6129_s8 + $0x3c] sm:$0xc] }
  0x7e   : > { %2485 = vmatmul.bf16.gmra.mxu0 %v2393_v16  ;;  %v1325_v16 = vsel %vm6270_vm5, %v1323_v3, %v1324_v4  ;;  %v1465_v22 = vunpack.c.l.b16 %v1322_v14  ;;  %v810_v4 = vrot.slane %v690_v63, 5  ;;  %v1335_v11 = vrot.slane %v1215_v0, 6  ;;  %v1216_v14 = vld [vmem:[%s6129_s8 + $0x44] sm:$0x3]  ;;  %v1217_v63 = vld [vmem:[%s6129_s8 + $0x48] sm:$0xc] }
  0x7f   : > { %v1466_v23 = vunpack.c.l.b16 %v1325_v16  ;;  %v969_v29 = vpack.c.b16 %v941_v21, %v940_v20  ;;  %v2236_v16 = vrot.slane %v5285_v1, 5  ;;  %v813_v21 = vrot.slane %v691_v9, 5  ;;  %v1219_v0 = vld [vmem:[%s6129_s8 + $0x50] sm:$0x3] }
  0x80   : > { %v812_v20 = vrot.slane %v810_v4, 4  ;;  %v1338_v24 = vrot.slane %v1216_v14, 6  ;;  %v811_v34 = vsel %vm6265_vm4, %v5002_v19, %v810_v4  ;;  %v5067_v8 = vrot.slane %v1217_v63, 10 }
  0x81   : > { %v1494_v30 = vpack.c.b16 %v1466_v23, %v1465_v22  ;;  %v5066_v22 = vrot.slane %v1214_v13, 10  ;;  %v1337_v23 = vrot.slane %v1335_v11, 4  ;;  %v2238_v28 = vrot.slane %v2236_v16, 4 }
  0x82   : > { %v814_v35 = vsel %vm6265_vm4, %v812_v20, %v813_v21  ;;  %v2237_v39 = vsel %vm6265_vm4, %v5322_v27, %v2236_v16 }
  0x83   : > { %v1339_v37 = vsel %vm6270_vm5, %v1337_v23, %v1338_v24  ;;  %v2370_v46 = vunpack.c.l.b16 %v2237_v39 }
  0x8c   : > { %1064 = vmatmul.bf16.gmra.mxu1 %v968_v50  ;;  %1589 = vmatmul.bf16.gmra.mxu2 %v1493_v51  ;;  %v2232_v50 = vrot.slane %v5283_v41, 5  ;;  %v804_v51 = vsel %vm6265_vm4, %v5001_v42, %v803_v31  ;;  %v5980_v41 = vld [vmem:[%s7297_s1 + $0x220] sm:$0xff]  ;;  %v944_v42 = vunpack.c.l.b16 %v811_v34 }
  0x8d   : > { %1968 = vmatmul.bf16.gmra.mxu3 %v5906_v52  ;;  %v807_v52 = vsel %vm6265_vm4, %v805_v43, %v806_v44  ;;  %v942_v57 = vunpack.c.l.b16 %v804_v51  ;;  %v945_v43 = vunpack.c.l.b16 %v814_v35  ;;  %4420 = vmatpush.bf16.msra.mxu0 %v5980_v41  ;;  %v5288_v51 = vld [vmem:[%s6129_s8 + $0x64] sm:$0xf] }
  0x8e   : > { %2490 = vmatmul.bf16.gmra.mxu0 %v2394_v53  ;;  %v1329_v53 = vsel %vm6270_vm5, %v5065_v45, %v1328_v36  ;;  %v2233_v56 = vsel %vm6265_vm4, %v2231_v49, %v2232_v50  ;;  %v943_v58 = vunpack.c.l.b16 %v807_v52  ;;  %v1336_v36 = vsel %vm6270_vm5, %v5066_v22, %v1335_v11  ;;  %v1218_v49 = vld [vmem:[%s6129_s8 + $0x4c] sm:$0xf] }
  0x8f   : > { %v1467_v59 = vunpack.c.l.b16 %v1329_v53  ;;  %v2369_v62 = vunpack.c.l.b16 %v2233_v56  ;;  %v1469_v44 = vunpack.c.l.b16 %v1336_v36  ;;  %v1470_v45 = vunpack.c.l.b16 %v1339_v37  ;;  %v696_v36 = vld [vmem:[%s6129_s8 + $0x58] sm:$0xf] }
  0x90   : > { %v970_v2 = vpack.c.b16 %v943_v58, %v942_v57  ;;  %v971_v53 = vpack.c.b16 %v945_v43, %v944_v42  ;;  %v5909_v57 = vld [vmem:[%s6129_s8 + $0x54] sm:$0xff]  ;;  %v2243_v1 = vrot.slane %v5288_v51, 5  ;;  %v1345_v11 = vrot.slane %v1219_v0, 6 }
  0x91   : > { %v1495_v3 = vpack.c.b16 %v1468_v60, %v1467_v59  ;;  %v2396_v7 = vpack.c.b16 %v2369_v62, %v2368_v61  ;;  %v1496_v54 = vpack.c.b16 %v1470_v45, %v1469_v44  ;;  %v692_v59 = vld [vmem:[%s6129_s8 + $0x48] sm:$0xe]  ;;  %v694_v60 = vld [vmem:[%s6129_s8 + $0x50] sm:$0x1]  ;;  %v1342_v61 = vrot.slane %v1218_v49, 6 }
  0x92   : > { %v5003_v4 = vrot.slane %v692_v59, 9  ;;  %v2245_v14 = vrot.slane %v2243_v1, 4  ;;  %v1221_v37 = vld [vmem:[%s6129_s8 + $0x58] sm:$0xf]  ;;  %v824_v44 = vrot.slane %v696_v36, 5 }
  0x93   : > { %v1344_v9 = vrot.slane %v1342_v61, 4  ;;  %v1343_v22 = vsel %vm6270_vm5, %v5067_v8, %v1342_v61  ;;  %v697_v49 = vld [vmem:[%s6129_s8 + $0x5c] sm:$0x1]  ;;  %v1349_v51 = vrot.slane %v1221_v37, 6  ;;  %v5292_v59 = vld [vmem:[%s6129_s8 + $0x74] sm:$0x1] }
  0x94   : > { %v818_v20 = vsel %vm6265_vm4, %v5003_v4, %v817_v55  ;;  %v826_v61 = vrot.slane %v824_v44, 4  ;;  %v827_v63 = vrot.slane %v697_v49, 5  ;;  %v5971_v4 = vld [vmem:[%s7297_s1 + $0x1d8] sm:$0xff]  ;;  %v2253_v8 = vrot.slane %v5292_v59, 5  ;;  %v699_v37 = vld [vmem:[%s6129_s8 + $0x64] sm:$0xf] }
  0x95   : > { %v1346_v23 = vsel %vm6270_vm5, %v1344_v9, %v1345_v11  ;;  %v946_v27 = vunpack.c.l.b16 %v818_v20  ;;  %3899 = vmatpush.bf16.msra.mxu3 %v5971_v4 }
  0x9c   : > { %1069 = vmatmul.bf16.gmra.mxu1 %v969_v29  ;;  %1594 = vmatmul.bf16.gmra.mxu2 %v1494_v30  ;;  %v2239_v29 = vrot.slane %v5286_v18, 5 }
  0x9d   : > { %1973 = vmatmul.bf16.gmra.mxu3 %v5907_v32  ;;  %v5940_v32 = vld [vmem:[%s7297_s1 + $0x160] sm:$0xff] }
  0x9e   : > { %2495 = vmatmul.bf16.gmra.mxu0 %v2395_v33  ;;  %v2240_v40 = vsel %vm6265_vm4, %v2238_v28, %v2239_v29  ;;  %2997 = vmatpush.bf16.msra.mxu1 %v5940_v32  ;;  %v1471_v29 = vunpack.c.l.b16 %v1343_v22  ;;  %v1472_v32 = vunpack.c.l.b16 %v1346_v23 }
  0x9f   : > { %v2371_v47 = vunpack.c.l.b16 %v2240_v40  ;;  %v5291_v40 = vld [vmem:[%s6129_s8 + $0x70] sm:$0xf] }
  0xa0   : > { %v1497_v43 = vpack.c.b16 %v1472_v32, %v1471_v29 }
  0xa1   : > { %v2397_v58 = vpack.c.b16 %v2371_v47, %v2370_v46  ;;  %v5910_v46 = vld [vmem:[%s6129_s8 + $0x60] sm:$0xff] }
  0xa9   : > { %v6401_v5 = vpop.f32.mrf.mxu1 }
  0xab   : > { %v6406_v12 = vpop.f32.mrf.mxu0 }
  0xac   : > { %1074 = vmatmul.bf16.gmra.mxu1 %v970_v2  ;;  %1599 = vmatmul.bf16.gmra.mxu2 %v1495_v3  ;;  %v5287_v2 = vld [vmem:[%s6129_s8 + $0x60] sm:$0xe]  ;;  %v5289_v3 = vld [vmem:[%s6129_s8 + $0x68] sm:$0x1] }
  0xad   : > { %1978 = vmatmul.bf16.gmra.mxu3 %v5908_v6  ;;  %v819_v6 = vrot.slane %v817_v55, 4  ;;  %v5323_v13 = vrot.slane %v5287_v2, 9  ;;  %v2246_v16 = vrot.slane %v5289_v3, 5  ;;  %v1222_v55 = vld [vmem:[%s6129_s8 + $0x5c] sm:$0x3] }
  0xae   : > { %2500 = vmatmul.bf16.gmra.mxu0 %v2396_v7  ;;  %v820_v7 = vrot.slane %v694_v60, 5  ;;  %v5004_v60 = vrot.slane %v695_v48, 9  ;;  %v1352_v2 = vrot.slane %v1222_v55, 6  ;;  %v5963_v3 = vld [vmem:[%s7297_s1 + $0x198] sm:$0xff]  ;;  %v831_v48 = vrot.slane %v699_v37, 5 }
  0xaf   : > { %v6418_v30 = vpop.f32.mrf.mxu2  ;;  %v2244_v25 = vsel %vm6265_vm4, %v5323_v13, %v2243_v1  ;;  %v2247_v26 = vsel %vm6265_vm4, %v2245_v14, %v2246_v16  ;;  %v1351_v1 = vrot.slane %v1349_v51, 4  ;;  %3377 = vmatpush.bf16.msra.mxu2 %v5963_v3  ;;  %v828_v16 = vsel %vm6265_vm4, %v826_v61, %v827_v63  ;;  %v698_v55 = vld [vmem:[%s6129_s8 + $0x60] sm:$0xe]  ;;  %v1225_v61 = vld [vmem:[%s6129_s8 + $0x68] sm:$0x3] }
  0xb0   : > { %v6420_v31 = vpop.f32.mrf.mxu3  ;;  %v821_v21 = vsel %vm6265_vm4, %v819_v6, %v820_v7  ;;  %v2372_v34 = vunpack.c.l.b16 %v2244_v25  ;;  %v2373_v35 = vunpack.c.l.b16 %v2247_v26  ;;  %v825_v14 = vsel %vm6265_vm4, %v5004_v60, %v824_v44  ;;  %v5939_v26 = vld [vmem:[%s7297_s1 + $0x158] sm:$0xff]  ;;  %v1223_v60 = vld [vmem:[%s6129_s8 + $0x60] sm:$0xc] }
  0xb1   : > { %v6425_v33 = vpop.f32.mrf.mxu1  ;;  %v947_v28 = vunpack.c.l.b16 %v821_v21  ;;  %v1353_v21 = vsel %vm6270_vm5, %v1351_v1, %v1352_v2  ;;  %v949_v29 = vunpack.c.l.b16 %v828_v16  ;;  %2998 = vmatpush.bf16.msra.mxu1 %v5939_v26  ;;  %v5295_v1 = vld [vmem:[%s6129_s8 + $0x80] sm:$0x1]  ;;  %v5005_v2 = vrot.slane %v698_v55, 9  ;;  %v5297_v55 = vld [vmem:[%s6129_s8 + $0x88] sm:$0xf] }
  0xb2   : > { %v2398_v47 = vpack.c.b16 %v2373_v35, %v2372_v34  ;;  %v1474_v34 = vunpack.c.l.b16 %v1353_v21  ;;  %v833_v3 = vrot.slane %v831_v48, 4 }
  0xb3   : > { %v6435_v38 = vpop.f32.mrf.mxu0  ;;  %v972_v42 = vpack.c.b16 %v947_v28, %v946_v27  ;;  %v5979_v27 = vld [vmem:[%s7297_s1 + $0x218] sm:$0xff]  ;;  %v948_v28 = vunpack.c.l.b16 %v825_v14  ;;  %v832_v26 = vsel %vm6265_vm4, %v5005_v2, %v831_v48  ;;  %v702_v48 = vld [vmem:[%s6129_s8 + $0x70] sm:$0xf]  ;;  %v701_v2 = vld [vmem:[%s6129_s8 + $0x6c] sm:$0xe] }
  0xb4   : > { %4421 = vmatpush.bf16.msra.mxu0 %v5979_v27 }
  0xb7   : > { %v6446_v50 = vpop.f32.mrf.mxu2 }
  0xb8   : > { %v6449_v52 = vpop.f32.mrf.mxu3 }
  0xb9   : > { %v6451_v56 = vpop.f32.mrf.mxu1 }
  0xbb   : > { %v6456_v62 = vpop.f32.mrf.mxu0 }
  0xbc   : > { %1079 = vmatmul.bf16.gmra.mxu1 %v971_v53  ;;  %1604 = vmatmul.bf16.gmra.mxu2 %v1496_v54  ;;  %v1220_v54 = vld [vmem:[%s6129_s8 + $0x54] sm:$0xc] }
  0xbd   : > { %1983 = vmatmul.bf16.gmra.mxu3 %v5909_v57  ;;  %v2250_v57 = vrot.slane %v5291_v40, 5  ;;  %v5068_v0 = vrot.slane %v1220_v54, 10  ;;  %v1224_v40 = vld [vmem:[%s6129_s8 + $0x64] sm:$0xf] }
  0xbe   : > { %2505 = vmatmul.bf16.gmra.mxu0 %v2397_v58  ;;  %v5290_v58 = vld [vmem:[%s6129_s8 + $0x6c] sm:$0xe] }
  0xbf   : > { %v6462_v17 = vpop.f32.mrf.mxu2  ;;  %v5324_v6 = vrot.slane %v5290_v58, 9  ;;  %v2252_v7 = vrot.slane %v2250_v57, 4  ;;  %v1350_v20 = vsel %vm6270_vm5, %v5068_v0, %v1349_v51  ;;  %v5911_v51 = vld [vmem:[%s6129_s8 + $0x6c] sm:$0xff]  ;;  %v1356_v58 = vrot.slane %v1224_v40, 6  ;;  %v5293_v0 = vld [vmem:[%s6129_s8 + $0x78] sm:$0xe] }
  0xc0   : > { %v6464_v18 = vpop.f32.mrf.mxu3  ;;  %v1473_v32 = vunpack.c.l.b16 %v1350_v20  ;;  %v5325_v14 = vrot.slane %v5293_v0, 9  ;;  %v2260_v20 = vrot.slane %v5295_v1, 5  ;;  %v5912_v0 = vld [vmem:[%s6129_s8 + $0x78] sm:$0xff] }
  0xc1   : > { %v6466_v19 = vpop.f32.mrf.mxu1  ;;  %v2251_v23 = vsel %vm6265_vm4, %v5324_v6, %v2250_v57  ;;  %v2254_v25 = vsel %vm6265_vm4, %v2252_v7, %v2253_v8  ;;  %v700_v57 = vld [vmem:[%s6129_s8 + $0x68] sm:$0x1]  ;;  %v5069_v6 = vrot.slane %v1223_v60, 10  ;;  %v1358_v7 = vrot.slane %v1356_v58, 4 }
  0xc2   : > { %v2374_v35 = vunpack.c.l.b16 %v2251_v23  ;;  %v2375_v36 = vunpack.c.l.b16 %v2254_v25  ;;  %v834_v4 = vrot.slane %v700_v57, 5  ;;  %v1359_v8 = vrot.slane %v1225_v61, 6 }
  0xc3   : > { %v6476_v24 = vpop.f32.mrf.mxu0  ;;  %v838_v61 = vrot.slane %v702_v48, 5 }
  0xc4   : > { %v2399_v54 = vpack.c.b16 %v2375_v36, %v2374_v35  ;;  %v835_v27 = vsel %vm6265_vm4, %v833_v3, %v834_v4  ;;  %v950_v36 = vunpack.c.l.b16 %v832_v26  ;;  %v703_v3 = vld [vmem:[%s6129_s8 + $0x74] sm:$0x1]  ;;  %v5298_v26 = vld [vmem:[%s6129_s8 + $0x8c] sm:$0x1] }
  0xc5   : > { %v951_v37 = vunpack.c.l.b16 %v835_v27  ;;  %v5006_v27 = vrot.slane %v701_v2, 9 }
  0xc7   : > { %v6484_v39 = vpop.f32.mrf.mxu2 }
  0xc8   : > { %v6487_v41 = vpop.f32.mrf.mxu3 }
  0xc9   : > { %v6489_v45 = vpop.f32.mrf.mxu1 }
  0xcb   : > { %v6494_v53 = vpop.f32.mrf.mxu0 }
  0xcc   : > { %1084 = vmatmul.bf16.gmra.mxu1 %v972_v42  ;;  %1609 = vmatmul.bf16.gmra.mxu2 %v1497_v43  ;;  %v5294_v43 = vld [vmem:[%s6129_s8 + $0x7c] sm:$0xf] }
  0xcd   : > { %1988 = vmatmul.bf16.gmra.mxu3 %v5910_v46  ;;  %v973_v46 = vpack.c.b16 %v949_v29, %v948_v28  ;;  %v2257_v63 = vrot.slane %v5294_v43, 5  ;;  %v1357_v28 = vsel %vm6270_vm5, %v5069_v6, %v1356_v58  ;;  %v1360_v29 = vsel %vm6270_vm5, %v1358_v7, %v1359_v8  ;;  %v1226_v8 = vld [vmem:[%s6129_s8 + $0x6c] sm:$0xc] }
  0xce   : > { %2510 = vmatmul.bf16.gmra.mxu0 %v2398_v47  ;;  %v1498_v47 = vpack.c.b16 %v1474_v34, %v1473_v32  ;;  %v1475_v40 = vunpack.c.l.b16 %v1357_v28  ;;  %v1476_v43 = vunpack.c.l.b16 %v1360_v29  ;;  %v974_v58 = vpack.c.b16 %v951_v37, %v950_v36  ;;  %v5970_v37 = vld [vmem:[%s7297_s1 + $0x1d0] sm:$0xff] }
  0xcf   : > { %v6506_v9 = vpop.f32.mrf.mxu2  ;;  %v2259_v16 = vrot.slane %v2257_v63, 4  ;;  %v2258_v34 = vsel %vm6265_vm4, %v5325_v14, %v2257_v63  ;;  %v1228_v14 = vld [vmem:[%s6129_s8 + $0x74] sm:$0x3]  ;;  %v840_v28 = vrot.slane %v838_v61, 4  ;;  %v841_v29 = vrot.slane %v703_v3, 5  ;;  %3900 = vmatpush.bf16.msra.mxu3 %v5970_v37 }
  0xd0   : > { %v6508_v11 = vpop.f32.mrf.mxu3  ;;  %v1499_v60 = vpack.c.b16 %v1476_v43, %v1475_v40  ;;  %v1366_v36 = vrot.slane %v1228_v14, 6 }
  0xd1   : > { %v6510_v13 = vpop.f32.mrf.mxu1  ;;  %v2261_v35 = vsel %vm6265_vm4, %v2259_v16, %v2260_v20  ;;  %v2264_v16 = vrot.slane %v5297_v55, 5  ;;  %v5296_v20 = vld [vmem:[%s6129_s8 + $0x84] sm:$0xe]  ;;  %v839_v55 = vsel %vm6265_vm4, %v5006_v27, %v838_v61 }
  0xd2   : > { %v5326_v40 = vrot.slane %v5296_v20, 9  ;;  %v952_v14 = vunpack.c.l.b16 %v839_v55  ;;  %v706_v55 = vld [vmem:[%s6129_s8 + $0x80] sm:$0x1] }
  0xd3   : > { %v6520_v22 = vpop.f32.mrf.mxu0  ;;  %v2266_v43 = vrot.slane %v2264_v16, 4 }
  0xd7   : > { %v6534_v42 = vpop.f32.mrf.mxu2 }
  0xd8   : > { %v6537_v44 = vpop.f32.mrf.mxu3 }
  0xd9   : > { %v6539_v49 = vpop.f32.mrf.mxu1 }
  0xdb   : > { %v6544_v59 = vpop.f32.mrf.mxu0 }
  0xdc   : > { %1089 = vmatmul.bf16.gmra.mxu1 %v973_v46  ;;  %1614 = vmatmul.bf16.gmra.mxu2 %v1498_v47  ;;  %v2376_v46 = vunpack.c.l.b16 %v2258_v34  ;;  %v2377_v47 = vunpack.c.l.b16 %v2261_v35  ;;  %v5070_v34 = vrot.slane %v1226_v8, 10  ;;  %v5978_v8 = vld [vmem:[%s7297_s1 + $0x210] sm:$0xff] }
  0xdd   : > { %1993 = vmatmul.bf16.gmra.mxu3 %v5911_v51  ;;  %v1227_v51 = vld [vmem:[%s6129_s8 + $0x70] sm:$0xf]  ;;  %4422 = vmatpush.bf16.msra.mxu0 %v5978_v8 }
  0xde   : > { %2515 = vmatmul.bf16.gmra.mxu0 %v2399_v54  ;;  %v2400_v1 = vpack.c.b16 %v2377_v47, %v2376_v46  ;;  %v1363_v4 = vrot.slane %v1227_v51, 6  ;;  %v2267_v46 = vrot.slane %v5298_v26, 5 }
  0xdf   : > { %v6550_v21 = vpop.f32.mrf.mxu2 }
  0xe0   : > { %v6552_v23 = vpop.f32.mrf.mxu3  ;;  %v1365_v35 = vrot.slane %v1363_v4, 4  ;;  %v2268_v61 = vsel %vm6265_vm4, %v2266_v43, %v2267_v46 }
  0xe1   : > { %v6554_v25 = vpop.f32.mrf.mxu1 }
  0xe3   : > { %v6564_v32 = vpop.f32.mrf.mxu0 }
  0xe7   : > { %v6572_v54 = vpop.f32.mrf.mxu2 }
  0xe8   : > { %v6575_v57 = vpop.f32.mrf.mxu3 }
  0xe9   : > { %v1055_v63 = vpop.f32.mrf.mxu1 }
  0xea   : > { %v1135_v6 = vadd.f32 %v1055_v63, %v6406_v12  ;;  %v5962_v12 = vld [vmem:[%s7297_s1 + $0x190] sm:$0xff]  ;;  %v1364_v63 = vsel %vm6270_vm5, %v5070_v34, %v1363_v4  ;;  %v1230_v34 = vld [vmem:[%s6129_s8 + $0x7c] sm:$0xf] }
  0xeb   : > { %v2481_v7 = vpop.f32.mrf.mxu0  ;;  %3378 = vmatpush.bf16.msra.mxu2 %v5962_v12  ;;  %v5938_v4 = vld [vmem:[%s7297_s1 + $0x150] sm:$0xff] }
  0xec   : > { %1094 = vmatmul.bf16.gmra.mxu1 %v974_v58  ;;  %1619 = vmatmul.bf16.gmra.mxu2 %v1499_v60  ;;  %v842_v60 = vsel %vm6265_vm4, %v840_v28, %v841_v29  ;;  %v2379_v28 = vunpack.c.l.b16 %v2268_v61  ;;  %v705_v29 = vld [vmem:[%s6129_s8 + $0x7c] sm:$0xf] }
  0xed   : > { %1998 = vmatmul.bf16.gmra.mxu3 %v5912_v0  ;;  %v1367_v0 = vsel %vm6270_vm5, %v1365_v35, %v1366_v36  ;;  %v953_v20 = vunpack.c.l.b16 %v842_v60  ;;  %2999 = vmatpush.bf16.msra.mxu1 %v5938_v4  ;;  %v5300_v36 = vld [vmem:[%s6129_s8 + $0x94] sm:$0xf]  ;;  %v845_v46 = vrot.slane %v705_v29, 5  ;;  %v5301_v4 = vld [vmem:[%s6129_s8 + $0x98] sm:$0x1] }
  0xee   : > { %2520 = vmatmul.bf16.gmra.mxu0 %v2400_v1  ;;  %v1478_v26 = vunpack.c.l.b16 %v1367_v0  ;;  %v2271_v61 = vrot.slane %v5300_v36, 5 }
  0xef   : > { %v1580_v47 = vpop.f32.mrf.mxu2 }
  0xf0   : > { %v1660_v48 = vadd.f32 %v1580_v47, %v1135_v6  ;;  %v1959_v51 = vpop.f32.mrf.mxu3  ;;  %v2265_v6 = vsel %vm6265_vm4, %v5326_v40, %v2264_v16  ;;  %v975_v40 = vpack.c.b16 %v953_v20, %v952_v14  ;;  %v847_v14 = vrot.slane %v845_v46, 4 }
  0xf1   : > { %v1057_v58 = vpop.f32.mrf.mxu1  ;;  %v2378_v27 = vunpack.c.l.b16 %v2265_v6  ;;  %v1231_v6 = vld [vmem:[%s6129_s8 + $0x80] sm:$0x3] }
  0xf2   : > { %v2039_v1 = vadd.f32 %v1959_v51, %v1660_v48  ;;  %v1136_v2 = vadd.f32 %v1057_v58, %v6435_v38  ;;  %v1477_v38 = vunpack.c.l.b16 %v1364_v63  ;;  %v5913_v48 = vld [vmem:[%s6129_s8 + $0x84] sm:$0xff]  ;;  %v704_v51 = vld [vmem:[%s6129_s8 + $0x78] sm:$0xe]  ;;  %v1370_v58 = vrot.slane %v1230_v34, 6 }
  0xf3   : > { %v2483_v3 = vpop.f32.mrf.mxu0  ;;  %v5007_v8 = vrot.slane %v704_v51, 9  ;;  %v2274_v34 = vrot.slane %v5301_v4, 5 }
  0xf4   : > { %v6610_v16 = vadd.f32 %v2481_v7, %v2039_v1  ;;  %v1500_v43 = vpack.c.b16 %v1478_v26, %v1477_v38  ;;  %v2401_v7 = vpack.c.b16 %v2379_v28, %v2378_v27  ;;  %v1229_v1 = vld [vmem:[%s6129_s8 + $0x78] sm:$0xc]  ;;  %v848_v38 = vrot.slane %v706_v55, 5 }
  0xf5   : > { %v5071_v26 = vrot.slane %v1229_v1, 10  ;;  %v1372_v27 = vrot.slane %v1370_v58, 4  ;;  %v1373_v28 = vrot.slane %v1231_v6, 6 }
  0xf7   : > { %v1582_v35 = vpop.f32.mrf.mxu2 }
  0xf8   : > { %v1661_v12 = vadd.f32 %v1582_v35, %v1136_v2  ;;  %v1961_v37 = vpop.f32.mrf.mxu3  ;;  %v5299_v2 = vld [vmem:[%s6129_s8 + $0x90] sm:$0xe] }
  0xf9   : > { %v1060_v47 = vpop.f32.mrf.mxu1  ;;  %v5327_v29 = vrot.slane %v5299_v2, 9 }
  0xfa   : > { %v2040_v60 = vadd.f32 %v1961_v37, %v1661_v12  ;;  %v1137_v63 = vadd.f32 %v1060_v47, %v6456_v62  ;;  %v2273_v62 = vrot.slane %v2271_v61, 4  ;;  %v846_v37 = vsel %vm6265_vm4, %v5007_v8, %v845_v46  ;;  %v708_v8 = vld [vmem:[%s6129_s8 + $0x88] sm:$0xf] }
  0xfb   : > { %v2486_v0 = vpop.f32.mrf.mxu0  ;;  %v1374_v47 = vsel %vm6270_vm5, %v1372_v27, %v1373_v28  ;;  %v2272_v46 = vsel %vm6265_vm4, %v5327_v29, %v2271_v61  ;;  %v852_v29 = vrot.slane %v708_v8, 5  ;;  %v5969_v8 = vld [vmem:[%s7297_s1 + $0x1c8] sm:$0xff] }
  0xfc   : > { %1099 = vmatmul.bf16.gmra.mxu1 %v975_v40  ;;  %1624 = vmatmul.bf16.gmra.mxu2 %v1500_v43  ;;  %v6623_v20 = vadd.f32 %v2483_v3, %v2040_v60  ;;  %v849_v3 = vsel %vm6265_vm4, %v847_v14, %v848_v38  ;;  %v1371_v43 = vsel %vm6270_vm5, %v5071_v26, %v1370_v58  ;;  %v954_v60 = vunpack.c.l.b16 %v846_v37  ;;  %v5303_v38 = vld [vmem:[%s6129_s8 + $0xa0] sm:$0xf] }
  0xfd   : > { %2003 = vmatmul.bf16.gmra.mxu3 %v5913_v48  ;;  %v2275_v55 = vsel %vm6265_vm4, %v2273_v62, %v2274_v34  ;;  %v1479_v1 = vunpack.c.l.b16 %v1371_v43  ;;  %v1480_v6 = vunpack.c.l.b16 %v1374_v47  ;;  %v2380_v2 = vunpack.c.l.b16 %v2272_v46  ;;  %v5914_v34 = vld [vmem:[%s6129_s8 + $0x90] sm:$0xff]  ;;  %v1232_v43 = vld [vmem:[%s6129_s8 + $0x84] sm:$0xc]  ;;  %v1234_v47 = vld [vmem:[%s6129_s8 + $0x8c] sm:$0x3] }
  0xfe   : > { %2525 = vmatmul.bf16.gmra.mxu0 %v2401_v7  ;;  %v2381_v4 = vunpack.c.l.b16 %v2275_v55  ;;  %v5304_v46 = vld [vmem:[%s6129_s8 + $0xa4] sm:$0x1]  ;;  %3901 = vmatpush.bf16.msra.mxu3 %v5969_v8 }
  0xff   : > { %v1585_v35 = vpop.f32.mrf.mxu2  ;;  %v1501_v28 = vpack.c.b16 %v1480_v6, %v1479_v1  ;;  %v5072_v6 = vrot.slane %v1232_v43, 10  ;;  %v5977_v43 = vld [vmem:[%s7297_s1 + $0x208] sm:$0xff] }
 0x100   : > { %v1662_v12 = vadd.f32 %v1585_v35, %v1137_v63  ;;  %v1964_v36 = vpop.f32.mrf.mxu3  ;;  %v955_v63 = vunpack.c.l.b16 %v849_v3  ;;  %v707_v35 = vld [vmem:[%s6129_s8 + $0x84] sm:$0xe]  ;;  %4423 = vmatpush.bf16.msra.mxu0 %v5977_v43 }
 0x101   : > { %v1062_v40 = vpop.f32.mrf.mxu1  ;;  %v5008_v55 = vrot.slane %v707_v35, 9 }
 0x102   : > { %v2041_v48 = vadd.f32 %v1964_v36, %v1662_v12  ;;  %v1138_v7 = vadd.f32 %v1062_v40, %v6476_v24  ;;  %v1233_v24 = vld [vmem:[%s6129_s8 + $0x88] sm:$0xf]  ;;  %v976_v27 = vpack.c.b16 %v955_v63, %v954_v60  ;;  %v709_v12 = vld [vmem:[%s6129_s8 + $0x8c] sm:$0x1]  ;;  %v854_v60 = vrot.slane %v852_v29, 4 }
 0x103   : > { %v2488_v51 = vpop.f32.mrf.mxu0  ;;  %v1377_v36 = vrot.slane %v1233_v24, 6  ;;  %v855_v1 = vrot.slane %v709_v12, 5 }
 0x104   : > { %v6638_v58 = vadd.f32 %v2486_v0, %v2041_v48  ;;  %v2402_v0 = vpack.c.b16 %v2381_v4, %v2380_v2  ;;  %v2278_v48 = vrot.slane %v5303_v38, 5  ;;  %v1380_v4 = vrot.slane %v1234_v47, 6 }
 0x105   : > { %v1379_v2 = vrot.slane %v1377_v36, 4  ;;  %v2281_v38 = vrot.slane %v5304_v46, 5 }
 0x107   : > { %v1587_v14 = vpop.f32.mrf.mxu2 }
 0x108   : > { %v1663_v61 = vadd.f32 %v1587_v14, %v1138_v7  ;;  %v1966_v26 = vpop.f32.mrf.mxu3  ;;  %v5302_v7 = vld [vmem:[%s6129_s8 + $0x9c] sm:$0xe]  ;;  %v2280_v14 = vrot.slane %v2278_v48, 4 }
 0x109   : > { %v1065_v62 = vpop.f32.mrf.mxu1  ;;  %v5328_v24 = vrot.slane %v5302_v7, 9 }
 0x10a   : > { %v2042_v37 = vadd.f32 %v1966_v26, %v1663_v61  ;;  %v1139_v40 = vadd.f32 %v1065_v62, %v6494_v53  ;;  %v5961_v53 = vld [vmem:[%s7297_s1 + $0x188] sm:$0xff]  ;;  %v856_v62 = vsel %vm6265_vm4, %v854_v60, %v855_v1  ;;  %v711_v1 = vld [vmem:[%s6129_s8 + $0x94] sm:$0xf] }
 0x10b   : > { %v2491_v3 = vpop.f32.mrf.mxu0  ;;  %3379 = vmatpush.bf16.msra.mxu2 %v5961_v53  ;;  %v957_v7 = vunpack.c.l.b16 %v856_v62 }
 0x10c   : > { %1104 = vmatmul.bf16.gmra.mxu1 %v976_v27  ;;  %1629 = vmatmul.bf16.gmra.mxu2 %v1501_v28  ;;  %v6651_v63 = vadd.f32 %v2488_v51, %v2042_v37  ;;  %v853_v27 = vsel %vm6265_vm4, %v5008_v55, %v852_v29  ;;  %v2282_v29 = vsel %vm6265_vm4, %v2280_v14, %v2281_v38  ;;  %v859_v38 = vrot.slane %v711_v1, 5 }
 0x10d   : > { %2008 = vmatmul.bf16.gmra.mxu3 %v5914_v34  ;;  %v1378_v34 = vsel %vm6270_vm5, %v5072_v6, %v1377_v36  ;;  %v5937_v36 = vld [vmem:[%s7297_s1 + $0x148] sm:$0xff]  ;;  %v956_v47 = vunpack.c.l.b16 %v853_v27  ;;  %v2383_v60 = vunpack.c.l.b16 %v2282_v29  ;;  %v1236_v6 = vld [vmem:[%s6129_s8 + $0x94] sm:$0xf]  ;;  %v712_v27 = vld [vmem:[%s6129_s8 + $0x98] sm:$0x1] }
 0x10e   : > { %2530 = vmatmul.bf16.gmra.mxu0 %v2402_v0  ;;  %v1381_v0 = vsel %vm6270_vm5, %v1379_v2, %v1380_v4  ;;  %3000 = vmatpush.bf16.msra.mxu1 %v5937_v36  ;;  %v5306_v4 = vld [vmem:[%s6129_s8 + $0xac] sm:$0xf]  ;;  %v5307_v36 = vld [vmem:[%s6129_s8 + $0xb0] sm:$0x1] }
 0x10f   : > { %v1590_v61 = vpop.f32.mrf.mxu2  ;;  %v1482_v46 = vunpack.c.l.b16 %v1381_v0  ;;  %v2285_v29 = vrot.slane %v5306_v4, 5 }
 0x110   : > { %v1664_v51 = vadd.f32 %v1590_v61, %v1139_v40  ;;  %v1969_v26 = vpop.f32.mrf.mxu3  ;;  %v2279_v40 = vsel %vm6265_vm4, %v5328_v24, %v2278_v48  ;;  %v977_v24 = vpack.c.b16 %v957_v7, %v956_v47  ;;  %v861_v47 = vrot.slane %v859_v38, 4 }
 0x111   : > { %v1067_v28 = vpop.f32.mrf.mxu1  ;;  %v2382_v55 = vunpack.c.l.b16 %v2279_v40  ;;  %v1237_v40 = vld [vmem:[%s6129_s8 + $0x98] sm:$0x3] }
 0x112   : > { %v2043_v35 = vadd.f32 %v1969_v26, %v1664_v51  ;;  %v1140_v12 = vadd.f32 %v1067_v28, %v6520_v22  ;;  %v1481_v22 = vunpack.c.l.b16 %v1378_v34  ;;  %v5915_v51 = vld [vmem:[%s6129_s8 + $0x9c] sm:$0xff]  ;;  %v710_v26 = vld [vmem:[%s6129_s8 + $0x90] sm:$0xe]  ;;  %v1384_v28 = vrot.slane %v1236_v6, 6 }
 0x113   : > { %v2493_v37 = vpop.f32.mrf.mxu0  ;;  %v5009_v43 = vrot.slane %v710_v26, 9  ;;  %v2288_v6 = vrot.slane %v5307_v36, 5 }
 0x114   : > { %v6678_v48 = vadd.f32 %v2491_v3, %v2043_v35  ;;  %v1502_v14 = vpack.c.b16 %v1482_v46, %v1481_v22  ;;  %v2403_v3 = vpack.c.b16 %v2383_v60, %v2382_v55  ;;  %v1235_v35 = vld [vmem:[%s6129_s8 + $0x90] sm:$0xc]  ;;  %v862_v22 = vrot.slane %v712_v27, 5 }
 0x115   : > { %v5073_v46 = vrot.slane %v1235_v35, 10  ;;  %v1386_v55 = vrot.slane %v1384_v28, 4  ;;  %v1387_v60 = vrot.slane %v1237_v40, 6 }
 0x117   : > { %v1592_v2 = vpop.f32.mrf.mxu2 }
 0x118   : > { %v1665_v53 = vadd.f32 %v1592_v2, %v1140_v12  ;;  %v1971_v8 = vpop.f32.mrf.mxu3  ;;  %v5305_v12 = vld [vmem:[%s6129_s8 + $0xa8] sm:$0xe] }
 0x119   : > { %v1070_v61 = vpop.f32.mrf.mxu1  ;;  %v5329_v1 = vrot.slane %v5305_v12, 9 }
 0x11a   : > { %v2044_v62 = vadd.f32 %v1971_v8, %v1665_v53  ;;  %v1141_v34 = vadd.f32 %v1070_v61, %v6544_v59  ;;  %v2287_v59 = vrot.slane %v2285_v29, 4  ;;  %v860_v8 = vsel %vm6265_vm4, %v5009_v43, %v859_v38  ;;  %v714_v43 = vld [vmem:[%s6129_s8 + $0xa0] sm:$0xf] }
 0x11b   : > { %v2496_v0 = vpop.f32.mrf.mxu0  ;;  %v1388_v61 = vsel %vm6270_vm5, %v1386_v55, %v1387_v60  ;;  %v2286_v38 = vsel %vm6265_vm4, %v5329_v1, %v2285_v29  ;;  %v5309_v29 = vld [vmem:[%s6129_s8 + $0xb8] sm:$0xf]  ;;  %v866_v1 = vrot.slane %v714_v43, 5  ;;  %v5968_v43 = vld [vmem:[%s7297_s1 + $0x1c0] sm:$0xff] }
 0x11c   : > { %1109 = vmatmul.bf16.gmra.mxu1 %v977_v24  ;;  %1634 = vmatmul.bf16.gmra.mxu2 %v1502_v14  ;;  %v6691_v7 = vadd.f32 %v2493_v37, %v2044_v62  ;;  %v863_v37 = vsel %vm6265_vm4, %v861_v47, %v862_v22  ;;  %v1385_v14 = vsel %vm6270_vm5, %v5073_v46, %v1384_v28  ;;  %v958_v62 = vunpack.c.l.b16 %v860_v8 }
 0x11d   : > { %2013 = vmatmul.bf16.gmra.mxu3 %v5915_v51  ;;  %v2289_v27 = vsel %vm6265_vm4, %v2287_v59, %v2288_v6  ;;  %v1483_v35 = vunpack.c.l.b16 %v1385_v14  ;;  %v1484_v40 = vunpack.c.l.b16 %v1388_v61  ;;  %v2384_v12 = vunpack.c.l.b16 %v2286_v38  ;;  %v5916_v6 = vld [vmem:[%s6129_s8 + $0xa8] sm:$0xff]  ;;  %v1240_v14 = vld [vmem:[%s6129_s8 + $0xa4] sm:$0x3]  ;;  %v5310_v38 = vld [vmem:[%s6129_s8 + $0xbc] sm:$0x1] }
 0x11e   : > { %2535 = vmatmul.bf16.gmra.mxu0 %v2403_v3  ;;  %v2385_v36 = vunpack.c.l.b16 %v2289_v27  ;;  %v2292_v61 = vrot.slane %v5309_v29, 5  ;;  %v868_v27 = vrot.slane %v866_v1, 4  ;;  %3902 = vmatpush.bf16.msra.mxu3 %v5968_v43  ;;  %v5312_v43 = vld [vmem:[%s6129_s8 + $0xc4] sm:$0xf] }
 0x11f   : > { %v1595_v2 = vpop.f32.mrf.mxu2  ;;  %v1503_v60 = vpack.c.b16 %v1484_v40, %v1483_v35 }
 0x120   : > { %v1666_v53 = vadd.f32 %v1595_v2, %v1141_v34  ;;  %v1974_v4 = vpop.f32.mrf.mxu3  ;;  %v959_v34 = vunpack.c.l.b16 %v863_v37  ;;  %v713_v2 = vld [vmem:[%s6129_s8 + $0x9c] sm:$0xe]  ;;  %v2294_v29 = vrot.slane %v2292_v61, 4 }
 0x121   : > { %v1072_v24 = vpop.f32.mrf.mxu1  ;;  %v1238_v37 = vld [vmem:[%s6129_s8 + $0x9c] sm:$0xc] }
 0x122   : > { %v2045_v51 = vadd.f32 %v1974_v4, %v1666_v53  ;;  %v1142_v3 = vadd.f32 %v1072_v24, %v6564_v32  ;;  %v1239_v32 = vld [vmem:[%s6129_s8 + $0xa0] sm:$0xf]  ;;  %v978_v55 = vpack.c.b16 %v959_v34, %v958_v62  ;;  %v715_v53 = vld [vmem:[%s6129_s8 + $0xa4] sm:$0x1]  ;;  %v5074_v35 = vrot.slane %v1238_v37, 10 }
 0x123   : > { %v2498_v26 = vpop.f32.mrf.mxu0  ;;  %v1391_v4 = vrot.slane %v1239_v32, 6  ;;  %v869_v34 = vrot.slane %v715_v53, 5  ;;  %v5936_v37 = vld [vmem:[%s7297_s1 + $0x140] sm:$0xff] }
 0x124   : > { %v6706_v28 = vadd.f32 %v2496_v0, %v2045_v51  ;;  %v2404_v0 = vpack.c.b16 %v2385_v36, %v2384_v12  ;;  %v5308_v51 = vld [vmem:[%s6129_s8 + $0xb4] sm:$0xe]  ;;  %v1394_v12 = vrot.slane %v1240_v14, 6  ;;  %v5960_v36 = vld [vmem:[%s7297_s1 + $0x180] sm:$0xff]  ;;  %3001 = vmatpush.bf16.msra.mxu1 %v5936_v37  ;;  %v5313_v37 = vld [vmem:[%s6129_s8 + $0xc8] sm:$0x1] }
 0x125   : > { %v1393_v40 = vrot.slane %v1391_v4, 4  ;;  %3380 = vmatpush.bf16.msra.mxu2 %v5960_v36 }
 0x127   : > { %v1597_v47 = vpop.f32.mrf.mxu2 }
 0x128   : > { %v1667_v22 = vadd.f32 %v1597_v47, %v1142_v3  ;;  %v1976_v46 = vpop.f32.mrf.mxu3  ;;  %v5010_v3 = vrot.slane %v713_v2, 9  ;;  %v5330_v47 = vrot.slane %v5308_v51, 9  ;;  %v1392_v2 = vsel %vm6270_vm5, %v5074_v35, %v1391_v4  ;;  %v5976_v4 = vld [vmem:[%s7297_s1 + $0x200] sm:$0xff]  ;;  %v717_v35 = vld [vmem:[%s6129_s8 + $0xac] sm:$0xf] }
 0x129   : > { %v1075_v59 = vpop.f32.mrf.mxu1  ;;  %4424 = vmatpush.bf16.msra.mxu0 %v5976_v4 }
 0x12a   : > { %v2046_v8 = vadd.f32 %v1976_v46, %v1667_v22  ;;  %v1143_v32 = vadd.f32 %v1075_v59, %v6401_v5  ;;  %v1395_v5 = vsel %vm6270_vm5, %v1393_v40, %v1394_v12  ;;  %v1242_v12 = vld [vmem:[%s6129_s8 + $0xac] sm:$0xf] }
 0x12b   : > { %v2501_v24 = vpop.f32.mrf.mxu0 }
 0x12c   : > { %1114 = vmatmul.bf16.gmra.mxu1 %v978_v55  ;;  %1639 = vmatmul.bf16.gmra.mxu2 %v1503_v60  ;;  %v6718_v62 = vadd.f32 %v2498_v26, %v2046_v8  ;;  %v2295_v26 = vrot.slane %v5310_v38, 5  ;;  %v867_v60 = vsel %vm6265_vm4, %v5010_v3, %v866_v1  ;;  %v2293_v8 = vsel %vm6265_vm4, %v5330_v47, %v2292_v61 }
 0x12d   : > { %2018 = vmatmul.bf16.gmra.mxu3 %v5916_v6  ;;  %v960_v14 = vunpack.c.l.b16 %v867_v60  ;;  %v1485_v38 = vunpack.c.l.b16 %v1392_v2  ;;  %v1486_v3 = vunpack.c.l.b16 %v1395_v5  ;;  %v716_v60 = vld [vmem:[%s6129_s8 + $0xa8] sm:$0xe]  ;;  %v1398_v2 = vrot.slane %v1242_v12, 6 }
 0x12e   : > { %2540 = vmatmul.bf16.gmra.mxu0 %v2404_v0  ;;  %v870_v0 = vsel %vm6265_vm4, %v868_v27, %v869_v34  ;;  %v2296_v1 = vsel %vm6265_vm4, %v2294_v29, %v2295_v26  ;;  %v2386_v27 = vunpack.c.l.b16 %v2293_v8  ;;  %v2299_v8 = vrot.slane %v5312_v43, 5 }
 0x12f   : > { %v1600_v22 = vpop.f32.mrf.mxu2  ;;  %v961_v51 = vunpack.c.l.b16 %v870_v0  ;;  %v2387_v34 = vunpack.c.l.b16 %v2296_v1  ;;  %v1504_v26 = vpack.c.b16 %v1486_v3, %v1485_v38  ;;  %v718_v0 = vld [vmem:[%s6129_s8 + $0xb0] sm:$0x1]  ;;  %v5311_v1 = vld [vmem:[%s6129_s8 + $0xc0] sm:$0xe]  ;;  %v5011_v4 = vrot.slane %v716_v60, 9 }
 0x130   : > { %v1668_v46 = vadd.f32 %v1600_v22, %v1143_v32  ;;  %v1979_v55 = vpop.f32.mrf.mxu3  ;;  %v1400_v3 = vrot.slane %v1398_v2, 4  ;;  %v2301_v12 = vrot.slane %v2299_v8, 4 }
 0x131   : > { %v1077_v6 = vpop.f32.mrf.mxu1  ;;  %v979_v29 = vpack.c.b16 %v961_v51, %v960_v14  ;;  %v876_v51 = vrot.slane %v718_v0, 5 }
 0x132   : > { %v2047_v59 = vadd.f32 %v1979_v55, %v1668_v46  ;;  %v1144_v40 = vadd.f32 %v1077_v6, %v6425_v33  ;;  %v5917_v46 = vld [vmem:[%s6129_s8 + $0xb4] sm:$0xff]  ;;  %v2405_v55 = vpack.c.b16 %v2387_v34, %v2386_v27  ;;  %v1241_v6 = vld [vmem:[%s6129_s8 + $0xa8] sm:$0xc] }
 0x133   : > { %v2503_v53 = vpop.f32.mrf.mxu0  ;;  %v5075_v38 = vrot.slane %v1241_v6, 10 }
 0x134   : > { %v6745_v61 = vadd.f32 %v2501_v24, %v2047_v59  ;;  %v873_v24 = vrot.slane %v717_v35, 5  ;;  %v1243_v59 = vld [vmem:[%s6129_s8 + $0xb0] sm:$0x3]  ;;  %v5331_v35 = vrot.slane %v5311_v1, 9 }
 0x135   : > { %v1401_v27 = vrot.slane %v1243_v59, 6 }
 0x136   : > { %v2300_v60 = vsel %vm6265_vm4, %v5331_v35, %v2299_v8 }
 0x137   : > { %v1602_v36 = vpop.f32.mrf.mxu2 }
 0x138   : > { %v1669_v32 = vadd.f32 %v1602_v36, %v1144_v40  ;;  %v1981_v47 = vpop.f32.mrf.mxu3  ;;  %v875_v40 = vrot.slane %v873_v24, 4  ;;  %v2302_v36 = vrot.slane %v5313_v37, 5 }
 0x139   : > { %v1080_v22 = vpop.f32.mrf.mxu1 }
 0x13a   : > { %v2048_v5 = vadd.f32 %v1981_v47, %v1669_v32  ;;  %v1145_v34 = vadd.f32 %v1080_v22, %v6451_v56  ;;  %v1402_v56 = vsel %vm6270_vm5, %v1400_v3, %v1401_v27 }
 0x13b   : > { %v2506_v33 = vpop.f32.mrf.mxu0  ;;  %v1488_v59 = vunpack.c.l.b16 %v1402_v56 }
 0x13c   : > { %1119 = vmatmul.bf16.gmra.mxu1 %v979_v29  ;;  %1644 = vmatmul.bf16.gmra.mxu2 %v1504_v26  ;;  %v6758_v14 = vadd.f32 %v2503_v53, %v2048_v5  ;;  %v874_v29 = vsel %vm6265_vm4, %v5011_v4, %v873_v24  ;;  %v877_v26 = vsel %vm6265_vm4, %v875_v40, %v876_v51  ;;  %v720_v4 = vld [vmem:[%s6129_s8 + $0xb8] sm:$0xf] }
 0x13d   : > { %2023 = vmatmul.bf16.gmra.mxu3 %v5917_v46  ;;  %v1399_v46 = vsel %vm6270_vm5, %v5075_v38, %v1398_v2  ;;  %v2303_v24 = vsel %vm6265_vm4, %v2301_v12, %v2302_v36  ;;  %v962_v0 = vunpack.c.l.b16 %v874_v29  ;;  %v963_v5 = vunpack.c.l.b16 %v877_v26  ;;  %v1245_v51 = vld [vmem:[%s6129_s8 + $0xb8] sm:$0xf]  ;;  %v5315_v38 = vld [vmem:[%s6129_s8 + $0xd0] sm:$0xf]  ;;  %v5918_v36 = vld [vmem:[%s6129_s8 + $0xc0] sm:$0xff] }
 0x13e   : > { %2545 = vmatmul.bf16.gmra.mxu0 %v2405_v55  ;;  %v1487_v6 = vunpack.c.l.b16 %v1399_v46  ;;  %v2388_v2 = vunpack.c.l.b16 %v2300_v60  ;;  %v2389_v37 = vunpack.c.l.b16 %v2303_v24  ;;  %v1405_v29 = vrot.slane %v1245_v51, 6  ;;  %v1246_v46 = vld [vmem:[%s6129_s8 + $0xbc] sm:$0x3]  ;;  %v5316_v60 = vld [vmem:[%s6129_s8 + $0xd4] sm:$0x1] }
 0x13f   : > { %v1605_v43 = vpop.f32.mrf.mxu2  ;;  %v2306_v56 = vrot.slane %v5315_v38, 5 }
 0x140   : > { %v1670_v32 = vadd.f32 %v1605_v43, %v1145_v34  ;;  %v1984_v47 = vpop.f32.mrf.mxu3  ;;  %v980_v34 = vpack.c.b16 %v963_v5, %v962_v0  ;;  %v1505_v35 = vpack.c.b16 %v1488_v59, %v1487_v6  ;;  %v2406_v43 = vpack.c.b16 %v2389_v37, %v2388_v2 }
 0x141   : > { %v1082_v53 = vpop.f32.mrf.mxu1  ;;  %v1407_v59 = vrot.slane %v1405_v29, 4  ;;  %v1408_v2 = vrot.slane %v1246_v46, 6  ;;  %v2308_v51 = vrot.slane %v2306_v56, 4 }
 0x142   : > { %v2049_v22 = vadd.f32 %v1984_v47, %v1670_v32  ;;  %v1146_v40 = vadd.f32 %v1082_v53, %v6466_v19  ;;  %v719_v32 = vld [vmem:[%s6129_s8 + $0xb4] sm:$0xe]  ;;  %v721_v47 = vld [vmem:[%s6129_s8 + $0xbc] sm:$0x1] }
 0x143   : > { %v2508_v55 = vpop.f32.mrf.mxu0  ;;  %v1244_v53 = vld [vmem:[%s6129_s8 + $0xb4] sm:$0xc]  ;;  %v5012_v24 = vrot.slane %v719_v32, 9  ;;  %v883_v5 = vrot.slane %v721_v47, 5 }
 0x144   : > { %v6773_v1 = vadd.f32 %v2506_v33, %v2049_v22  ;;  %v880_v33 = vrot.slane %v720_v4, 5  ;;  %v5314_v22 = vld [vmem:[%s6129_s8 + $0xcc] sm:$0xe]  ;;  %v5076_v6 = vrot.slane %v1244_v53, 10 }
 0x145   : > { %v5332_v4 = vrot.slane %v5314_v22, 9 }
 0x147   : > { %v1607_v8 = vpop.f32.mrf.mxu2  ;;  %v2307_v32 = vsel %vm6265_vm4, %v5332_v4, %v2306_v56 }
 0x148   : > { %v1671_v3 = vadd.f32 %v1607_v8, %v1146_v40  ;;  %v1986_v27 = vpop.f32.mrf.mxu3  ;;  %v882_v40 = vrot.slane %v880_v33, 4  ;;  %v2309_v8 = vrot.slane %v5316_v60, 5 }
 0x149   : > { %v1085_v12 = vpop.f32.mrf.mxu1 }
 0x14a   : > { %v2050_v26 = vadd.f32 %v1986_v27, %v1671_v3  ;;  %v1147_v37 = vadd.f32 %v1085_v12, %v6489_v45  ;;  %v1409_v45 = vsel %vm6270_vm5, %v1407_v59, %v1408_v2 }
 0x14b   : > { %v2511_v19 = vpop.f32.mrf.mxu0  ;;  %v1490_v46 = vunpack.c.l.b16 %v1409_v45 }
 0x14c   : > { %1124 = vmatmul.bf16.gmra.mxu1 %v980_v34  ;;  %1649 = vmatmul.bf16.gmra.mxu2 %v1505_v35  ;;  %v6786_v0 = vadd.f32 %v2508_v55, %v2050_v26  ;;  %v881_v34 = vsel %vm6265_vm4, %v5012_v24, %v880_v33  ;;  %v884_v35 = vsel %vm6265_vm4, %v882_v40, %v883_v5  ;;  %v5382_v24 = vld [vmem:[%s6129_s8 + $0x1c] sm:$0xf]  ;;  %v5638_v5 = vld [vmem:[%s6129_s8 + $0x34] sm:$0xf] }
 0x14d   : > { %2028 = vmatmul.bf16.gmra.mxu3 %v5918_v36  ;;  %v1406_v36 = vsel %vm6270_vm5, %v5076_v6, %v1405_v29  ;;  %v2310_v33 = vsel %vm6265_vm4, %v2308_v51, %v2309_v8  ;;  %v964_v47 = vunpack.c.l.b16 %v881_v34  ;;  %v965_v26 = vunpack.c.l.b16 %v884_v35  ;;  %v5750_v6 = vld [vmem:[%s6129_s8 + $0x34] sm:$0xf]  ;;  %v5919_v8 = vld [vmem:[%s6129_s8 + $0xcc] sm:$0xff] }
 0x14e   : > { %2550 = vmatmul.bf16.gmra.mxu0 %v2406_v43  ;;  %v1489_v53 = vunpack.c.l.b16 %v1406_v36  ;;  %v2390_v29 = vunpack.c.l.b16 %v2307_v32  ;;  %v2391_v60 = vunpack.c.l.b16 %v2310_v33  ;;  %v3624_v34 = vrot.slane %v5638_v5, 5  ;;  %v5639_v36 = vld [vmem:[%s6129_s8 + $0x38] sm:$0x1] }
 0x14f   : > { %v1610_v38 = vpop.f32.mrf.mxu2  ;;  %v4146_v45 = vrot.slane %v5750_v6, 6  ;;  %v5751_v32 = vld [vmem:[%s6129_s8 + $0x38] sm:$0x3] }
 0x150   : > { %v1672_v3 = vadd.f32 %v1610_v38, %v1147_v37  ;;  %v1989_v27 = vpop.f32.mrf.mxu3  ;;  %v981_v37 = vpack.c.b16 %v965_v26, %v964_v47  ;;  %v1506_v4 = vpack.c.b16 %v1490_v46, %v1489_v53  ;;  %v2407_v38 = vpack.c.b16 %v2391_v60, %v2390_v29 }
 0x151   : > { %v1087_v55 = vpop.f32.mrf.mxu1  ;;  %v3626_v46 = vrot.slane %v3624_v34, 4  ;;  %v3627_v29 = vrot.slane %v5639_v36, 5  ;;  %v4148_v5 = vrot.slane %v4146_v45, 4 }
 0x152   : > { %v2051_v12 = vadd.f32 %v1989_v27, %v1672_v3  ;;  %v1148_v40 = vadd.f32 %v1087_v55, %v6510_v13  ;;  %v5381_v3 = vld [vmem:[%s6129_s8 + $0x18] sm:$0xc]  ;;  %v5383_v27 = vld [vmem:[%s6129_s8 + $0x20] sm:$0x3]  ;;  %v5637_v55 = vld [vmem:[%s6129_s8 + $0x30] sm:$0xe] }
 0x153   : > { %v2513_v43 = vpop.f32.mrf.mxu0  ;;  %v5429_v33 = vrot.slane %v5381_v3, 10  ;;  %v2726_v26 = vrot.slane %v5383_v27, 6  ;;  %v5685_v53 = vrot.slane %v5637_v55, 9 }
 0x154   : > { %v6801_v22 = vadd.f32 %v2511_v19, %v2051_v12  ;;  %v2723_v19 = vrot.slane %v5382_v24, 6  ;;  %v5749_v12 = vld [vmem:[%s6129_s8 + $0x30] sm:$0xc] }
 0x155   : > { %v5797_v24 = vrot.slane %v5749_v12, 10 }
 0x157   : > { %v1612_v56 = vpop.f32.mrf.mxu2  ;;  %v4147_v3 = vsel %vm6270_vm5, %v5797_v24, %v4146_v45 }
 0x158   : > { %v1673_v59 = vadd.f32 %v1612_v56, %v1148_v40  ;;  %v1991_v2 = vpop.f32.mrf.mxu3  ;;  %v2725_v40 = vrot.slane %v2723_v19, 4  ;;  %v4149_v56 = vrot.slane %v5751_v32, 6 }
 0x159   : > { %v1090_v51 = vpop.f32.mrf.mxu1 }
 0x15a   : > { %v2052_v35 = vadd.f32 %v1991_v2, %v1673_v59  ;;  %v1149_v60 = vadd.f32 %v1090_v51, %v6539_v49  ;;  %v3628_v51 = vsel %vm6265_vm4, %v3626_v46, %v3627_v29  ;;  %v4150_v27 = vsel %vm6270_vm5, %v4148_v5, %v4149_v56 }
 0x15b   : > { %v2516_v13 = vpop.f32.mrf.mxu0  ;;  %v3784_v12 = vunpack.c.l.b16 %v3628_v51  ;;  %v4306_v32 = vunpack.c.l.b16 %v4150_v27  ;;  %v5752_v51 = vld [vmem:[%s6129_s8 + $0x3c] sm:$0xc] }
 0x15c   : > { %1129 = vmatmul.bf16.gmra.mxu1 %v981_v37  ;;  %1654 = vmatmul.bf16.gmra.mxu2 %v1506_v4  ;;  %v6814_v47 = vadd.f32 %v2513_v43, %v2052_v35  ;;  %v2724_v43 = vsel %vm6270_vm5, %v5429_v33, %v2723_v19  ;;  %v2727_v4 = vsel %vm6270_vm5, %v2725_v40, %v2726_v26  ;;  %v5385_v33 = vld [vmem:[%s6129_s8 + $0x28] sm:$0xf]  ;;  %v5641_v26 = vld [vmem:[%s6129_s8 + $0x40] sm:$0xf] }
 0x15d   : > { %2033 = vmatmul.bf16.gmra.mxu3 %v5919_v8  ;;  %v3625_v8 = vsel %vm6265_vm4, %v5685_v53, %v3624_v34  ;;  %v2882_v19 = vunpack.c.l.b16 %v2724_v43  ;;  %v2883_v35 = vunpack.c.l.b16 %v2727_v4  ;;  %v4305_v34 = vunpack.c.l.b16 %v4147_v3  ;;  %v5753_v53 = vld [vmem:[%s6129_s8 + $0x40] sm:$0xf]  ;;  %v5754_v3 = vld [vmem:[%s6129_s8 + $0x44] sm:$0x3] }
 0x15e   : > { %2555 = vmatmul.bf16.gmra.mxu0 %v2407_v38  ;;  %v3783_v36 = vunpack.c.l.b16 %v3625_v8  ;;  %v2730_v24 = vrot.slane %v5385_v33, 6  ;;  %v3631_v43 = vrot.slane %v5641_v26, 5  ;;  %v5642_v8 = vld [vmem:[%s6129_s8 + $0x44] sm:$0x1]  ;;  %v5798_v33 = vrot.slane %v5752_v51, 10 }
 0x15f   : > { %v1615_v6 = vpop.f32.mrf.mxu2 }
 0x160   : > { %v1674_v59 = vadd.f32 %v1615_v6, %v1149_v60  ;;  %v1994_v2 = vpop.f32.mrf.mxu3  ;;  %v5944_v60 = vld [vmem:[%s6129_s8 + $0x30] sm:$0xff]  ;;  %v3815_v56 = vpack.c.b16 %v3784_v12, %v3783_v36  ;;  %v4337_v6 = vpack.c.b16 %v4306_v32, %v4305_v34  ;;  %v3633_v12 = vrot.slane %v3631_v43, 4 }
 0x161   : > { %v1092_v37 = vpop.f32.mrf.mxu1  ;;  %v3634_v34 = vrot.slane %v5642_v8, 5 }
 0x162   : > { %v2053_v38 = vadd.f32 %v1994_v2, %v1674_v59  ;;  %v1150_v40 = vadd.f32 %v1092_v37, %v6554_v25  ;;  %v5384_v59 = vld [vmem:[%s6129_s8 + $0x24] sm:$0xc]  ;;  %v5386_v2 = vld [vmem:[%s6129_s8 + $0x2c] sm:$0x3]  ;;  %v5640_v37 = vld [vmem:[%s6129_s8 + $0x3c] sm:$0xe] }
 0x163   : > { %v2518_v49 = vpop.f32.mrf.mxu0  ;;  %v5430_v27 = vrot.slane %v5384_v59, 10  ;;  %v5686_v36 = vrot.slane %v5640_v37, 9 }
 0x164   : > { %v6829_v55 = vadd.f32 %v2516_v13, %v2053_v38  ;;  %v2914_v13 = vpack.c.b16 %v2883_v35, %v2882_v19  ;;  %v4153_v38 = vrot.slane %v5753_v53, 6  ;;  %v2733_v35 = vrot.slane %v5386_v2, 6 }
 0x166   : > { %v4155_v26 = vrot.slane %v4153_v38, 4  ;;  %v4154_v59 = vsel %vm6270_vm5, %v5798_v33, %v4153_v38 }
 0x167   : > { %v1617_v45 = vpop.f32.mrf.mxu2 }
 0x168   : > { %v1675_v46 = vadd.f32 %v1617_v45, %v1150_v40  ;;  %v1996_v29 = vpop.f32.mrf.mxu3  ;;  %v2732_v40 = vrot.slane %v2730_v24, 4  ;;  %v4156_v45 = vrot.slane %v5754_v3, 6 }
 0x169   : > { %v1095_v5 = vpop.f32.mrf.mxu1 }
 0x16a   : > { %v2054_v4 = vadd.f32 %v1996_v29, %v1675_v46  ;;  %v1151_v32 = vadd.f32 %v1095_v5, %v6418_v30  ;;  %v3635_v5 = vsel %vm6265_vm4, %v3633_v12, %v3634_v34  ;;  %v4157_v2 = vsel %vm6270_vm5, %v4155_v26, %v4156_v45 }
 0x16b   : > { %v2521_v25 = vpop.f32.mrf.mxu0  ;;  %v3786_v51 = vunpack.c.l.b16 %v3635_v5  ;;  %v4308_v3 = vunpack.c.l.b16 %v4157_v2  ;;  %v5755_v5 = vld [vmem:[%s6129_s8 + $0x48] sm:$0xc] }
 0x16c   : > { %3002 = vmatmul.bf16.vlgmr.msra.gmra.mxu1 %v2914_v13  ;;  %3381 = vmatmul.bf16.vlgmr.msra.gmra.mxu2 %v5944_v60  ;;  %v6842_v19 = vadd.f32 %v2518_v49, %v2054_v4  ;;  %v2731_v49 = vsel %vm6270_vm5, %v5430_v27, %v2730_v24  ;;  %v2734_v60 = vsel %vm6270_vm5, %v2732_v40, %v2733_v35  ;;  %v5388_v27 = vld [vmem:[%s6129_s8 + $0x34] sm:$0xf]  ;;  %v5644_v35 = vld [vmem:[%s6129_s8 + $0x4c] sm:$0xf] }
 0x16d   : > { %3903 = vmatmul.bf16.vlgmr.msra.gmra.mxu3 %v3815_v56  ;;  %v3632_v56 = vsel %vm6265_vm4, %v5686_v36, %v3631_v43  ;;  %v2884_v24 = vunpack.c.l.b16 %v2731_v49  ;;  %v2885_v4 = vunpack.c.l.b16 %v2734_v60  ;;  %v4307_v43 = vunpack.c.l.b16 %v4154_v59  ;;  %v5756_v36 = vld [vmem:[%s6129_s8 + $0x4c] sm:$0xf]  ;;  %v5757_v59 = vld [vmem:[%s6129_s8 + $0x50] sm:$0x3] }
 0x16e   : > { %4425 = vmatmul.bf16.vlgmr.msra.gmra.mxu0 %v4337_v6  ;;  %v3785_v8 = vunpack.c.l.b16 %v3632_v56  ;;  %v2737_v33 = vrot.slane %v5388_v27, 6  ;;  %v3638_v49 = vrot.slane %v5644_v35, 5  ;;  %v5645_v56 = vld [vmem:[%s6129_s8 + $0x50] sm:$0x1]  ;;  %v5799_v27 = vrot.slane %v5755_v5, 10 }
 0x16f   : > { %v1620_v53 = vpop.f32.mrf.mxu2 }
 0x170   : > { %v1676_v46 = vadd.f32 %v1620_v53, %v1151_v32  ;;  %v1999_v29 = vpop.f32.mrf.mxu3  ;;  %v5945_v32 = vld [vmem:[%s6129_s8 + $0x3c] sm:$0xff]  ;;  %v3816_v45 = vpack.c.b16 %v3786_v51, %v3785_v8  ;;  %v4338_v53 = vpack.c.b16 %v4308_v3, %v4307_v43  ;;  %v3640_v51 = vrot.slane %v3638_v49, 4 }
 0x171   : > { %v1097_v13 = vpop.f32.mrf.mxu1  ;;  %v3641_v43 = vrot.slane %v5645_v56, 5 }
 0x172   : > { %v2055_v6 = vadd.f32 %v1999_v29, %v1676_v46  ;;  %v1152_v40 = vadd.f32 %v1097_v13, %v6446_v50  ;;  %v5387_v46 = vld [vmem:[%s6129_s8 + $0x30] sm:$0xc]  ;;  %v5389_v29 = vld [vmem:[%s6129_s8 + $0x38] sm:$0x3]  ;;  %v5643_v13 = vld [vmem:[%s6129_s8 + $0x48] sm:$0xe] }
 0x173   : > { %v2523_v30 = vpop.f32.mrf.mxu0  ;;  %v5431_v2 = vrot.slane %v5387_v46, 10  ;;  %v5687_v8 = vrot.slane %v5643_v13, 9 }
 0x174   : > { %v6857_v37 = vadd.f32 %v2521_v25, %v2055_v6  ;;  %v2915_v25 = vpack.c.b16 %v2885_v4, %v2884_v24  ;;  %v4160_v6 = vrot.slane %v5756_v36, 6  ;;  %v2740_v4 = vrot.slane %v5389_v29, 6 }
 0x176   : > { %v4162_v35 = vrot.slane %v4160_v6, 4  ;;  %v4161_v46 = vsel %vm6270_vm5, %v5799_v27, %v4160_v6 }
 0x177   : > { %v1622_v38 = vpop.f32.mrf.mxu2 }
 0x178   : > { %v1677_v12 = vadd.f32 %v1622_v38, %v1152_v40  ;;  %v2001_v34 = vpop.f32.mrf.mxu3  ;;  %v2739_v40 = vrot.slane %v2737_v33, 4  ;;  %v4163_v38 = vrot.slane %v5757_v59, 6 }
 0x179   : > { %v1100_v26 = vpop.f32.mrf.mxu1 }
 0x17a   : > { %v2056_v60 = vadd.f32 %v2001_v34, %v1677_v12  ;;  %v1153_v3 = vadd.f32 %v1100_v26, %v6462_v17  ;;  %v3642_v26 = vsel %vm6265_vm4, %v3640_v51, %v3641_v43  ;;  %v4164_v29 = vsel %vm6270_vm5, %v4162_v35, %v4163_v38 }
 0x17b   : > { %v2526_v50 = vpop.f32.mrf.mxu0  ;;  %v3788_v5 = vunpack.c.l.b16 %v3642_v26  ;;  %v4310_v59 = vunpack.c.l.b16 %v4164_v29  ;;  %v5758_v26 = vld [vmem:[%s6129_s8 + $0x54] sm:$0xc] }
 0x17c   : > { %3007 = vmatmul.bf16.gmra.mxu1 %v2915_v25  ;;  %3386 = vmatmul.bf16.gmra.mxu2 %v5945_v32  ;;  %v6870_v24 = vadd.f32 %v2523_v30, %v2056_v60  ;;  %v2738_v30 = vsel %vm6270_vm5, %v5431_v2, %v2737_v33  ;;  %v2741_v32 = vsel %vm6270_vm5, %v2739_v40, %v2740_v4  ;;  %v5391_v2 = vld [vmem:[%s6129_s8 + $0x40] sm:$0xf]  ;;  %v5647_v4 = vld [vmem:[%s6129_s8 + $0x58] sm:$0xf] }
 0x17d   : > { %3908 = vmatmul.bf16.gmra.mxu3 %v3816_v45  ;;  %v3639_v45 = vsel %vm6265_vm4, %v5687_v8, %v3638_v49  ;;  %v2886_v33 = vunpack.c.l.b16 %v2738_v30  ;;  %v2887_v60 = vunpack.c.l.b16 %v2741_v32  ;;  %v4309_v49 = vunpack.c.l.b16 %v4161_v46  ;;  %v5759_v8 = vld [vmem:[%s6129_s8 + $0x58] sm:$0xf]  ;;  %v5760_v46 = vld [vmem:[%s6129_s8 + $0x5c] sm:$0x3] }
 0x17e   : > { %4430 = vmatmul.bf16.gmra.mxu0 %v4338_v53  ;;  %v3787_v56 = vunpack.c.l.b16 %v3639_v45  ;;  %v2744_v27 = vrot.slane %v5391_v2, 6  ;;  %v3645_v30 = vrot.slane %v5647_v4, 5  ;;  %v5648_v45 = vld [vmem:[%s6129_s8 + $0x5c] sm:$0x1]  ;;  %v5800_v2 = vrot.slane %v5758_v26, 10 }
 0x17f   : > { %v1625_v36 = vpop.f32.mrf.mxu2 }
 0x180   : > { %v1678_v12 = vadd.f32 %v1625_v36, %v1153_v3  ;;  %v2004_v34 = vpop.f32.mrf.mxu3  ;;  %v5946_v3 = vld [vmem:[%s6129_s8 + $0x48] sm:$0xff]  ;;  %v3817_v38 = vpack.c.b16 %v3788_v5, %v3787_v56  ;;  %v4339_v36 = vpack.c.b16 %v4310_v59, %v4309_v49  ;;  %v3647_v5 = vrot.slane %v3645_v30, 4 }
 0x181   : > { %v1102_v25 = vpop.f32.mrf.mxu1  ;;  %v3648_v49 = vrot.slane %v5648_v45, 5 }
 0x182   : > { %v2057_v53 = vadd.f32 %v2004_v34, %v1678_v12  ;;  %v1154_v40 = vadd.f32 %v1102_v25, %v6484_v39  ;;  %v5390_v12 = vld [vmem:[%s6129_s8 + $0x3c] sm:$0xc]  ;;  %v5392_v34 = vld [vmem:[%s6129_s8 + $0x44] sm:$0x3]  ;;  %v5646_v25 = vld [vmem:[%s6129_s8 + $0x54] sm:$0xe] }
 0x183   : > { %v2528_v17 = vpop.f32.mrf.mxu0  ;;  %v5432_v29 = vrot.slane %v5390_v12, 10  ;;  %v5688_v56 = vrot.slane %v5646_v25, 9 }
 0x184   : > { %v6885_v13 = vadd.f32 %v2526_v50, %v2057_v53  ;;  %v2916_v50 = vpack.c.b16 %v2887_v60, %v2886_v33  ;;  %v4167_v53 = vrot.slane %v5759_v8, 6  ;;  %v2747_v60 = vrot.slane %v5392_v34, 6 }
 0x186   : > { %v4169_v4 = vrot.slane %v4167_v53, 4  ;;  %v4168_v12 = vsel %vm6270_vm5, %v5800_v2, %v4167_v53 }
 0x187   : > { %v1627_v6 = vpop.f32.mrf.mxu2 }
 0x188   : > { %v1679_v51 = vadd.f32 %v1627_v6, %v1154_v40  ;;  %v2006_v43 = vpop.f32.mrf.mxu3  ;;  %v2746_v40 = vrot.slane %v2744_v27, 4  ;;  %v4170_v6 = vrot.slane %v5760_v46, 6 }
 0x189   : > { %v1105_v35 = vpop.f32.mrf.mxu1 }
 0x18a   : > { %v2058_v32 = vadd.f32 %v2006_v43, %v1679_v51  ;;  %v1155_v59 = vadd.f32 %v1105_v35, %v6506_v9  ;;  %v3649_v35 = vsel %vm6265_vm4, %v3647_v5, %v3648_v49  ;;  %v4171_v34 = vsel %vm6270_vm5, %v4169_v4, %v4170_v6 }
 0x18b   : > { %v2531_v39 = vpop.f32.mrf.mxu0  ;;  %v3790_v26 = vunpack.c.l.b16 %v3649_v35  ;;  %v4312_v46 = vunpack.c.l.b16 %v4171_v34  ;;  %v5761_v35 = vld [vmem:[%s6129_s8 + $0x60] sm:$0xc] }
 0x18c   : > { %3012 = vmatmul.bf16.gmra.mxu1 %v2916_v50  ;;  %3391 = vmatmul.bf16.gmra.mxu2 %v5946_v3  ;;  %v6898_v33 = vadd.f32 %v2528_v17, %v2058_v32  ;;  %v2745_v17 = vsel %vm6270_vm5, %v5432_v29, %v2744_v27  ;;  %v2748_v3 = vsel %vm6270_vm5, %v2746_v40, %v2747_v60  ;;  %v5394_v29 = vld [vmem:[%s6129_s8 + $0x4c] sm:$0xf]  ;;  %v5650_v60 = vld [vmem:[%s6129_s8 + $0x64] sm:$0xf] }
 0x18d   : > { %3913 = vmatmul.bf16.gmra.mxu3 %v3817_v38  ;;  %v3646_v38 = vsel %vm6265_vm4, %v5688_v56, %v3645_v30  ;;  %v2888_v27 = vunpack.c.l.b16 %v2745_v17  ;;  %v2889_v32 = vunpack.c.l.b16 %v2748_v3  ;;  %v4311_v30 = vunpack.c.l.b16 %v4168_v12  ;;  %v5762_v56 = vld [vmem:[%s6129_s8 + $0x64] sm:$0xf]  ;;  %v5763_v12 = vld [vmem:[%s6129_s8 + $0x68] sm:$0x3] }
 0x18e   : > { %4435 = vmatmul.bf16.gmra.mxu0 %v4339_v36  ;;  %v3789_v45 = vunpack.c.l.b16 %v3646_v38  ;;  %v2751_v2 = vrot.slane %v5394_v29, 6  ;;  %v3652_v17 = vrot.slane %v5650_v60, 5  ;;  %v5651_v38 = vld [vmem:[%s6129_s8 + $0x68] sm:$0x1]  ;;  %v5801_v29 = vrot.slane %v5761_v35, 10 }
 0x18f   : > { %v1630_v8 = vpop.f32.mrf.mxu2 }
 0x190   : > { %v1680_v51 = vadd.f32 %v1630_v8, %v1155_v59  ;;  %v2009_v43 = vpop.f32.mrf.mxu3  ;;  %v5947_v59 = vld [vmem:[%s6129_s8 + $0x54] sm:$0xff]  ;;  %v3818_v6 = vpack.c.b16 %v3790_v26, %v3789_v45  ;;  %v4340_v8 = vpack.c.b16 %v4312_v46, %v4311_v30  ;;  %v3654_v26 = vrot.slane %v3652_v17, 4 }
 0x191   : > { %v1107_v50 = vpop.f32.mrf.mxu1  ;;  %v3655_v30 = vrot.slane %v5651_v38, 5 }
 0x192   : > { %v2059_v36 = vadd.f32 %v2009_v43, %v1680_v51  ;;  %v1156_v40 = vadd.f32 %v1107_v50, %v6534_v42  ;;  %v5393_v51 = vld [vmem:[%s6129_s8 + $0x48] sm:$0xc]  ;;  %v5395_v43 = vld [vmem:[%s6129_s8 + $0x50] sm:$0x3]  ;;  %v5649_v50 = vld [vmem:[%s6129_s8 + $0x60] sm:$0xe] }
 0x193   : > { %v2533_v9 = vpop.f32.mrf.mxu0  ;;  %v5433_v34 = vrot.slane %v5393_v51, 10  ;;  %v5689_v45 = vrot.slane %v5649_v50, 9 }
 0x194   : > { %v6913_v25 = vadd.f32 %v2531_v39, %v2059_v36  ;;  %v2917_v39 = vpack.c.b16 %v2889_v32, %v2888_v27  ;;  %v4174_v36 = vrot.slane %v5762_v56, 6  ;;  %v2754_v32 = vrot.slane %v5395_v43, 6 }
 0x196   : > { %v4176_v60 = vrot.slane %v4174_v36, 4  ;;  %v4175_v51 = vsel %vm6270_vm5, %v5801_v29, %v4174_v36 }
 0x197   : > { %v1632_v53 = vpop.f32.mrf.mxu2 }
 0x198   : > { %v1681_v5 = vadd.f32 %v1632_v53, %v1156_v40  ;;  %v2011_v49 = vpop.f32.mrf.mxu3  ;;  %v2753_v40 = vrot.slane %v2751_v2, 4  ;;  %v4177_v53 = vrot.slane %v5763_v12, 6 }
 0x199   : > { %v1110_v4 = vpop.f32.mrf.mxu1 }
 0x19a   : > { %v2060_v3 = vadd.f32 %v2011_v49, %v1681_v5  ;;  %v1157_v46 = vadd.f32 %v1110_v4, %v6550_v21  ;;  %v3656_v4 = vsel %vm6265_vm4, %v3654_v26, %v3655_v30  ;;  %v4178_v43 = vsel %vm6270_vm5, %v4176_v60, %v4177_v53 }
 0x19b   : > { %v2536_v42 = vpop.f32.mrf.mxu0  ;;  %v3792_v35 = vunpack.c.l.b16 %v3656_v4  ;;  %v4314_v12 = vunpack.c.l.b16 %v4178_v43  ;;  %v5764_v4 = vld [vmem:[%s6129_s8 + $0x6c] sm:$0xc] }
 0x19c   : > { %3017 = vmatmul.bf16.gmra.mxu1 %v2917_v39  ;;  %3396 = vmatmul.bf16.gmra.mxu2 %v5947_v59  ;;  %v6926_v27 = vadd.f32 %v2533_v9, %v2060_v3  ;;  %v2752_v9 = vsel %vm6270_vm5, %v5433_v34, %v2751_v2  ;;  %v2755_v59 = vsel %vm6270_vm5, %v2753_v40, %v2754_v32  ;;  %v5397_v34 = vld [vmem:[%s6129_s8 + $0x58] sm:$0xf]  ;;  %v5653_v32 = vld [vmem:[%s6129_s8 + $0x70] sm:$0xf] }
 0x19d   : > { %3918 = vmatmul.bf16.gmra.mxu3 %v3818_v6  ;;  %v3653_v6 = vsel %vm6265_vm4, %v5689_v45, %v3652_v17  ;;  %v2890_v2 = vunpack.c.l.b16 %v2752_v9  ;;  %v2891_v3 = vunpack.c.l.b16 %v2755_v59  ;;  %v4313_v17 = vunpack.c.l.b16 %v4175_v51  ;;  %v5765_v45 = vld [vmem:[%s6129_s8 + $0x70] sm:$0xf]  ;;  %v5766_v51 = vld [vmem:[%s6129_s8 + $0x74] sm:$0x3] }
 0x19e   : > { %4440 = vmatmul.bf16.gmra.mxu0 %v4340_v8  ;;  %v3791_v38 = vunpack.c.l.b16 %v3653_v6  ;;  %v2758_v29 = vrot.slane %v5397_v34, 6  ;;  %v3659_v9 = vrot.slane %v5653_v32, 5  ;;  %v5654_v6 = vld [vmem:[%s6129_s8 + $0x74] sm:$0x1]  ;;  %v5802_v34 = vrot.slane %v5764_v4, 10 }
 0x19f   : > { %v1635_v56 = vpop.f32.mrf.mxu2 }
 0x1a0   : > { %v1682_v5 = vadd.f32 %v1635_v56, %v1157_v46  ;;  %v2014_v49 = vpop.f32.mrf.mxu3  ;;  %v5948_v46 = vld [vmem:[%s6129_s8 + $0x60] sm:$0xff]  ;;  %v3819_v53 = vpack.c.b16 %v3792_v35, %v3791_v38  ;;  %v4341_v56 = vpack.c.b16 %v4314_v12, %v4313_v17  ;;  %v3661_v35 = vrot.slane %v3659_v9, 4 }
 0x1a1   : > { %v1112_v39 = vpop.f32.mrf.mxu1  ;;  %v3662_v17 = vrot.slane %v5654_v6, 5 }
 0x1a2   : > { %v2061_v8 = vadd.f32 %v2014_v49, %v1682_v5  ;;  %v1158_v40 = vadd.f32 %v1112_v39, %v6572_v54  ;;  %v5396_v5 = vld [vmem:[%s6129_s8 + $0x54] sm:$0xc]  ;;  %v5398_v49 = vld [vmem:[%s6129_s8 + $0x5c] sm:$0x3]  ;;  %v5652_v39 = vld [vmem:[%s6129_s8 + $0x6c] sm:$0xe] }
 0x1a3   : > { %v2538_v21 = vpop.f32.mrf.mxu0  ;;  %v5434_v43 = vrot.slane %v5396_v5, 10  ;;  %v5690_v38 = vrot.slane %v5652_v39, 9 }
 0x1a4   : > { %v6941_v50 = vadd.f32 %v2536_v42, %v2061_v8  ;;  %v2918_v42 = vpack.c.b16 %v2891_v3, %v2890_v2  ;;  %v4181_v8 = vrot.slane %v5765_v45, 6  ;;  %v2761_v3 = vrot.slane %v5398_v49, 6 }
 0x1a6   : > { %v4183_v32 = vrot.slane %v4181_v8, 4  ;;  %v4182_v5 = vsel %vm6270_vm5, %v5802_v34, %v4181_v8 }
 0x1a7   : > { %v1637_v36 = vpop.f32.mrf.mxu2 }
 0x1a8   : > { %v1683_v26 = vadd.f32 %v1637_v36, %v1158_v40  ;;  %v2016_v30 = vpop.f32.mrf.mxu3  ;;  %v2760_v40 = vrot.slane %v2758_v29, 4  ;;  %v4184_v36 = vrot.slane %v5766_v51, 6 }
 0x1a9   : > { %v1115_v60 = vpop.f32.mrf.mxu1 }
 0x1aa   : > { %v2062_v59 = vadd.f32 %v2016_v30, %v1683_v26  ;;  %v1159_v12 = vadd.f32 %v1115_v60, %v6420_v31  ;;  %v3663_v60 = vsel %vm6265_vm4, %v3661_v35, %v3662_v17  ;;  %v4185_v49 = vsel %vm6270_vm5, %v4183_v32, %v4184_v36 }
 0x1ab   : > { %v2541_v54 = vpop.f32.mrf.mxu0  ;;  %v3794_v4 = vunpack.c.l.b16 %v3663_v60  ;;  %v4316_v51 = vunpack.c.l.b16 %v4185_v49  ;;  %v5767_v60 = vld [vmem:[%s6129_s8 + $0x78] sm:$0xc] }
 0x1ac   : > { %3022 = vmatmul.bf16.gmra.mxu1 %v2918_v42  ;;  %3401 = vmatmul.bf16.gmra.mxu2 %v5948_v46  ;;  %v6954_v2 = vadd.f32 %v2538_v21, %v2062_v59  ;;  %v2759_v21 = vsel %vm6270_vm5, %v5434_v43, %v2758_v29  ;;  %v2762_v46 = vsel %vm6270_vm5, %v2760_v40, %v2761_v3  ;;  %v5400_v43 = vld [vmem:[%s6129_s8 + $0x64] sm:$0xf]  ;;  %v5656_v3 = vld [vmem:[%s6129_s8 + $0x7c] sm:$0xf] }
 0x1ad   : > { %3923 = vmatmul.bf16.gmra.mxu3 %v3819_v53  ;;  %v3660_v53 = vsel %vm6265_vm4, %v5690_v38, %v3659_v9  ;;  %v2892_v29 = vunpack.c.l.b16 %v2759_v21  ;;  %v2893_v59 = vunpack.c.l.b16 %v2762_v46  ;;  %v4315_v9 = vunpack.c.l.b16 %v4182_v5  ;;  %v5768_v38 = vld [vmem:[%s6129_s8 + $0x7c] sm:$0xf]  ;;  %v5769_v5 = vld [vmem:[%s6129_s8 + $0x80] sm:$0x3] }
 0x1ae   : > { %4445 = vmatmul.bf16.gmra.mxu0 %v4341_v56  ;;  %v3793_v6 = vunpack.c.l.b16 %v3660_v53  ;;  %v2765_v34 = vrot.slane %v5400_v43, 6  ;;  %v3666_v21 = vrot.slane %v5656_v3, 5  ;;  %v5657_v53 = vld [vmem:[%s6129_s8 + $0x80] sm:$0x1]  ;;  %v5803_v43 = vrot.slane %v5767_v60, 10 }
 0x1af   : > { %v1640_v45 = vpop.f32.mrf.mxu2 }
 0x1b0   : > { %v1684_v26 = vadd.f32 %v1640_v45, %v1159_v12  ;;  %v2019_v30 = vpop.f32.mrf.mxu3  ;;  %v5949_v12 = vld [vmem:[%s6129_s8 + $0x6c] sm:$0xff]  ;;  %v3820_v36 = vpack.c.b16 %v3794_v4, %v3793_v6  ;;  %v4342_v45 = vpack.c.b16 %v4316_v51, %v4315_v9  ;;  %v3668_v4 = vrot.slane %v3666_v21, 4 }
 0x1b1   : > { %v1117_v42 = vpop.f32.mrf.mxu1  ;;  %v3669_v9 = vrot.slane %v5657_v53, 5 }
 0x1b2   : > { %v2063_v56 = vadd.f32 %v2019_v30, %v1684_v26  ;;  %v1160_v40 = vadd.f32 %v1117_v42, %v6449_v52  ;;  %v5399_v26 = vld [vmem:[%s6129_s8 + $0x60] sm:$0xc]  ;;  %v5401_v30 = vld [vmem:[%s6129_s8 + $0x68] sm:$0x3]  ;;  %v5655_v42 = vld [vmem:[%s6129_s8 + $0x78] sm:$0xe] }
 0x1b3   : > { %v2543_v31 = vpop.f32.mrf.mxu0  ;;  %v5435_v49 = vrot.slane %v5399_v26, 10  ;;  %v5691_v6 = vrot.slane %v5655_v42, 9 }
 0x1b4   : > { %v6969_v39 = vadd.f32 %v2541_v54, %v2063_v56  ;;  %v2919_v54 = vpack.c.b16 %v2893_v59, %v2892_v29  ;;  %v4188_v56 = vrot.slane %v5768_v38, 6  ;;  %v2768_v59 = vrot.slane %v5401_v30, 6 }
 0x1b6   : > { %v4190_v3 = vrot.slane %v4188_v56, 4  ;;  %v4189_v26 = vsel %vm6270_vm5, %v5803_v43, %v4188_v56 }
 0x1b7   : > { %v1642_v8 = vpop.f32.mrf.mxu2 }
 0x1b8   : > { %v1685_v35 = vadd.f32 %v1642_v8, %v1160_v40  ;;  %v2021_v17 = vpop.f32.mrf.mxu3  ;;  %v2767_v40 = vrot.slane %v2765_v34, 4  ;;  %v4191_v8 = vrot.slane %v5769_v5, 6 }
 0x1b9   : > { %v1120_v32 = vpop.f32.mrf.mxu1 }
 0x1ba   : > { %v2064_v46 = vadd.f32 %v2021_v17, %v1685_v35  ;;  %v1161_v51 = vadd.f32 %v1120_v32, %v6464_v18  ;;  %v3670_v32 = vsel %vm6265_vm4, %v3668_v4, %v3669_v9  ;;  %v4192_v30 = vsel %vm6270_vm5, %v4190_v3, %v4191_v8 }
 0x1bb   : > { %v2546_v52 = vpop.f32.mrf.mxu0  ;;  %v3796_v60 = vunpack.c.l.b16 %v3670_v32  ;;  %v4318_v5 = vunpack.c.l.b16 %v4192_v30  ;;  %v5770_v32 = vld [vmem:[%s6129_s8 + $0x84] sm:$0xc] }
 0x1bc   : > { %3027 = vmatmul.bf16.gmra.mxu1 %v2919_v54  ;;  %3406 = vmatmul.bf16.gmra.mxu2 %v5949_v12  ;;  %v6982_v29 = vadd.f32 %v2543_v31, %v2064_v46  ;;  %v2766_v31 = vsel %vm6270_vm5, %v5435_v49, %v2765_v34  ;;  %v2769_v12 = vsel %vm6270_vm5, %v2767_v40, %v2768_v59  ;;  %v5403_v49 = vld [vmem:[%s6129_s8 + $0x70] sm:$0xf]  ;;  %v5659_v59 = vld [vmem:[%s6129_s8 + $0x88] sm:$0xf] }
 0x1bd   : > { %3928 = vmatmul.bf16.gmra.mxu3 %v3820_v36  ;;  %v3667_v36 = vsel %vm6265_vm4, %v5691_v6, %v3666_v21  ;;  %v2894_v34 = vunpack.c.l.b16 %v2766_v31  ;;  %v2895_v46 = vunpack.c.l.b16 %v2769_v12  ;;  %v4317_v21 = vunpack.c.l.b16 %v4189_v26  ;;  %v5771_v6 = vld [vmem:[%s6129_s8 + $0x88] sm:$0xf]  ;;  %v5772_v26 = vld [vmem:[%s6129_s8 + $0x8c] sm:$0x3] }
 0x1be   : > { %4450 = vmatmul.bf16.gmra.mxu0 %v4342_v45  ;;  %v3795_v53 = vunpack.c.l.b16 %v3667_v36  ;;  %v2772_v43 = vrot.slane %v5403_v49, 6  ;;  %v3673_v31 = vrot.slane %v5659_v59, 5  ;;  %v5660_v36 = vld [vmem:[%s6129_s8 + $0x8c] sm:$0x1]  ;;  %v5804_v49 = vrot.slane %v5770_v32, 10 }
 0x1bf   : > { %v1645_v38 = vpop.f32.mrf.mxu2 }
 0x1c0   : > { %v1686_v35 = vadd.f32 %v1645_v38, %v1161_v51  ;;  %v2024_v17 = vpop.f32.mrf.mxu3  ;;  %v5950_v51 = vld [vmem:[%s6129_s8 + $0x78] sm:$0xff]  ;;  %v3821_v8 = vpack.c.b16 %v3796_v60, %v3795_v53  ;;  %v4343_v38 = vpack.c.b16 %v4318_v5, %v4317_v21  ;;  %v3675_v60 = vrot.slane %v3673_v31, 4 }
 0x1c1   : > { %v1122_v54 = vpop.f32.mrf.mxu1  ;;  %v3676_v21 = vrot.slane %v5660_v36, 5 }
 0x1c2   : > { %v2065_v45 = vadd.f32 %v2024_v17, %v1686_v35  ;;  %v1162_v40 = vadd.f32 %v1122_v54, %v6487_v41  ;;  %v5402_v35 = vld [vmem:[%s6129_s8 + $0x6c] sm:$0xc]  ;;  %v5404_v17 = vld [vmem:[%s6129_s8 + $0x74] sm:$0x3]  ;;  %v5658_v54 = vld [vmem:[%s6129_s8 + $0x84] sm:$0xe] }
 0x1c3   : > { %v2548_v18 = vpop.f32.mrf.mxu0  ;;  %v5436_v30 = vrot.slane %v5402_v35, 10  ;;  %v5692_v53 = vrot.slane %v5658_v54, 9 }
 0x1c4   : > { %v6997_v42 = vadd.f32 %v2546_v52, %v2065_v45  ;;  %v2920_v52 = vpack.c.b16 %v2895_v46, %v2894_v34  ;;  %v4195_v45 = vrot.slane %v5771_v6, 6  ;;  %v2775_v46 = vrot.slane %v5404_v17, 6 }
 0x1c6   : > { %v4197_v59 = vrot.slane %v4195_v45, 4  ;;  %v4196_v35 = vsel %vm6270_vm5, %v5804_v49, %v4195_v45 }
 0x1c7   : > { %v1647_v56 = vpop.f32.mrf.mxu2 }
 0x1c8   : > { %v1687_v4 = vadd.f32 %v1647_v56, %v1162_v40  ;;  %v2026_v9 = vpop.f32.mrf.mxu3  ;;  %v2774_v40 = vrot.slane %v2772_v43, 4  ;;  %v4198_v56 = vrot.slane %v5772_v26, 6 }
 0x1c9   : > { %v1125_v3 = vpop.f32.mrf.mxu1 }
 0x1ca   : > { %v2066_v12 = vadd.f32 %v2026_v9, %v1687_v4  ;;  %v1163_v5 = vadd.f32 %v1125_v3, %v6508_v11  ;;  %v3677_v3 = vsel %vm6265_vm4, %v3675_v60, %v3676_v21  ;;  %v4199_v17 = vsel %vm6270_vm5, %v4197_v59, %v4198_v56 }
 0x1cb   : > { %v2551_v41 = vpop.f32.mrf.mxu0  ;;  %v3798_v32 = vunpack.c.l.b16 %v3677_v3  ;;  %v4320_v26 = vunpack.c.l.b16 %v4199_v17  ;;  %v5773_v3 = vld [vmem:[%s6129_s8 + $0x90] sm:$0xc] }
 0x1cc   : > { %3032 = vmatmul.bf16.gmra.mxu1 %v2920_v52  ;;  %3411 = vmatmul.bf16.gmra.mxu2 %v5950_v51  ;;  %v7010_v34 = vadd.f32 %v2548_v18, %v2066_v12  ;;  %v2773_v18 = vsel %vm6270_vm5, %v5436_v30, %v2772_v43  ;;  %v2776_v51 = vsel %vm6270_vm5, %v2774_v40, %v2775_v46  ;;  %v5406_v30 = vld [vmem:[%s6129_s8 + $0x7c] sm:$0xf]  ;;  %v5662_v46 = vld [vmem:[%s6129_s8 + $0x94] sm:$0xf] }
 0x1cd   : > { %3933 = vmatmul.bf16.gmra.mxu3 %v3821_v8  ;;  %v3674_v8 = vsel %vm6265_vm4, %v5692_v53, %v3673_v31  ;;  %v2896_v43 = vunpack.c.l.b16 %v2773_v18  ;;  %v2897_v12 = vunpack.c.l.b16 %v2776_v51  ;;  %v4319_v31 = vunpack.c.l.b16 %v4196_v35  ;;  %v5774_v53 = vld [vmem:[%s6129_s8 + $0x94] sm:$0xf]  ;;  %v5775_v35 = vld [vmem:[%s6129_s8 + $0x98] sm:$0x3] }
 0x1ce   : > { %4455 = vmatmul.bf16.gmra.mxu0 %v4343_v38  ;;  %v3797_v36 = vunpack.c.l.b16 %v3674_v8  ;;  %v2779_v49 = vrot.slane %v5406_v30, 6  ;;  %v3680_v18 = vrot.slane %v5662_v46, 5  ;;  %v5663_v8 = vld [vmem:[%s6129_s8 + $0x98] sm:$0x1]  ;;  %v5805_v30 = vrot.slane %v5773_v3, 10 }
 0x1cf   : > { %v1650_v6 = vpop.f32.mrf.mxu2 }
 0x1d0   : > { %v1688_v4 = vadd.f32 %v1650_v6, %v1163_v5  ;;  %v2029_v9 = vpop.f32.mrf.mxu3  ;;  %v5951_v5 = vld [vmem:[%s6129_s8 + $0x84] sm:$0xff]  ;;  %v3822_v56 = vpack.c.b16 %v3798_v32, %v3797_v36  ;;  %v4344_v6 = vpack.c.b16 %v4320_v26, %v4319_v31  ;;  %v3682_v32 = vrot.slane %v3680_v18, 4 }
 0x1d1   : > { %v1127_v52 = vpop.f32.mrf.mxu1  ;;  %v3683_v31 = vrot.slane %v5663_v8, 5 }
 0x1d2   : > { %v2067_v38 = vadd.f32 %v2029_v9, %v1688_v4  ;;  %v1164_v40 = vadd.f32 %v1127_v52, %v6537_v44  ;;  %v5405_v4 = vld [vmem:[%s6129_s8 + $0x78] sm:$0xc]  ;;  %v5407_v9 = vld [vmem:[%s6129_s8 + $0x80] sm:$0x3]  ;;  %v5661_v52 = vld [vmem:[%s6129_s8 + $0x90] sm:$0xe] }
 0x1d3   : > { %v2553_v11 = vpop.f32.mrf.mxu0  ;;  %v5437_v17 = vrot.slane %v5405_v4, 10  ;;  %v5693_v36 = vrot.slane %v5661_v52, 9 }
 0x1d4   : > { %v7025_v54 = vadd.f32 %v2551_v41, %v2067_v38  ;;  %v2921_v41 = vpack.c.b16 %v2897_v12, %v2896_v43  ;;  %v4202_v38 = vrot.slane %v5774_v53, 6  ;;  %v2782_v12 = vrot.slane %v5407_v9, 6 }
 0x1d6   : > { %v4204_v46 = vrot.slane %v4202_v38, 4  ;;  %v4203_v4 = vsel %vm6270_vm5, %v5805_v30, %v4202_v38 }
 0x1d7   : > { %v1652_v45 = vpop.f32.mrf.mxu2 }
 0x1d8   : > { %v1689_v60 = vadd.f32 %v1652_v45, %v1164_v40  ;;  %v2031_v21 = vpop.f32.mrf.mxu3  ;;  %v2781_v40 = vrot.slane %v2779_v49, 4  ;;  %v4205_v45 = vrot.slane %v5775_v35, 6 }
 0x1d9   : > { %v1130_v59 = vpop.f32.mrf.mxu1 }
 0x1da   : > { %v2068_v51 = vadd.f32 %v2031_v21, %v1689_v60  ;;  %v1165_v26 = vadd.f32 %v1130_v59, %v6552_v23  ;;  %v3684_v59 = vsel %vm6265_vm4, %v3682_v32, %v3683_v31  ;;  %v4206_v9 = vsel %vm6270_vm5, %v4204_v46, %v4205_v45 }
 0x1db   : > { %v2556_v44 = vpop.f32.mrf.mxu0  ;;  %v3800_v3 = vunpack.c.l.b16 %v3684_v59  ;;  %v4322_v35 = vunpack.c.l.b16 %v4206_v9  ;;  %v5776_v59 = vld [vmem:[%s6129_s8 + $0x9c] sm:$0xc] }
 0x1dc   : > { %3037 = vmatmul.bf16.gmra.mxu1 %v2921_v41  ;;  %3416 = vmatmul.bf16.gmra.mxu2 %v5951_v5  ;;  %v7038_v43 = vadd.f32 %v2553_v11, %v2068_v51  ;;  %v2780_v11 = vsel %vm6270_vm5, %v5437_v17, %v2779_v49  ;;  %v2783_v5 = vsel %vm6270_vm5, %v2781_v40, %v2782_v12  ;;  %v5409_v17 = vld [vmem:[%s6129_s8 + $0x88] sm:$0xf]  ;;  %v5665_v12 = vld [vmem:[%s6129_s8 + $0xa0] sm:$0xf] }
 0x1dd   : > { %3938 = vmatmul.bf16.gmra.mxu3 %v3822_v56  ;;  %v3681_v56 = vsel %vm6265_vm4, %v5693_v36, %v3680_v18  ;;  %v2898_v49 = vunpack.c.l.b16 %v2780_v11  ;;  %v2899_v51 = vunpack.c.l.b16 %v2783_v5  ;;  %v4321_v18 = vunpack.c.l.b16 %v4203_v4  ;;  %v5777_v36 = vld [vmem:[%s6129_s8 + $0xa0] sm:$0xf]  ;;  %v5778_v4 = vld [vmem:[%s6129_s8 + $0xa4] sm:$0x3] }
 0x1de   : > { %4460 = vmatmul.bf16.gmra.mxu0 %v4344_v6  ;;  %v3799_v8 = vunpack.c.l.b16 %v3681_v56  ;;  %v2786_v30 = vrot.slane %v5409_v17, 6  ;;  %v3687_v11 = vrot.slane %v5665_v12, 5  ;;  %v5666_v56 = vld [vmem:[%s6129_s8 + $0xa4] sm:$0x1] }
 0x1df   : > { %v1655_v53 = vpop.f32.mrf.mxu2 }
 0x1e0   : > { %v1690_v60 = vadd.f32 %v1655_v53, %v1165_v26  ;;  %v2034_v21 = vpop.f32.mrf.mxu3  ;;  %v5952_v26 = vld [vmem:[%s6129_s8 + $0x90] sm:$0xff]  ;;  %v3823_v45 = vpack.c.b16 %v3800_v3, %v3799_v8  ;;  %v4345_v53 = vpack.c.b16 %v4322_v35, %v4321_v18  ;;  %v3689_v18 = vrot.slane %v3687_v11, 4 }
 0x1e1   : > { %v1132_v41 = vpop.f32.mrf.mxu1  ;;  %v3690_v35 = vrot.slane %v5666_v56, 5 }
 0x1e2   : > { %v2069_v6 = vadd.f32 %v2034_v21, %v1690_v60  ;;  %v1166_v40 = vadd.f32 %v1132_v41, %v6575_v57  ;;  %v5408_v60 = vld [vmem:[%s6129_s8 + $0x84] sm:$0xc]  ;;  %v5410_v21 = vld [vmem:[%s6129_s8 + $0x8c] sm:$0x3]  ;;  %v5664_v41 = vld [vmem:[%s6129_s8 + $0x9c] sm:$0xe] }
 0x1e3   : > { %v2558_v23 = vpop.f32.mrf.mxu0  ;;  %v5438_v9 = vrot.slane %v5408_v60, 10  ;;  %v2789_v8 = vrot.slane %v5410_v21, 6  ;;  %v5694_v3 = vrot.slane %v5664_v41, 9  ;;  %v5412_v41 = vld [vmem:[%s6129_s8 + $0x94] sm:$0xf] }
 0x1e4   : > { %v7053_v52 = vadd.f32 %v2556_v44, %v2069_v6  ;;  %v2922_v44 = vpack.c.b16 %v2899_v51, %v2898_v49  ;;  %v4209_v6 = vrot.slane %v5777_v36, 6  ;;  %v2788_v49 = vrot.slane %v2786_v30, 4 }
 0x1e6   : > { %v4211_v12 = vrot.slane %v4209_v6, 4 }
 0x1e7   : > { %v1657_v38 = vpop.f32.mrf.mxu2 }
 0x1e8   : > { %v1691_v32 = vadd.f32 %v1657_v38, %v1166_v40  ;;  %v2036_v31 = vpop.f32.mrf.mxu3  ;;  %v5806_v40 = vrot.slane %v5776_v59, 10  ;;  %v4212_v38 = vrot.slane %v5778_v4, 6 }
 0x1e9   : > { %v3003_v46 = vpop.f32.mrf.mxu1 }
 0x1ea   : > { %v2070_v5 = vadd.f32 %v2036_v31, %v1691_v32  ;;  %v3083_v17 = vadd.f32 %v3003_v46, %v6610_v16  ;;  %v4210_v60 = vsel %vm6270_vm5, %v5806_v40, %v4209_v6  ;;  %v4213_v21 = vsel %vm6270_vm5, %v4211_v12, %v4212_v38  ;;  %v5668_v6 = vld [vmem:[%s6129_s8 + $0xac] sm:$0xf]  ;;  %v5953_v40 = vld [vmem:[%s6129_s8 + $0x9c] sm:$0xff]  ;;  %v5411_v12 = vld [vmem:[%s6129_s8 + $0x90] sm:$0xc] }
 0x1eb   : > { %v4426_v57 = vpop.f32.mrf.mxu0  ;;  %v4323_v4 = vunpack.c.l.b16 %v4210_v60  ;;  %v3694_v38 = vrot.slane %v5668_v6, 5  ;;  %v5781_v60 = vld [vmem:[%s6129_s8 + $0xb0] sm:$0x3] }
 0x1ec   : > { %3042 = vmatmul.bf16.gmra.mxu1 %v2922_v44  ;;  %3421 = vmatmul.bf16.gmra.mxu2 %v5952_v26  ;;  %v7066_v51 = vadd.f32 %v2558_v23, %v2070_v5  ;;  %v2787_v23 = vsel %vm6270_vm5, %v5438_v9, %v2786_v30  ;;  %v2790_v26 = vsel %vm6270_vm5, %v2788_v49, %v2789_v8  ;;  %v4324_v9 = vunpack.c.l.b16 %v4213_v21  ;;  %v5780_v8 = vld [vmem:[%s6129_s8 + $0xac] sm:$0xf] }
 0x1ed   : > { %3943 = vmatmul.bf16.gmra.mxu3 %v3823_v45  ;;  %v3688_v45 = vsel %vm6265_vm4, %v5694_v3, %v3687_v11  ;;  %v2900_v11 = vunpack.c.l.b16 %v2787_v23  ;;  %v2901_v5 = vunpack.c.l.b16 %v2790_v26  ;;  %v5413_v23 = vld [vmem:[%s6129_s8 + $0x98] sm:$0x3]  ;;  %v5667_v26 = vld [vmem:[%s6129_s8 + $0xa8] sm:$0xe]  ;;  %v5439_v21 = vrot.slane %v5411_v12, 10 }
 0x1ee   : > { %7304 = vst [vmem:[#allocation3_spill] sm:$0xff] %v7066_v51  ;;  %4465 = vmatmul.bf16.gmra.mxu0 %v4345_v53  ;;  %v3691_v53 = vsel %vm6265_vm4, %v3689_v18, %v3690_v35  ;;  %v3801_v56 = vunpack.c.l.b16 %v3688_v45  ;;  %v2793_v18 = vrot.slane %v5412_v41, 6  ;;  %v4216_v45 = vrot.slane %v5780_v8, 6 }
 0x1ef   : > { %v3382_v36 = vpop.f32.mrf.mxu2  ;;  %v3802_v59 = vunpack.c.l.b16 %v3691_v53  ;;  %v5779_v53 = vld [vmem:[%s6129_s8 + $0xa8] sm:$0xc]  ;;  %v3696_v6 = vrot.slane %v3694_v38, 4 }
 0x1f0   : > { %v3462_v32 = vadd.f32 %v3382_v36, %v3083_v17  ;;  %v3904_v31 = vpop.f32.mrf.mxu3  ;;  %v2923_v17 = vpack.c.b16 %v2901_v5, %v2900_v11  ;;  %v2795_v41 = vrot.slane %v2793_v18, 4  ;;  %v2796_v11 = vrot.slane %v5413_v23, 6 }
 0x1f1   : > { %v3005_v44 = vpop.f32.mrf.mxu1  ;;  %v5695_v5 = vrot.slane %v5667_v26, 9 }
 0x1f2   : > { %v3984_v16 = vadd.f32 %v3904_v31, %v3462_v32  ;;  %v3084_v49 = vadd.f32 %v3005_v44, %v6623_v20  ;;  %v3824_v32 = vpack.c.b16 %v3802_v59, %v3801_v56  ;;  %v4346_v31 = vpack.c.b16 %v4324_v9, %v4323_v4  ;;  %v5669_v44 = vld [vmem:[%s6129_s8 + $0xb0] sm:$0x1] }
 0x1f3   : > { %v4428_v46 = vpop.f32.mrf.mxu0  ;;  %v3697_v56 = vrot.slane %v5669_v44, 5  ;;  %v5807_v59 = vrot.slane %v5779_v53, 10  ;;  %v4218_v4 = vrot.slane %v4216_v45, 4  ;;  %v4219_v9 = vrot.slane %v5781_v60, 6 }
 0x1f4   : > { %v4506_v30 = vadd.f32 %v4426_v57, %v3984_v16 }
 0x1f6   : > { %4605 = vst [vmem:[%s7085_s7] sm:$0xff] %v4506_v30  ;;  %v4675_v8 = vmul.f32 %v4506_v30, %v4506_v30 }
 0x1f7   : > { %v3384_v3 = vpop.f32.mrf.mxu2 }
 0x1f8   : > { %v3463_v57 = vadd.f32 %v3384_v3, %v3084_v49  ;;  %v3906_v35 = vpop.f32.mrf.mxu3 }
 0x1f9   : > { %v3008_v36 = vpop.f32.mrf.mxu1 }
 0x1fa   : > { %v3985_v16 = vadd.f32 %v3906_v35, %v3463_v57  ;;  %v3085_v35 = vadd.f32 %v3008_v36, %v6638_v58  ;;  %v3698_v58 = vsel %vm6265_vm4, %v3696_v6, %v3697_v56  ;;  %v4217_v36 = vsel %vm6270_vm5, %v5807_v59, %v4216_v45 }
 0x1fb   : > { %v4431_v20 = vpop.f32.mrf.mxu0 }
 0x1fc   : > { %v4507_v49 = vadd.f32 %v4428_v46, %v3985_v16  ;;  %3047 = vmatmul.bf16.gmra.mxu1 %v2923_v17  ;;  %3426 = vmatmul.bf16.gmra.mxu2 %v5953_v40  ;;  %v2794_v40 = vsel %vm6270_vm5, %v5439_v21, %v2793_v18  ;;  %v4220_v18 = vsel %vm6270_vm5, %v4218_v4, %v4219_v9  ;;  %v3804_v21 = vunpack.c.l.b16 %v3698_v58  ;;  %v5783_v4 = vld [vmem:[%s6129_s8 + $0xb8] sm:$0xf]  ;;  %v5782_v58 = vld [vmem:[%s6129_s8 + $0xb4] sm:$0xc] }
 0x1fd   : > { %3948 = vmatmul.bf16.gmra.mxu3 %v3824_v32  ;;  %v2797_v32 = vsel %vm6270_vm5, %v2795_v41, %v2796_v11  ;;  %v2902_v16 = vunpack.c.l.b16 %v2794_v40  ;;  %v4326_v41 = vunpack.c.l.b16 %v4220_v18  ;;  %v5671_v11 = vld [vmem:[%s6129_s8 + $0xb8] sm:$0xf]  ;;  %v4223_v18 = vrot.slane %v5783_v4, 6 }
 0x1fe   : > { %4470 = vmatmul.bf16.gmra.mxu0 %v4346_v31  ;;  %4606 = vst [vmem:[%s7085_s7 + $0x8] sm:$0xff] %v4507_v49  ;;  %v4637_v3 = vadd.f32 %v4507_v49, %v4506_v30  ;;  %v4676_v57 = vmul.f32 %v4507_v49, %v4507_v49  ;;  %v3695_v30 = vsel %vm6265_vm4, %v5695_v5, %v3694_v38  ;;  %v2903_v44 = vunpack.c.l.b16 %v2797_v32  ;;  %v5415_v49 = vld [vmem:[%s6129_s8 + $0xa0] sm:$0xf]  ;;  %v5416_v32 = vld [vmem:[%s6129_s8 + $0xa4] sm:$0x3] }
 0x1ff   : > { %v3387_v12 = vpop.f32.mrf.mxu2  ;;  %v3803_v60 = vunpack.c.l.b16 %v3695_v30  ;;  %v4325_v38 = vunpack.c.l.b16 %v4217_v36  ;;  %v5670_v30 = vld [vmem:[%s6129_s8 + $0xb4] sm:$0xe]  ;;  %v5784_v36 = vld [vmem:[%s6129_s8 + $0xbc] sm:$0x3] }
 0x200   : > { %v4707_v51 = vadd.f32 %v4676_v57, %v4675_v8  ;;  %v3464_v46 = vadd.f32 %v3387_v12, %v3085_v35  ;;  %v3909_v17 = vpop.f32.mrf.mxu3  ;;  %v2924_v59 = vpack.c.b16 %v2903_v44, %v2902_v16  ;;  %v5954_v57 = vld [vmem:[%s6129_s8 + $0xa8] sm:$0xff]  ;;  %v5414_v35 = vld [vmem:[%s6129_s8 + $0x9c] sm:$0xc]  ;;  %v2800_v12 = vrot.slane %v5415_v49, 6 }
 0x201   : > { %v3010_v31 = vpop.f32.mrf.mxu1  ;;  %v4347_v40 = vpack.c.b16 %v4326_v41, %v4325_v38  ;;  %v5696_v49 = vrot.slane %v5670_v30, 9  ;;  %v5808_v38 = vrot.slane %v5782_v58, 10  ;;  %v4226_v41 = vrot.slane %v5784_v36, 6  ;;  %v5418_v36 = vld [vmem:[%s6129_s8 + $0xac] sm:$0xf] }
 0x202   : > { %v3986_v23 = vadd.f32 %v3909_v17, %v3464_v46  ;;  %v3086_v45 = vadd.f32 %v3010_v31, %v6651_v63  ;;  %v3701_v46 = vrot.slane %v5671_v11, 5  ;;  %v2802_v44 = vrot.slane %v2800_v12, 4 }
 0x203   : > { %v4433_v26 = vpop.f32.mrf.mxu0 }
 0x204   : > { %v4508_v53 = vadd.f32 %v4431_v20, %v3986_v23  ;;  %v5672_v23 = vld [vmem:[%s6129_s8 + $0xbc] sm:$0x1] }
 0x206   : > { %4607 = vst [vmem:[%s7085_s7 + $0x10] sm:$0xff] %v4508_v53  ;;  %v4638_v5 = vadd.f32 %v4637_v3, %v4508_v53  ;;  %v4677_v6 = vmul.f32 %v4508_v53, %v4508_v53  ;;  %v3825_v3 = vpack.c.b16 %v3804_v21, %v3803_v60  ;;  %v2803_v53 = vrot.slane %v5416_v32, 6 }
 0x207   : > { %v3389_v56 = vpop.f32.mrf.mxu2  ;;  %v3703_v60 = vrot.slane %v3701_v46, 4  ;;  %v3704_v21 = vrot.slane %v5672_v23, 5 }
 0x208   : > { %v4708_v20 = vadd.f32 %v4707_v51, %v4677_v6  ;;  %v3465_v9 = vadd.f32 %v3389_v56, %v3086_v45  ;;  %v3911_v8 = vpop.f32.mrf.mxu3  ;;  %v5440_v51 = vrot.slane %v5414_v35, 10  ;;  %v4225_v56 = vrot.slane %v4223_v18, 4 }
 0x209   : > { %v3013_v17 = vpop.f32.mrf.mxu1 }
 0x20a   : > { %v3987_v63 = vadd.f32 %v3911_v8, %v3465_v9  ;;  %v3087_v45 = vadd.f32 %v3013_v17, %v6678_v48  ;;  %v2801_v8 = vsel %vm6270_vm5, %v5440_v51, %v2800_v12  ;;  %v4224_v17 = vsel %vm6270_vm5, %v5808_v38, %v4223_v18  ;;  %v5674_v51 = vld [vmem:[%s6129_s8 + $0xc4] sm:$0xf] }
 0x20b   : > { %v4436_v31 = vpop.f32.mrf.mxu0  ;;  %v4227_v12 = vsel %vm6270_vm5, %v4225_v56, %v4226_v41  ;;  %v5955_v41 = vld [vmem:[%s6129_s8 + $0xb4] sm:$0xff]  ;;  %v3708_v56 = vrot.slane %v5674_v51, 5 }
 0x20c   : > { %v4509_v16 = vadd.f32 %v4433_v26, %v3987_v63  ;;  %3052 = vmatmul.bf16.gmra.mxu1 %v2924_v59  ;;  %3431 = vmatmul.bf16.gmra.mxu2 %v5954_v57  ;;  %v2804_v57 = vsel %vm6270_vm5, %v2802_v44, %v2803_v53  ;;  %v4328_v58 = vunpack.c.l.b16 %v4227_v12 }
 0x20d   : > { %3953 = vmatmul.bf16.gmra.mxu3 %v3825_v3  ;;  %v2905_v32 = vunpack.c.l.b16 %v2804_v57  ;;  %v5675_v57 = vld [vmem:[%s6129_s8 + $0xc8] sm:$0x1] }
 0x20e   : > { %4475 = vmatmul.bf16.gmra.mxu0 %v4347_v40  ;;  %4608 = vst [vmem:[%s7085_s7 + $0x18] sm:$0xff] %v4509_v16  ;;  %v4639_v11 = vadd.f32 %v4638_v5, %v4509_v16  ;;  %v4678_v6 = vmul.f32 %v4509_v16, %v4509_v16  ;;  %v3702_v5 = vsel %vm6265_vm4, %v5696_v49, %v3701_v46  ;;  %v2904_v40 = vunpack.c.l.b16 %v2801_v8  ;;  %v5673_v8 = vld [vmem:[%s6129_s8 + $0xc0] sm:$0xe] }
 0x20f   : > { %v3392_v4 = vpop.f32.mrf.mxu2  ;;  %v3805_v23 = vunpack.c.l.b16 %v3702_v5  ;;  %v4327_v46 = vunpack.c.l.b16 %v4224_v17  ;;  %v5785_v5 = vld [vmem:[%s6129_s8 + $0xc0] sm:$0xc] }
 0x210   : > { %v4709_v9 = vadd.f32 %v4708_v20, %v4678_v6  ;;  %v3466_v26 = vadd.f32 %v3392_v4, %v3087_v45  ;;  %v3914_v59 = vpop.f32.mrf.mxu3  ;;  %v3705_v20 = vsel %vm6265_vm4, %v3703_v60, %v3704_v21  ;;  %v2925_v49 = vpack.c.b16 %v2905_v32, %v2904_v40  ;;  %v5786_v60 = vld [vmem:[%s6129_s8 + $0xc4] sm:$0xf]  ;;  %v5417_v6 = vld [vmem:[%s6129_s8 + $0xa8] sm:$0xc] }
 0x211   : > { %v3015_v35 = vpop.f32.mrf.mxu1  ;;  %v3806_v63 = vunpack.c.l.b16 %v3705_v20  ;;  %v2807_v45 = vrot.slane %v5418_v36, 6  ;;  %v4230_v20 = vrot.slane %v5786_v60, 6  ;;  %v5697_v32 = vrot.slane %v5673_v8, 9 }
 0x212   : > { %v3988_v3 = vadd.f32 %v3914_v59, %v3466_v26  ;;  %v3088_v18 = vadd.f32 %v3015_v35, %v6691_v7  ;;  %v4348_v26 = vpack.c.b16 %v4328_v58, %v4327_v46  ;;  %v5419_v59 = vld [vmem:[%s6129_s8 + $0xb0] sm:$0x3] }
 0x213   : > { %v4438_v48 = vpop.f32.mrf.mxu0  ;;  %v2809_v12 = vrot.slane %v2807_v45, 4  ;;  %v2810_v40 = vrot.slane %v5419_v59, 6 }
 0x214   : > { %v4510_v30 = vadd.f32 %v4436_v31, %v3988_v3  ;;  %v5787_v3 = vld [vmem:[%s6129_s8 + $0xc8] sm:$0x3] }
 0x215   : > { %v4233_v46 = vrot.slane %v5787_v3, 6 }
 0x216   : > { %4609 = vst [vmem:[%s7085_s7 + $0x20] sm:$0xff] %v4510_v30  ;;  %v4640_v16 = vadd.f32 %v4639_v11, %v4510_v30  ;;  %v4679_v44 = vmul.f32 %v4510_v30, %v4510_v30  ;;  %v3826_v11 = vpack.c.b16 %v3806_v63, %v3805_v23  ;;  %v3710_v30 = vrot.slane %v3708_v56, 4 }
 0x217   : > { %v3394_v53 = vpop.f32.mrf.mxu2  ;;  %v3711_v23 = vrot.slane %v5675_v57, 5  ;;  %v5809_v63 = vrot.slane %v5785_v5, 10  ;;  %v5677_v5 = vld [vmem:[%s6129_s8 + $0xd0] sm:$0xf] }
 0x218   : > { %v4710_v31 = vadd.f32 %v4709_v9, %v4679_v44  ;;  %v3467_v21 = vadd.f32 %v3394_v53, %v3088_v18  ;;  %v3916_v38 = vpop.f32.mrf.mxu3  ;;  %v5441_v9 = vrot.slane %v5417_v6, 10  ;;  %v4232_v44 = vrot.slane %v4230_v20, 4 }
 0x219   : > { %v3018_v4 = vpop.f32.mrf.mxu1  ;;  %v4231_v6 = vsel %vm6270_vm5, %v5809_v63, %v4230_v20  ;;  %v5420_v63 = vld [vmem:[%s6129_s8 + $0xb4] sm:$0xc] }
 0x21a   : > { %v3989_v7 = vadd.f32 %v3916_v38, %v3467_v21  ;;  %v3089_v51 = vadd.f32 %v3018_v4, %v6706_v28  ;;  %v2808_v60 = vsel %vm6270_vm5, %v5441_v9, %v2807_v45  ;;  %v2811_v21 = vsel %vm6270_vm5, %v2809_v12, %v2810_v40  ;;  %v5789_v40 = vld [vmem:[%s6129_s8 + $0xd0] sm:$0xf] }
 0x21b   : > { %v4441_v35 = vpop.f32.mrf.mxu0  ;;  %v4234_v45 = vsel %vm6270_vm5, %v4232_v44, %v4233_v46  ;;  %v2906_v4 = vunpack.c.l.b16 %v2808_v60 }
 0x21c   : > { %v4511_v17 = vadd.f32 %v4438_v48, %v3989_v7  ;;  %3057 = vmatmul.bf16.gmra.mxu1 %v2925_v49  ;;  %3436 = vmatmul.bf16.gmra.mxu2 %v5955_v41  ;;  %v4330_v57 = vunpack.c.l.b16 %v4234_v45  ;;  %v5421_v7 = vld [vmem:[%s6129_s8 + $0xb8] sm:$0xf] }
 0x21d   : > { %3958 = vmatmul.bf16.gmra.mxu3 %v3826_v11  ;;  %v2907_v11 = vunpack.c.l.b16 %v2811_v21  ;;  %v2814_v46 = vrot.slane %v5421_v7, 6  ;;  %v5788_v21 = vld [vmem:[%s6129_s8 + $0xcc] sm:$0xc] }
 0x21e   : > { %4480 = vmatmul.bf16.gmra.mxu0 %v4348_v26  ;;  %4610 = vst [vmem:[%s7085_s7 + $0x28] sm:$0xff] %v4511_v17  ;;  %v4641_v58 = vadd.f32 %v4640_v16, %v4511_v17  ;;  %v4680_v36 = vmul.f32 %v4511_v17, %v4511_v17  ;;  %v3709_v16 = vsel %vm6265_vm4, %v5697_v32, %v3708_v56  ;;  %v4329_v56 = vunpack.c.l.b16 %v4231_v6 }
 0x21f   : > { %v3397_v18 = vpop.f32.mrf.mxu2  ;;  %v3807_v59 = vunpack.c.l.b16 %v3709_v16  ;;  %v2926_v12 = vpack.c.b16 %v2907_v11, %v2906_v4  ;;  %v4237_v16 = vrot.slane %v5789_v40, 6 }
 0x220   : > { %v4711_v53 = vadd.f32 %v4710_v31, %v4680_v36  ;;  %v3468_v48 = vadd.f32 %v3397_v18, %v3089_v51  ;;  %v3919_v49 = vpop.f32.mrf.mxu3  ;;  %v3712_v31 = vsel %vm6265_vm4, %v3710_v30, %v3711_v23  ;;  %v5956_v23 = vld [vmem:[%s6129_s8 + $0xc0] sm:$0xff]  ;;  %v3715_v36 = vrot.slane %v5677_v5, 5  ;;  %v5422_v18 = vld [vmem:[%s6129_s8 + $0xbc] sm:$0x3] }
 0x221   : > { %v3020_v38 = vpop.f32.mrf.mxu1  ;;  %v3808_v8 = vunpack.c.l.b16 %v3712_v31  ;;  %v4349_v44 = vpack.c.b16 %v4330_v57, %v4329_v56  ;;  %v2816_v31 = vrot.slane %v2814_v46, 4  ;;  %v2817_v6 = vrot.slane %v5422_v18, 6 }
 0x222   : > { %v3990_v41 = vadd.f32 %v3919_v49, %v3468_v48  ;;  %v3090_v20 = vadd.f32 %v3020_v38, %v6718_v62  ;;  %v5676_v48 = vld [vmem:[%s6129_s8 + $0xcc] sm:$0xe]  ;;  %v5678_v49 = vld [vmem:[%s6129_s8 + $0xd4] sm:$0x1]  ;;  %v3717_v4 = vrot.slane %v3715_v36, 4  ;;  %v4239_v7 = vrot.slane %v4237_v16, 4 }
 0x223   : > { %v4443_v28 = vpop.f32.mrf.mxu0  ;;  %v5790_v38 = vld [vmem:[%s6129_s8 + $0xd4] sm:$0x3]  ;;  %v5698_v45 = vrot.slane %v5676_v48, 9  ;;  %v3718_v11 = vrot.slane %v5678_v49, 5  ;;  %v5424_v48 = vld [vmem:[%s6129_s8 + $0xc4] sm:$0xf] }
 0x224   : > { %v4512_v26 = vadd.f32 %v4441_v35, %v3990_v41  ;;  %v5680_v49 = vld [vmem:[%s6129_s8 + $0xdc] sm:$0xf] }
 0x226   : > { %4611 = vst [vmem:[%s7085_s7 + $0x30] sm:$0xff] %v4512_v26  ;;  %v4642_v3 = vadd.f32 %v4641_v58, %v4512_v26  ;;  %v4681_v9 = vmul.f32 %v4512_v26, %v4512_v26  ;;  %v3827_v58 = vpack.c.b16 %v3808_v8, %v3807_v59  ;;  %v5810_v26 = vrot.slane %v5788_v21, 10 }
 0x227   : > { %v3399_v17 = vpop.f32.mrf.mxu2  ;;  %v4240_v59 = vrot.slane %v5790_v38, 6 }
 0x228   : > { %v4712_v35 = vadd.f32 %v4711_v53, %v4681_v9  ;;  %v3469_v32 = vadd.f32 %v3399_v17, %v3090_v20  ;;  %v3921_v30 = vpop.f32.mrf.mxu3  ;;  %v5442_v53 = vrot.slane %v5420_v63, 10 }
 0x229   : > { %v3023_v51 = vpop.f32.mrf.mxu1 }
 0x22a   : > { %v3991_v62 = vadd.f32 %v3921_v30, %v3469_v32  ;;  %v3091_v57 = vadd.f32 %v3023_v51, %v6745_v61  ;;  %v2815_v17 = vsel %vm6270_vm5, %v5442_v53, %v2814_v46  ;;  %v4238_v30 = vsel %vm6270_vm5, %v5810_v26, %v4237_v16 }
 0x22b   : > { %v4446_v60 = vpop.f32.mrf.mxu0  ;;  %v2908_v63 = vunpack.c.l.b16 %v2815_v17  ;;  %v3722_v26 = vrot.slane %v5680_v49, 5  ;;  %v5793_v17 = vld [vmem:[%s6129_s8 + $0xe0] sm:$0x3] }
 0x22c   : > { %v4513_v41 = vadd.f32 %v4443_v28, %v3991_v62  ;;  %3062 = vmatmul.bf16.gmra.mxu1 %v2926_v12  ;;  %3441 = vmatmul.bf16.gmra.mxu2 %v5956_v23  ;;  %v2818_v12 = vsel %vm6270_vm5, %v2816_v31, %v2817_v6  ;;  %v4241_v23 = vsel %vm6270_vm5, %v4239_v7, %v4240_v59  ;;  %v5679_v7 = vld [vmem:[%s6129_s8 + $0xd8] sm:$0xe] }
 0x22d   : > { %3963 = vmatmul.bf16.gmra.mxu3 %v3827_v58  ;;  %v2909_v46 = vunpack.c.l.b16 %v2818_v12  ;;  %v4332_v18 = vunpack.c.l.b16 %v4241_v23 }
 0x22e   : > { %4485 = vmatmul.bf16.gmra.mxu0 %v4349_v44  ;;  %4612 = vst [vmem:[%s7085_s7 + $0x38] sm:$0xff] %v4513_v41  ;;  %v4643_v8 = vadd.f32 %v4642_v3, %v4513_v41  ;;  %v4682_v56 = vmul.f32 %v4513_v41, %v4513_v41  ;;  %v3716_v3 = vsel %vm6265_vm4, %v5698_v45, %v3715_v36  ;;  %v4331_v36 = vunpack.c.l.b16 %v4238_v30  ;;  %v5792_v41 = vld [vmem:[%s6129_s8 + $0xdc] sm:$0xf]  ;;  %v5957_v45 = vld [vmem:[%s6129_s8 + $0xcc] sm:$0xff] }
 0x22f   : > { %v3402_v5 = vpop.f32.mrf.mxu2  ;;  %v3809_v58 = vunpack.c.l.b16 %v3716_v3  ;;  %v2927_v53 = vpack.c.b16 %v2909_v46, %v2908_v63  ;;  %v4244_v12 = vrot.slane %v5792_v41, 6  ;;  %v3724_v30 = vrot.slane %v3722_v26, 4 }
 0x230   : > { %v4713_v9 = vadd.f32 %v4712_v35, %v4682_v56  ;;  %v3470_v28 = vadd.f32 %v3402_v5, %v3091_v57  ;;  %v3924_v20 = vpop.f32.mrf.mxu3  ;;  %v3719_v35 = vsel %vm6265_vm4, %v3717_v4, %v3718_v11  ;;  %v5423_v4 = vld [vmem:[%s6129_s8 + $0xc0] sm:$0xc]  ;;  %v2821_v11 = vrot.slane %v5424_v48, 6  ;;  %v5425_v57 = vld [vmem:[%s6129_s8 + $0xc8] sm:$0x3] }
 0x231   : > { %v3025_v40 = vpop.f32.mrf.mxu1  ;;  %v3810_v44 = vunpack.c.l.b16 %v3719_v35  ;;  %v4350_v56 = vpack.c.b16 %v4332_v18, %v4331_v36  ;;  %v5681_v5 = vld [vmem:[%s6129_s8 + $0xe0] sm:$0x1]  ;;  %v5699_v35 = vrot.slane %v5679_v7, 9  ;;  %v4247_v46 = vrot.slane %v5793_v17, 6 }
 0x232   : > { %v3992_v32 = vadd.f32 %v3924_v20, %v3470_v28  ;;  %v3092_v38 = vadd.f32 %v3025_v40, %v6758_v14  ;;  %v5791_v20 = vld [vmem:[%s6129_s8 + $0xd8] sm:$0xc]  ;;  %v2823_v3 = vrot.slane %v2821_v11, 4  ;;  %v3725_v23 = vrot.slane %v5681_v5, 5 }
 0x233   : > { %v4448_v61 = vpop.f32.mrf.mxu0  ;;  %v5811_v63 = vrot.slane %v5791_v20, 10  ;;  %v4246_v36 = vrot.slane %v4244_v12, 4 }
 0x234   : > { %v4514_v51 = vadd.f32 %v4446_v60, %v3992_v32  ;;  %v2824_v32 = vrot.slane %v5425_v57, 6  ;;  %v3726_v41 = vsel %vm6265_vm4, %v3724_v30, %v3725_v23  ;;  %v5683_v57 = vld [vmem:[%s6129_s8 + $0xe8] sm:$0xf] }
 0x235   : > { %v3729_v30 = vrot.slane %v5683_v57, 5 }
 0x236   : > { %4613 = vst [vmem:[%s7085_s7 + $0x40] sm:$0xff] %v4514_v51  ;;  %v4644_v62 = vadd.f32 %v4643_v8, %v4514_v51  ;;  %v4683_v21 = vmul.f32 %v4514_v51, %v4514_v51  ;;  %v3828_v8 = vpack.c.b16 %v3810_v44, %v3809_v58 }
 0x237   : > { %v3404_v16 = vpop.f32.mrf.mxu2 }
 0x238   : > { %v4714_v60 = vadd.f32 %v4713_v9, %v4683_v21  ;;  %v3471_v31 = vadd.f32 %v3404_v16, %v3092_v38  ;;  %v3926_v6 = vpop.f32.mrf.mxu3  ;;  %v5443_v9 = vrot.slane %v5423_v4, 10  ;;  %v2825_v38 = vsel %vm6270_vm5, %v2823_v3, %v2824_v32  ;;  %v5958_v3 = vld [vmem:[%s6129_s8 + $0xd8] sm:$0xff]  ;;  %v5426_v32 = vld [vmem:[%s6129_s8 + $0xcc] sm:$0xc] }
 0x239   : > { %v3028_v59 = vpop.f32.mrf.mxu1 }
 0x23a   : > { %v3993_v14 = vadd.f32 %v3926_v6, %v3471_v31  ;;  %v3093_v44 = vadd.f32 %v3028_v59, %v6773_v1  ;;  %v2822_v21 = vsel %vm6270_vm5, %v5443_v9, %v2821_v11  ;;  %v4248_v31 = vsel %vm6270_vm5, %v4246_v36, %v4247_v46 }
 0x23b   : > { %v4451_v28 = vpop.f32.mrf.mxu0  ;;  %v2910_v6 = vunpack.c.l.b16 %v2822_v21  ;;  %v3812_v59 = vunpack.c.l.b16 %v3726_v41 }
 0x23c   : > { %v4515_v40 = vadd.f32 %v4448_v61, %v3993_v14  ;;  %3067 = vmatmul.bf16.gmra.mxu1 %v2927_v53  ;;  %3446 = vmatmul.bf16.gmra.mxu2 %v5957_v45  ;;  %v2911_v45 = vunpack.c.l.b16 %v2825_v38 }
 0x23d   : > { %3968 = vmatmul.bf16.gmra.mxu3 %v3828_v8  ;;  %v4334_v8 = vunpack.c.l.b16 %v4248_v31 }
 0x23e   : > { %4490 = vmatmul.bf16.gmra.mxu0 %v4350_v56  ;;  %4614 = vst [vmem:[%s7085_s7 + $0x48] sm:$0xff] %v4515_v40  ;;  %v4645_v51 = vadd.f32 %v4644_v62, %v4515_v40  ;;  %v4684_v58 = vmul.f32 %v4515_v40, %v4515_v40  ;;  %v3723_v62 = vsel %vm6265_vm4, %v5699_v35, %v3722_v26  ;;  %v5427_v56 = vld [vmem:[%s6129_s8 + $0xd0] sm:$0xf] }
 0x23f   : > { %v3407_v18 = vpop.f32.mrf.mxu2  ;;  %v3811_v11 = vunpack.c.l.b16 %v3723_v62  ;;  %v2928_v17 = vpack.c.b16 %v2911_v45, %v2910_v6  ;;  %v2828_v35 = vrot.slane %v5427_v56, 6 }
 0x240   : > { %v4715_v48 = vadd.f32 %v4714_v60, %v4684_v58  ;;  %v3472_v61 = vadd.f32 %v3407_v18, %v3093_v44  ;;  %v3929_v49 = vpop.f32.mrf.mxu3  ;;  %v4245_v60 = vsel %vm6270_vm5, %v5811_v63, %v4244_v12  ;;  %v5795_v12 = vld [vmem:[%s6129_s8 + $0xe8] sm:$0xf]  ;;  %v5682_v58 = vld [vmem:[%s6129_s8 + $0xe4] sm:$0xe]  ;;  %v5684_v44 = vld [vmem:[%s6129_s8 + $0xec] sm:$0x1] }
 0x241   : > { %v3030_v16 = vpop.f32.mrf.mxu1  ;;  %v4333_v26 = vunpack.c.l.b16 %v4245_v60  ;;  %v3829_v63 = vpack.c.b16 %v3812_v59, %v3811_v11  ;;  %v5794_v18 = vld [vmem:[%s6129_s8 + $0xe4] sm:$0xc]  ;;  %v2830_v38 = vrot.slane %v2828_v35, 4  ;;  %v5700_v62 = vrot.slane %v5682_v58, 9 }
 0x242   : > { %v3994_v53 = vadd.f32 %v3929_v49, %v3472_v61  ;;  %v3094_v14 = vadd.f32 %v3030_v16, %v6786_v0  ;;  %v5796_v61 = vld [vmem:[%s6129_s8 + $0xec] sm:$0x3]  ;;  %v4251_v49 = vrot.slane %v5795_v12, 6  ;;  %v3732_v41 = vrot.slane %v5684_v44, 5 }
 0x243   : > { %v4453_v1 = vpop.f32.mrf.mxu0  ;;  %v4351_v46 = vpack.c.b16 %v4334_v8, %v4333_v26  ;;  %v5812_v60 = vrot.slane %v5794_v18, 10  ;;  %v4254_v31 = vrot.slane %v5796_v61, 6 }
 0x244   : > { %v4516_v4 = vadd.f32 %v4451_v28, %v3994_v53  ;;  %v3731_v53 = vrot.slane %v3729_v30, 4  ;;  %v4253_v11 = vrot.slane %v4251_v49, 4 }
 0x246   : > { %4615 = vst [vmem:[%s7085_s7 + $0x50] sm:$0xff] %v4516_v4  ;;  %v4646_v7 = vadd.f32 %v4645_v51, %v4516_v4  ;;  %v4685_v5 = vmul.f32 %v4516_v4, %v4516_v4  ;;  %v5428_v51 = vld [vmem:[%s6129_s8 + $0xd4] sm:$0x3]  ;;  %v4255_v12 = vsel %vm6270_vm5, %v4253_v11, %v4254_v31 }
 0x247   : > { %v3409_v20 = vpop.f32.mrf.mxu2  ;;  %v2831_v16 = vrot.slane %v5428_v51, 6 }
 0x248   : > { %v4716_v28 = vadd.f32 %v4715_v48, %v4685_v5  ;;  %v3473_v9 = vadd.f32 %v3409_v20, %v3094_v14  ;;  %v3931_v40 = vpop.f32.mrf.mxu3  ;;  %v5444_v48 = vrot.slane %v5426_v32, 10  ;;  %v3730_v14 = vsel %vm6265_vm4, %v5700_v62, %v3729_v30 }
 0x249   : > { %v3033_v23 = vpop.f32.mrf.mxu1  ;;  %v2832_v5 = vsel %vm6270_vm5, %v2830_v38, %v2831_v16 }
 0x24a   : > { %v3995_v0 = vadd.f32 %v3931_v40, %v3473_v9  ;;  %v3095_v4 = vadd.f32 %v3033_v23, %v6801_v22  ;;  %v2829_v57 = vsel %vm6270_vm5, %v5444_v48, %v2828_v35  ;;  %v3733_v22 = vsel %vm6265_vm4, %v3731_v53, %v3732_v41 }
 0x24b   : > { %v4456_v36 = vpop.f32.mrf.mxu0  ;;  %v2912_v9 = vunpack.c.l.b16 %v2829_v57  ;;  %v2913_v40 = vunpack.c.l.b16 %v2832_v5  ;;  %v3814_v32 = vunpack.c.l.b16 %v3733_v22  ;;  %v4336_v23 = vunpack.c.l.b16 %v4255_v12 }
 0x24c   : > { %v4517_v21 = vadd.f32 %v4453_v1, %v3995_v0  ;;  %3072 = vmatmul.bf16.gmra.mxu1 %v2928_v17  ;;  %3451 = vmatmul.bf16.gmra.mxu2 %v5958_v3  ;;  %v4252_v17 = vsel %vm6270_vm5, %v5812_v60, %v4251_v49  ;;  %v3813_v3 = vunpack.c.l.b16 %v3730_v14  ;;  %v5959_v0 = vld [vmem:[%s6129_s8 + $0xe4] sm:$0xff]  ;;  %s4900_s8 = sshll.u32 %s7311_s12, 1 }
 0x24d   : > { %3973 = vmatmul.bf16.gmra.mxu3 %v3829_v63  ;;  %v4335_v35 = vunpack.c.l.b16 %v4252_v17  ;;  %v2929_v15 = vpack.c.b16 %v2913_v40, %v2912_v9  ;;  %s260_s11 = scalar_lea.vmem %s7299_s3, %s4900_s8 }
 0x24e   : > { %4495 = vmatmul.bf16.gmra.mxu0 %v4351_v46  ;;  %4616 = vst [vmem:[%s7085_s7 + $0x58] sm:$0xff] %v4517_v21  ;;  %v4647_v6 = vadd.f32 %v4646_v7, %v4517_v21  ;;  %v4686_v45 = vmul.f32 %v4517_v21, %v4517_v21  ;;  %v3830_v18 = vpack.c.b16 %v3814_v32, %v3813_v3 }
 0x24f   : > { %v3412_v59 = vpop.f32.mrf.mxu2  ;;  %v4352_v61 = vpack.c.b16 %v4336_v23, %v4335_v35 }
 0x250   : > { %v4717_v26 = vadd.f32 %v4716_v28, %v4686_v45  ;;  %v3474_v1 = vadd.f32 %v3412_v59, %v3095_v4  ;;  %v3934_v8 = vpop.f32.mrf.mxu3 }
 0x251   : > { %v3035_v56 = vpop.f32.mrf.mxu1 }
 0x252   : > { %v3996_v7 = vadd.f32 %v3934_v8, %v3474_v1  ;;  %v3096_v10 = vadd.f32 %v3035_v56, %v6814_v47 }
 0x253   : > { %v4458_v20 = vpop.f32.mrf.mxu0 }
 0x254   : > { %v4518_v28 = vadd.f32 %v4456_v36, %v3996_v7 }
 0x256   : > { %4617 = vst [vmem:[%s7085_s7 + $0x60] sm:$0xff] %v4518_v28  ;;  %v4648_v30 = vadd.f32 %v4647_v6, %v4518_v28  ;;  %v4687_v63 = vmul.f32 %v4518_v28, %v4518_v28 }
 0x257   : > { %v3414_v46 = vpop.f32.mrf.mxu2 }
 0x258   : > { %v4718_v51 = vadd.f32 %v4717_v26, %v4687_v63  ;;  %v3475_v58 = vadd.f32 %v3414_v46, %v3096_v10  ;;  %v3936_v44 = vpop.f32.mrf.mxu3 }
 0x259   : > { %v3038_v36 = vpop.f32.mrf.mxu1 }
 0x25a   : > { %v3997_v49 = vadd.f32 %v3936_v44, %v3475_v58  ;;  %v3097_v16 = vadd.f32 %v3038_v36, %v6829_v55 }
 0x25b   : > { %v4461_v48 = vpop.f32.mrf.mxu0 }
 0x25c   : > { %v4519_v21 = vadd.f32 %v4458_v20, %v3997_v49  ;;  %3077 = vmatmul.bf16.gmra.mxu1 %v2929_v15  ;;  %3456 = vmatmul.bf16.gmra.mxu2 %v5959_v0 }
 0x25d   : > { %3978 = vmatmul.bf16.gmra.mxu3 %v3830_v18 }
 0x25e   : > { %4500 = vmatmul.bf16.gmra.mxu0 %v4352_v61  ;;  %4618 = vst [vmem:[%s7085_s7 + $0x68] sm:$0xff] %v4519_v21  ;;  %v4649_v47 = vadd.f32 %v4648_v30, %v4519_v21  ;;  %v4688_v38 = vmul.f32 %v4519_v21, %v4519_v21 }
 0x25f   : > { %v3417_v62 = vpop.f32.mrf.mxu2 }
 0x260   : > { %v4719_v53 = vadd.f32 %v4718_v51, %v4688_v38  ;;  %v3476_v41 = vadd.f32 %v3417_v62, %v3097_v16  ;;  %v3939_v60 = vpop.f32.mrf.mxu3 }
 0x261   : > { %v3040_v31 = vpop.f32.mrf.mxu1 }
 0x262   : > { %v3998_v6 = vadd.f32 %v3939_v60, %v3476_v41  ;;  %v3098_v26 = vadd.f32 %v3040_v31, %v6842_v19 }
 0x263   : > { %v4463_v45 = vpop.f32.mrf.mxu0 }
 0x264   : > { %v4520_v4 = vadd.f32 %v4461_v48, %v3998_v6 }
 0x266   : > { %4619 = vst [vmem:[%s7085_s7 + $0x70] sm:$0xff] %v4520_v4  ;;  %v4650_v11 = vadd.f32 %v4649_v47, %v4520_v4  ;;  %v4689_v59 = vmul.f32 %v4520_v4, %v4520_v4 }
 0x267   : > { %v3419_v1 = vpop.f32.mrf.mxu2 }
 0x268   : > { %v4720_v8 = vadd.f32 %v4719_v53, %v4689_v59  ;;  %v3477_v56 = vadd.f32 %v3419_v1, %v3098_v26  ;;  %v3941_v57 = vpop.f32.mrf.mxu3 }
 0x269   : > { %v3043_v5 = vpop.f32.mrf.mxu1 }
 0x26a   : > { %v3999_v55 = vadd.f32 %v3941_v57, %v3477_v56  ;;  %v3099_v17 = vadd.f32 %v3043_v5, %v6857_v37 }
 0x26b   : > { %v4466_v14 = vpop.f32.mrf.mxu0 }
 0x26c   : > { %v4521_v7 = vadd.f32 %v4463_v45, %v3999_v55 }
 0x26e   : > { %4620 = vst [vmem:[%s7085_s7 + $0x78] sm:$0xff] %v4521_v7  ;;  %v4651_v20 = vadd.f32 %v4650_v11, %v4521_v7  ;;  %v4690_v22 = vmul.f32 %v4521_v7, %v4521_v7 }
 0x26f   : > { %v3422_v12 = vpop.f32.mrf.mxu2 }
 0x270   : > { %v4721_v28 = vadd.f32 %v4720_v8, %v4690_v22  ;;  %v3478_v9 = vadd.f32 %v3422_v12, %v3099_v17  ;;  %v3944_v40 = vpop.f32.mrf.mxu3 }
 0x271   : > { %v3045_v3 = vpop.f32.mrf.mxu1 }
 0x272   : > { %v4000_v19 = vadd.f32 %v3944_v40, %v3478_v9  ;;  %v3100_v63 = vadd.f32 %v3045_v3, %v6870_v24 }
 0x273   : > { %v4468_v32 = vpop.f32.mrf.mxu0 }
 0x274   : > { %v4522_v35 = vadd.f32 %v4466_v14, %v4000_v19 }
 0x276   : > { %4621 = vst [vmem:[%s7085_s7 + $0x80] sm:$0xff] %v4522_v35  ;;  %v4652_v23 = vadd.f32 %v4651_v20, %v4522_v35  ;;  %v4691_v30 = vmul.f32 %v4522_v35, %v4522_v35 }
 0x277   : > { %v3424_v10 = vpop.f32.mrf.mxu2 }
 0x278   : > { %v4722_v46 = vadd.f32 %v4721_v28, %v4691_v30  ;;  %v3479_v51 = vadd.f32 %v3424_v10, %v3100_v63  ;;  %v3946_v58 = vpop.f32.mrf.mxu3 }
 0x279   : > { %v3048_v44 = vpop.f32.mrf.mxu1 }
 0x27a   : > { %v4001_v37 = vadd.f32 %v3946_v58, %v3479_v51  ;;  %v3101_v61 = vadd.f32 %v3048_v44, %v6885_v13 }
 0x27b   : > { %v4471_v15 = vpop.f32.mrf.mxu0 }
 0x27c   : > { %v4523_v0 = vadd.f32 %v4468_v32, %v4001_v37 }
 0x27e   : > { %4622 = vst [vmem:[%s7085_s7 + $0x88] sm:$0xff] %v4523_v0  ;;  %v4653_v36 = vadd.f32 %v4652_v23, %v4523_v0  ;;  %v4692_v18 = vmul.f32 %v4523_v0, %v4523_v0 }
 0x27f   : > { %v3427_v49 = vpop.f32.mrf.mxu2 }
 0x280   : > { %v4723_v48 = vadd.f32 %v4722_v46, %v4692_v18  ;;  %v3480_v21 = vadd.f32 %v3427_v49, %v3101_v61  ;;  %v3949_v47 = vpop.f32.mrf.mxu3 }
 0x281   : > { %v3050_v38 = vpop.f32.mrf.mxu1 }
 0x282   : > { %v4002_v24 = vadd.f32 %v3949_v47, %v3480_v21  ;;  %v3102_v60 = vadd.f32 %v3050_v38, %v6898_v33 }
 0x283   : > { %v4473_v16 = vpop.f32.mrf.mxu0 }
 0x284   : > { %v4524_v62 = vadd.f32 %v4471_v15, %v4002_v24 }
 0x286   : > { %4623 = vst [vmem:[%s7085_s7 + $0x90] sm:$0xff] %v4524_v62  ;;  %v4654_v53 = vadd.f32 %v4653_v36, %v4524_v62  ;;  %v4693_v41 = vmul.f32 %v4524_v62, %v4524_v62 }
 0x287   : > { %v3429_v31 = vpop.f32.mrf.mxu2 }
 0x288   : > { %v4724_v6 = vadd.f32 %v4723_v48, %v4693_v41  ;;  %v3481_v45 = vadd.f32 %v3429_v31, %v3102_v60  ;;  %v3951_v4 = vpop.f32.mrf.mxu3 }
 0x289   : > { %v3053_v11 = vpop.f32.mrf.mxu1 }
 0x28a   : > { %v4003_v13 = vadd.f32 %v3951_v4, %v3481_v45  ;;  %v3103_v56 = vadd.f32 %v3053_v11, %v6913_v25 }
 0x28b   : > { %v4476_v59 = vpop.f32.mrf.mxu0 }
 0x28c   : > { %v4525_v26 = vadd.f32 %v4473_v16, %v4003_v13 }
 0x28e   : > { %4624 = vst [vmem:[%s7085_s7 + $0x98] sm:$0xff] %v4525_v26  ;;  %v4655_v1 = vadd.f32 %v4654_v53, %v4525_v26  ;;  %v4694_v8 = vmul.f32 %v4525_v26, %v4525_v26 }
 0x28f   : > { %v3432_v57 = vpop.f32.mrf.mxu2 }
 0x290   : > { %v4725_v5 = vadd.f32 %v4724_v6, %v4694_v8  ;;  %v3482_v55 = vadd.f32 %v3432_v57, %v3103_v56  ;;  %v3954_v14 = vpop.f32.mrf.mxu3 }
 0x291   : > { %v3055_v7 = vpop.f32.mrf.mxu1 }
 0x292   : > { %v4004_v33 = vadd.f32 %v3954_v14, %v3482_v55  ;;  %v3104_v28 = vadd.f32 %v3055_v7, %v6926_v27 }
 0x293   : > { %v4478_v20 = vpop.f32.mrf.mxu0 }
 0x294   : > { %v4526_v22 = vadd.f32 %v4476_v59, %v4004_v33 }
 0x296   : > { %4625 = vst [vmem:[%s7085_s7 + $0xa0] sm:$0xff] %v4526_v22  ;;  %v4656_v17 = vadd.f32 %v4655_v1, %v4526_v22  ;;  %v4695_v12 = vmul.f32 %v4526_v22, %v4526_v22 }
 0x297   : > { %v3434_v9 = vpop.f32.mrf.mxu2 }
 0x298   : > { %v4726_v40 = vadd.f32 %v4725_v5, %v4695_v12  ;;  %v3483_v3 = vadd.f32 %v3434_v9, %v3104_v28  ;;  %v3956_v19 = vpop.f32.mrf.mxu3 }
 0x299   : > { %v3058_v32 = vpop.f32.mrf.mxu1 }
 0x29a   : > { %v4005_v25 = vadd.f32 %v3956_v19, %v3483_v3  ;;  %v3105_v10 = vadd.f32 %v3058_v32, %v6941_v50 }
 0x29b   : > { %v4481_v35 = vpop.f32.mrf.mxu0 }
 0x29c   : > { %v4527_v23 = vadd.f32 %v4478_v20, %v4005_v25 }
 0x29e   : > { %4626 = vst [vmem:[%s7085_s7 + $0xa8] sm:$0xff] %v4527_v23  ;;  %v4657_v30 = vadd.f32 %v4656_v17, %v4527_v23  ;;  %v4696_v63 = vmul.f32 %v4527_v23, %v4527_v23 }
 0x29f   : > { %v3437_v46 = vpop.f32.mrf.mxu2 }
 0x2a0   : > { %v4727_v51 = vadd.f32 %v4726_v40, %v4696_v63  ;;  %v3484_v58 = vadd.f32 %v3437_v46, %v3105_v10  ;;  %v3959_v44 = vpop.f32.mrf.mxu3 }
 0x2a1   : > { %v3060_v37 = vpop.f32.mrf.mxu1 }
 0x2a2   : > { %v4006_v27 = vadd.f32 %v3959_v44, %v3484_v58  ;;  %v3106_v61 = vadd.f32 %v3060_v37, %v6954_v2 }
 0x2a3   : > { %v4483_v15 = vpop.f32.mrf.mxu0 }
 0x2a4   : > { %v4528_v0 = vadd.f32 %v4481_v35, %v4006_v27 }
 0x2a6   : > { %4627 = vst [vmem:[%s7085_s7 + $0xb0] sm:$0xff] %v4528_v0  ;;  %v4658_v36 = vadd.f32 %v4657_v30, %v4528_v0  ;;  %v4697_v18 = vmul.f32 %v4528_v0, %v4528_v0 }
 0x2a7   : > { %v3439_v49 = vpop.f32.mrf.mxu2 }
 0x2a8   : > { %v4728_v48 = vadd.f32 %v4727_v51, %v4697_v18  ;;  %v3485_v21 = vadd.f32 %v3439_v49, %v3106_v61  ;;  %v3961_v47 = vpop.f32.mrf.mxu3 }
 0x2a9   : > { %v3063_v38 = vpop.f32.mrf.mxu1 }
 0x2aa   : > { %v4007_v50 = vadd.f32 %v3961_v47, %v3485_v21  ;;  %v3107_v41 = vadd.f32 %v3063_v38, %v6969_v39 }
 0x2ab   : > { %v4486_v24 = vpop.f32.mrf.mxu0 }
 0x2ac   : > { %v4529_v16 = vadd.f32 %v4483_v15, %v4007_v50 }
 0x2ae   : > { %4628 = vst [vmem:[%s7085_s7 + $0xb8] sm:$0xff] %v4529_v16  ;;  %v4659_v62 = vadd.f32 %v4658_v36, %v4529_v16  ;;  %v4698_v53 = vmul.f32 %v4529_v16, %v4529_v16 }
 0x2af   : > { %v3442_v60 = vpop.f32.mrf.mxu2 }
 0x2b0   : > { %v4729_v31 = vadd.f32 %v4728_v48, %v4698_v53  ;;  %v3486_v6 = vadd.f32 %v3442_v60, %v3107_v41  ;;  %v3964_v45 = vpop.f32.mrf.mxu3 }
 0x2b1   : > { %v3065_v4 = vpop.f32.mrf.mxu1 }
 0x2b2   : > { %v4008_v2 = vadd.f32 %v3964_v45, %v3486_v6  ;;  %v3108_v1 = vadd.f32 %v3065_v4, %v6982_v29 }
 0x2b3   : > { %v4488_v11 = vpop.f32.mrf.mxu0 }
 0x2b4   : > { %v4530_v13 = vadd.f32 %v4486_v24, %v4008_v2 }
 0x2b6   : > { %4629 = vst [vmem:[%s7085_s7 + $0xc0] sm:$0xff] %v4530_v13  ;;  %v4660_v59 = vadd.f32 %v4659_v62, %v4530_v13  ;;  %v4699_v26 = vmul.f32 %v4530_v13, %v4530_v13 }
 0x2b7   : > { %v3444_v8 = vpop.f32.mrf.mxu2 }
 0x2b8   : > { %v4730_v56 = vadd.f32 %v4729_v31, %v4699_v26  ;;  %v3487_v57 = vadd.f32 %v3444_v8, %v3108_v1  ;;  %v3966_v5 = vpop.f32.mrf.mxu3 }
 0x2b9   : > { %v3068_v55 = vpop.f32.mrf.mxu1 }
 0x2ba   : > { %v4009_v39 = vadd.f32 %v3966_v5, %v3487_v57  ;;  %v3109_v22 = vadd.f32 %v3068_v55, %v6997_v42 }
 0x2bb   : > { %v4491_v14 = vpop.f32.mrf.mxu0 }
 0x2bc   : > { %v4531_v7 = vadd.f32 %v4488_v11, %v4009_v39 }
 0x2be   : > { %4630 = vst [vmem:[%s7085_s7 + $0xc8] sm:$0xff] %v4531_v7  ;;  %v4661_v33 = vadd.f32 %v4660_v59, %v4531_v7  ;;  %v4700_v20 = vmul.f32 %v4531_v7, %v4531_v7 }
 0x2bf   : > { %v3447_v17 = vpop.f32.mrf.mxu2 }
 0x2c0   : > { %v4731_v12 = vadd.f32 %v4730_v56, %v4700_v20  ;;  %v3488_v28 = vadd.f32 %v3447_v17, %v3109_v22  ;;  %v3969_v9 = vpop.f32.mrf.mxu3  ;;  %v7305_v56 = vld [vmem:[#allocation3_spill] sm:$0xff] }
 0x2c1   : > { %v3070_v40 = vpop.f32.mrf.mxu1 }
 0x2c2   : > { %v4010_v29 = vadd.f32 %v3969_v9, %v3488_v28  ;;  %v3110_v35 = vadd.f32 %v3070_v40, %v7010_v34 }
 0x2c3   : > { %v4493_v3 = vpop.f32.mrf.mxu0 }
 0x2c4   : > { %v4532_v19 = vadd.f32 %v4491_v14, %v4010_v29 }
 0x2c6   : > { %4631 = vst [vmem:[%s7085_s7 + $0xd0] sm:$0xff] %v4532_v19  ;;  %v4662_v32 = vadd.f32 %v4661_v33, %v4532_v19  ;;  %v4701_v25 = vmul.f32 %v4532_v19, %v4532_v19 }
 0x2c7   : > { %v3449_v23 = vpop.f32.mrf.mxu2 }
 0x2c8   : > { %v4732_v30 = vadd.f32 %v4731_v12, %v4701_v25  ;;  %v3489_v63 = vadd.f32 %v3449_v23, %v3110_v35  ;;  %v3971_v10 = vpop.f32.mrf.mxu3 }
 0x2c9   : > { %v3073_v42 = vpop.f32.mrf.mxu1 }
 0x2ca   : > { %v4011_v46 = vadd.f32 %v3971_v10, %v3489_v63  ;;  %v3111_v27 = vadd.f32 %v3073_v42, %v7025_v54 }
 0x2cb   : > { %v4496_v58 = vpop.f32.mrf.mxu0 }
 0x2cc   : > { %v4533_v51 = vadd.f32 %v4493_v3, %v4011_v46 }
 0x2ce   : > { %4632 = vst [vmem:[%s7085_s7 + $0xd8] sm:$0xff] %v4533_v51  ;;  %v4663_v44 = vadd.f32 %v4662_v32, %v4533_v51  ;;  %v4702_v37 = vmul.f32 %v4533_v51, %v4533_v51 }
 0x2cf   : > { %v3452_v15 = vpop.f32.mrf.mxu2 }
 0x2d0   : > { %v4733_v0 = vadd.f32 %v4732_v30, %v4702_v37  ;;  %v3490_v36 = vadd.f32 %v3452_v15, %v3111_v27  ;;  %v3974_v18 = vpop.f32.mrf.mxu3 }
 0x2d1   : > { %v3075_v34 = vpop.f32.mrf.mxu1 }
 0x2d2   : > { %v4012_v61 = vadd.f32 %v3974_v18, %v3490_v36  ;;  %v3112_v47 = vadd.f32 %v3075_v34, %v7038_v43 }
 0x2d3   : > { %v4498_v38 = vpop.f32.mrf.mxu0 }
 0x2d4   : > { %v4534_v49 = vadd.f32 %v4496_v58, %v4012_v61 }
 0x2d6   : > { %4633 = vst [vmem:[%s7085_s7 + $0xe0] sm:$0xff] %v4534_v49  ;;  %v4664_v48 = vadd.f32 %v4663_v44, %v4534_v49  ;;  %v4703_v21 = vmul.f32 %v4534_v49, %v4534_v49 }
 0x2d7   : > { %v3454_v50 = vpop.f32.mrf.mxu2 }
 0x2d8   : > { %v4734_v24 = vadd.f32 %v4733_v0, %v4703_v21  ;;  %v3491_v16 = vadd.f32 %v3454_v50, %v3112_v47  ;;  %v3976_v62 = vpop.f32.mrf.mxu3 }
 0x2d9   : > { %v3078_v54 = vpop.f32.mrf.mxu1 }
 0x2da   : > { %v4013_v53 = vadd.f32 %v3976_v62, %v3491_v16  ;;  %v3113_v6 = vadd.f32 %v3078_v54, %v7053_v52 }
 0x2db   : > { %v4501_v43 = vpop.f32.mrf.mxu0 }
 0x2dc   : > { %v4535_v41 = vadd.f32 %v4498_v38, %v4013_v53 }
 0x2de   : > { %4634 = vst [vmem:[%s7085_s7 + $0xe8] sm:$0xff] %v4535_v41  ;;  %v4665_v60 = vadd.f32 %v4664_v48, %v4535_v41  ;;  %v4704_v31 = vmul.f32 %v4535_v41, %v4535_v41 }
 0x2df   : > { %v3457_v45 = vpop.f32.mrf.mxu2 }
 0x2e0   : > { %v4735_v4 = vadd.f32 %v4734_v24, %v4704_v31  ;;  %v3492_v2 = vadd.f32 %v3457_v45, %v3113_v6  ;;  %v3979_v11 = vpop.f32.mrf.mxu3 }
 0x2e1   : > { %v3080_v59 = vpop.f32.mrf.mxu1 }
 0x2e2   : > { %v4014_v13 = vadd.f32 %v3979_v11, %v3492_v2  ;;  %v3114_v57 = vadd.f32 %v3080_v59, %v7305_v56 }
 0x2e3   : > { %v4503_v7 = vpop.f32.mrf.mxu0 }
 0x2e4   : > { %v4536_v26 = vadd.f32 %v4501_v43, %v4014_v13 }
 0x2e6   : > { %4635 = vst [vmem:[%s7085_s7 + $0xf0] sm:$0xff] %v4536_v26  ;;  %v4666_v1 = vadd.f32 %v4665_v60, %v4536_v26  ;;  %v4705_v8 = vmul.f32 %v4536_v26, %v4536_v26 }
 0x2e7   : > { %v3459_v5 = vpop.f32.mrf.mxu2 }
 0x2e8   : > { %v4736_v55 = vadd.f32 %v4735_v4, %v4705_v8  ;;  %v3493_v39 = vadd.f32 %v3459_v5, %v3114_v57  ;;  %v3981_v14 = vpop.f32.mrf.mxu3 }
 0x2ea   : > { %v4015_v52 = vadd.f32 %v3981_v14, %v3493_v39 }
 0x2ec   : > { %v4537_v33 = vadd.f32 %v4503_v7, %v4015_v52 }
 0x2ee   : > { %4636 = vst [vmem:[%s7085_s7 + $0xf8] sm:$0xff] %v4537_v33  ;;  %v4667_v20 = vadd.f32 %v4666_v1, %v4537_v33  ;;  %v4706_v22 = vmul.f32 %v4537_v33, %v4537_v33 }
 0x2f0   : > { %v4668_v17 = vrot.slane %v4667_v20, 4  ;;  %v4737_v12 = vadd.f32 %v4736_v55, %v4706_v22 }
 0x2f2   : > { %v4669_v28 = vadd.f32 %v4668_v17, %v4667_v20  ;;  %v4738_v9 = vrot.slane %v4737_v12, 4 }
 0x2f4   : > { %v4670_v40 = vrot.slane %v4669_v28, 2  ;;  %v4739_v29 = vadd.f32 %v4738_v9, %v4737_v12 }
 0x2f6   : > { %v4671_v3 = vadd.f32 %v4670_v40, %v4669_v28  ;;  %v4740_v19 = vrot.slane %v4739_v29, 2 }
 0x2f8   : > { %v4672_v32 = vrot.slane %v4671_v3, 1  ;;  %v4741_v25 = vadd.f32 %v4740_v19, %v4739_v29 }
 0x2fa   : > { %v4673_v35 = vadd.f32 %v4672_v32, %v4671_v3  ;;  %v4742_v23 = vrot.slane %v4741_v25, 1 }
 0x2fc   : > { %4674 = vst [vmem:[%s260_s11] sm:$0x1] %v4673_v35  ;;  %v4743_v30 = vadd.f32 %v4742_v23, %v4741_v25 }
 0x2fe   : > { %4744 = vst [vmem:[%s260_s11 + $0x1] sm:$0x1] %v4743_v30 }
 0x2ff PF: > { %s14_s14 = sadd.s32 1, %s6055_s14   ;;  %s7306_s12 = smov %s6051_s13 }
 0x300   : > { %p11_p5 = scmp.ge.s32.totalorder %s14_s14, 4   ;;  %s7307_s13 = smov %s7309_s15 }
 0x302   :  { %13 = sbr.rel (!%p11_p5) target bundleno = 2 (0x2), region = 91 }

</bundles_post_ra>
